<compile_context>
chip_gen: v6e
topology: v6e:2x2x1
jax: 0.10.0
libtpu: 0.0.40
codegen_flags: <defaults>
</compile_context>

<pallas_src>
import math
from functools import partial

import jax
import jax.numpy as jnp
from jax import lax
from jax.experimental import pallas as pl
from jax.experimental.pallas import tpu as pltpu


def _round_up(x, m):
    return ((x + m - 1) // m) * m


# --------------------------- hash-based dropout mask -------------------------


def _keep_mask(lin_idx, seed, p):
    """Counter-based keep mask.

    hash(lin_idx, seed) is ~uniform over [0, 2^32); keep iff hash >= p * 2^32, i.e.
    P(keep) = 1 - p.  Pure integer jnp ops, so it lowers identically inside the Pallas
    kernel (Mosaic or interpreter) and in plain JAX (used for the reference).
    NOTE: lin_idx is int32; masks alias if N*C*Hp*Wp exceeds 2^31 (fine at these sizes).
    """
    thresh = jnp.uint32(min(int(float(p) * 4294967296.0), 4294967295))
    s = lin_idx.astype(jnp.uint32) ^ (seed.astype(jnp.uint32) * jnp.uint32(0x9E3779B9))
    # "lowbias32" integer finalizer
    s = s ^ (s >> jnp.uint32(16))
    s = s * jnp.uint32(0x7FEB352D)
    s = s ^ (s >> jnp.uint32(15))
    s = s * jnp.uint32(0x846CA68B)
    s = s ^ (s >> jnp.uint32(16))
    return s >= thresh


# ------------------------------ fused Pallas kernel ---------------------------


def _dropout_conv_kernel(seed_ref, x_ref, w_ref, o_ref, *,
                         KH, KW, sh, sw, dh, dw, OH, OW, C, Hp, Wp, M, Mp,
                         p, mode, per_tap):
    """One image per grid step: fused dropout + in-VMEM im2col + GEMM.

    x_ref : (1, Hp, Wp, C)   padded NHWC image, f32
    w_ref : (K, OCp)         weight, bf16; K = KH*KW*C, rows ordered (ki, kj, c)
    o_ref : (1, OCp, Mp)     f32 output, NCHW-native: OC on sublanes, M on lanes
    mode  : 0 = no dropout, 1 = 'vanilla' (per element), 2 = 'vanilla_2d' (per (n, c))
    """
    x = x_ref[0]                                            # (Hp, Wp, C) f32

    if mode != 0 and p > 0.0:
        n = pl.program_id(0)
        scale = jnp.float32(1.0 / (1.0 - p))
        if mode == 1:
            # iid Bernoulli per input element
            h_idx = lax.broadcasted_iota(jnp.int32, (Hp, Wp, C), 0)
            w_idx = lax.broadcasted_iota(jnp.int32, (Hp, Wp, C), 1)
            c_idx = lax.broadcasted_iota(jnp.int32, (Hp, Wp, C), 2)
            lin = ((n * Hp + h_idx) * Wp + w_idx) * C + c_idx
            keep = _keep_mask(lin, seed_ref[0], p)
            x = jnp.where(keep, x * scale, jnp.float32(0.0))
        else:
            # 'vanilla_2d': one decision per (image, channel) -> hash only a (1,1,C)
            # iota; broadcast the resulting f32 scale into a single multiply.
            lin = n * C + lax.broadcasted_iota(jnp.int32, (1, 1, C), 2)
            keep_c = _keep_mask(lin, seed_ref[0], p)                  # (1, 1, C) bool
            x = x * jnp.where(keep_c, scale, jnp.float32(0.0))        # f32 broadcast

    # Cast early: halves VMEM footprint / relayout traffic of every window slice and
    # of the patch temporary (MXU consumes bf16 anyway; accumulation stays f32).
    xb = x.astype(jnp.bfloat16)

    he = (OH - 1) * sh + 1                                  # window row extent
    we = (OW - 1) * sw + 1                                  # window col extent

    def window(ki, kj):
        win = xb[ki * dh: ki * dh + he: sh, kj * dw: kj * dw + we: sw, :]  # (OH,OW,C)
        return win.reshape(OH * OW, C)                      # (M, C)

    ocp = w_ref.shape[1]
    if per_tap:
        # Large C (>=128): accumulate KH*KW matmuls with K = C (aligned weight row
        # slices); no lane-axis concat relayouts, no (M, K) temporary in VMEM.
        acc = jnp.zeros((M, ocp), jnp.float32)
        for ki in range(KH):
            for kj in range(KW):
                t = ki * KW + kj
                acc = acc + jnp.dot(window(ki, kj), w_ref[t * C:(t + 1) * C, :],
                                    preferred_element_type=jnp.float32)
    else:
        # Small C: fused K = KH*KW*C contraction (per-tap K=C would starve the MXU).
        patches = jnp.concatenate(
            [window(ki, kj) for ki in range(KH) for kj in range(KW)], axis=1)  # (M, K)
        acc = jnp.dot(patches, w_ref[...], preferred_element_type=jnp.float32)  # (M,OCp)

    # Pad M up to a lane multiple so the transposed store below is unmasked.
    if Mp > M:
        acc = jnp.concatenate([acc, jnp.zeros((Mp - M, ocp), jnp.float32)], axis=0)

    # NCHW-native store: OC on sublanes, M (128-multiple) lane-dense on lanes.
    o_ref[0] = jnp.transpose(acc, (1, 0)).astype(o_ref.dtype)


# --------------------------------- wrapper ------------------------------------


def dropout_conv2d_forward(x, weight, *, stride, padding, dilation, p, mode, seed):
    """NCHW input, (OC, IC, KH, KW) weight -> NCHW output (PyTorch semantics)."""
    N, C, H, W = x.shape
    OC, _, KH, KW = weight.shape
    sh, sw = stride
    ph, pw = padding
    dh, dw = dilation
    Hp, Wp = H + 2 * ph, W + 2 * pw
    OH = (Hp - dh * (KH - 1) - 1) // sh + 1
    OW = (Wp - dw * (KW - 1) - 1) // sw + 1
    M = OH * OW
    K = KH * KW * C

    if mode != 0 and p >= 1.0:            # degenerate: dropout keeps nothing
        return jnp.zeros((N, OC, OH, OW), x.dtype)

    Mp = _round_up(M, 128)                # output lane axis -> unmasked stores
    # OC is only a sublane axis now: pad to 8 (not 128 -> no 16x writeback at OC=8);
    # bump to 256-granularity for large OC to match the 256-wide v6e/v7x MXU.
    OCp = _round_up(OC, 256) if OC > 128 else _round_up(OC, 8)
    per_tap = C >= 128

    # Single NCHW->NHWC layout change + spatial zero-pad (one fused XLA pass in HBM;
    # the ~KH*KW x patch expansion only ever exists in VMEM inside the kernel).
    # TODO(synk): for tiny C, ship x packed as (N, Hp, Wp*C) (lane-dense DMA, no 128/C
    # VMEM tile inflation); needs a minor-dim-splitting reshape or a manual im2col DMA
    # in-kernel, so it is deferred from this revision.
    x_pad = jnp.pad(jnp.transpose(x, (0, 2, 3, 1)),
                    ((0, 0), (ph, ph), (pw, pw), (0, 0)))
    # weight (OC, C, KH, KW) -> (KH, KW, C, OC) -> (K, OCp) bf16 (matches patch order).
    w_mat = jnp.transpose(weight, (2, 3, 1, 0)).reshape(K, OC).astype(jnp.bfloat16)
    w_mat = jnp.pad(w_mat, ((0, 0), (0, OCp - OC)))
    seed_arr = jnp.asarray([seed], dtype=jnp.int32)

    kernel = partial(_dropout_conv_kernel, KH=KH, KW=KW, sh=sh, sw=sw, dh=dh, dw=dw,
                     OH=OH, OW=OW, C=C, Hp=Hp, Wp=Wp, M=M, Mp=Mp,
                     p=float(p), mode=int(mode), per_tap=per_tap)

    cost = pl.CostEstimate(
        flops=2 * N * Mp * K * OCp,
        transcendentals=0,
        bytes_accessed=int(x_pad.size) * 4 + int(w_mat.size) * 2 + N * OCp * Mp * 4)

    # TODO(synk): v7x (64 MiB VMEM, 2 TCs): add a second grid axis tiling OH into
    # overlapping row bands (manual make_async_copy) plus an explicit vmem_limit_bytes
    # budget, so large images fit and both cores get work when N is small/odd.
    # TODO(synk): the weight block has a constant index_map and is never re-fetched;
    # single-buffer it (pipeline_mode=pl.Buffered(1)) to reclaim K*OCp*2 B of VMEM.
    out = pl.pallas_call(
        kernel,
        out_shape=jax.ShapeDtypeStruct((N, OCp, Mp), jnp.float32),
        grid_spec=pltpu.PrefetchScalarGridSpec(
            num_scalar_prefetch=1,
            grid=(N,),
            in_specs=[
                pl.BlockSpec((1, Hp, Wp, C), lambda n, seed: (n, 0, 0, 0)),
                pl.BlockSpec((K, OCp), lambda n, seed: (0, 0)),
            ],
            out_specs=pl.BlockSpec((1, OCp, Mp), lambda n, seed: (n, 0, 0)),
        ),
        compiler_params=pltpu.CompilerParams(dimension_semantics=("parallel",)),
        cost_estimate=cost,
    )(seed_arr, x_pad, w_mat)

    # NCHW-native kernel output: only a cheap slice + reshape remains in XLA
    # (no transpose, no 128-wide OC padding round-tripped through HBM).
    return out[:, :OC, :M].reshape(N, OC, OH, OW)


# ----------------------------- pure-JAX reference ------------------------------


def reference_forward(x, weight, *, stride, padding, dilation, p, mode, seed):
    """Reference: identical hash-based dropout (if any) + XLA conv in f32 HIGHEST."""
    N, C, H, W = x.shape
    sh, sw = stride
    ph, pw = padding
    dh, dw = dilation
    if mode != 0 and p > 0.0:
        Hp, Wp = H + 2 * ph, W + 2 * pw
        xp = jnp.pad(jnp.transpose(x, (0, 2, 3, 1)),
                     ((0, 0), (ph, ph), (pw, pw), (0, 0)))
        if mode == 1:
            lin = jnp.arange(N * Hp * Wp * C, dtype=jnp.int32).reshape(N, Hp, Wp, C)
        else:
            lin = (jnp.arange(N, dtype=jnp.int32)[:, None, None, None] * C
                   + jnp.arange(C, dtype=jnp.int32)[None, None, None, :])
            lin = jnp.broadcast_to(lin, (N, Hp, Wp, C))
        keep = _keep_mask(lin, jnp.int32(seed), p)
        xp = jnp.where(keep, xp * (1.0 / (1.0 - p)), 0.0)
        x_in = jnp.transpose(xp, (0, 3, 1, 2))
        pad_spec = [(0, 0), (0, 0)]
    else:
        x_in = x
        pad_spec = [(ph, ph), (pw, pw)]
    return lax.conv_general_dilated(
        x_in, weight, window_strides=(sh, sw), padding=pad_spec,
        rhs_dilation=(dh, dw), dimension_numbers=("NCHW", "OIHW", "NCHW"),
        precision=lax.Precision.HIGHEST)


# ----------------------------- module equivalent --------------------------------


class DropoutConv2d:
    """JAX/Pallas equivalent of the PyTorch DropoutConv2d module (forward only)."""

    def __init__(self, in_channels, out_channels, kernel_size,
                 stride=(1, 1), padding=(0, 0), dilation=(1, 1),
                 p=0.1, variant="vanilla", *, key):
        self.in_channels = in_channels
        self.out_channels = out_channels
        self.kernel_size = tuple(kernel_size)
        self.stride = tuple(stride)
        self.padding = tuple(padding)
        self.dilation = tuple(dilation)
        self.p = float(p)
        self.variant = variant
        # kaiming_uniform_(a=sqrt(5)) == uniform(-1/sqrt(fan_in), 1/sqrt(fan_in))
        fan_in = in_channels * self.kernel_size[0] * self.kernel_size[1]
        bound = 1.0 / math.sqrt(fan_in)
        self.weight = jax.random.uniform(
            key, (out_channels, in_channels, *self.kernel_size),
            dtype=jnp.float32, minval=-bound, maxval=bound)

    def _mode(self, training):
        if not training:
            return 0
        if self.variant in ("none", "im2col"):
            # TODO(synk): flash_dropout's 'im2col' training variant drops each
            # replicated patch element independently (F.im2col_conv2d); here it is
            # mapped to a plain conv, which changes training-time semantics for it.
            return 0
        if self.variant == "vanilla":
            return 1
        if self.variant == "vanilla_2d":
            return 2
        raise ValueError(f"unknown variant {self.variant}")

    def __call__(self, x, *, training=True, dropout_seed=0):
        return dropout_conv2d_forward(
            x, self.weight, stride=self.stride, padding=self.padding,
            dilation=self.dilation, p=self.p, mode=self._mode(training),
            seed=dropout_seed)


# ---------------------------------- main ----------------------------------------


if __name__ == "__main__":
    key = jax.random.PRNGKey(0)
    kx, kw = jax.random.split(key)

    N, C, H, W = 2, 4, 16, 16
    OC, KH, KW = 8, 3, 3

    x = jax.random.normal(kx, (N, C, H, W), dtype=jnp.float32)
    layer = DropoutConv2d(C, OC, (KH, KW), p=0.1, variant="vanilla", key=kw)

    # 1) eval-mode path (no dropout): fused Pallas conv vs XLA conv
    y_eval = layer(x, training=False)
    jax.block_until_ready(y_eval)
    ref_eval = reference_forward(x, layer.weight, stride=(1, 1), padding=(0, 0),
                                 dilation=(1, 1), p=0.1, mode=0, seed=0)
    assert y_eval.shape == ref_eval.shape == (N, OC, H - KH + 1, W - KW + 1)
    assert jnp.allclose(y_eval, ref_eval, atol=3e-2, rtol=3e-2), float(
        jnp.max(jnp.abs(y_eval - ref_eval)))

    # 2) training path, variant='vanilla': fused dropout+conv vs identical-mask reference
    y_tr = layer(x, training=True, dropout_seed=42)
    jax.block_until_ready(y_tr)
    ref_tr = reference_forward(x, layer.weight, stride=(1, 1), padding=(0, 0),
                               dilation=(1, 1), p=0.1, mode=1, seed=42)
    assert y_tr.shape == ref_tr.shape
    assert jnp.isfinite(y_tr).all()
    assert jnp.allclose(y_tr, ref_tr, atol=3e-2, rtol=3e-2), float(
        jnp.max(jnp.abs(y_tr - ref_tr)))

    # 3) training path, variant='vanilla_2d': channelwise dropout
    layer2d = DropoutConv2d(C, OC, (KH, KW), p=0.25, variant="vanilla_2d", key=kw)
    y2d = layer2d(x, training=True, dropout_seed=7)
    jax.block_until_ready(y2d)
    ref2d = reference_forward(x, layer2d.weight, stride=(1, 1), padding=(0, 0),
                              dilation=(1, 1), p=0.25, mode=2, seed=7)
    assert jnp.allclose(y2d, ref2d, atol=3e-2, rtol=3e-2), float(
        jnp.max(jnp.abs(y2d - ref2d)))

    print("KERNEL_OK")
</pallas_src>

<mosaic_0001>
module attributes {stable_mosaic.version = 11 : i64} {
  func.func @_dropout_conv_kernel(%arg0: i32, %arg1: memref<1xi32, #tpu.memory_space<smem>>, %arg2: memref<1x16x16x4xf32, #tpu.memory_space<vmem>>, %arg3: memref<36x8xbf16, #tpu.memory_space<vmem>>, %arg4: memref<1x8x256xf32, #tpu.memory_space<vmem>>) attributes {dimension_semantics = [#tpu.dimension_semantics<parallel>], iteration_bounds = array<i64: 2>, scalar_prefetch = 1 : i64, scratch_operands = 0 : i64, tpu.core_type = #tpu.core_type<tc>, window_params = [{transform_indices = @transform_0, window_bounds = array<i64: 1, 16, 16, 4>}, {pipeline_mode = #tpu.pipeline_mode<synchronous>, transform_indices = @transform_1, window_bounds = array<i64: 36, 8>}, {transform_indices = @transform_2, window_bounds = array<i64: 1, 8, 256>}]} {
    %c0 = arith.constant 0 : index
    %c0_0 = arith.constant 0 : index
    %c0_1 = arith.constant 0 : index
    %c0_2 = arith.constant 0 : index
    %0 = vector.load %arg2[%c0, %c0_0, %c0_1, %c0_2] : memref<1x16x16x4xf32, #tpu.memory_space<vmem>>, vector<1x16x16x4xf32>
    %1 = vector.shape_cast %0 : vector<1x16x16x4xf32> to vector<16x16x4xf32>
    %2 = arith.truncf %1 : vector<16x16x4xf32> to vector<16x16x4xbf16>
    %3 = vector.extract_strided_slice %2 {offsets = [0, 0, 0], sizes = [14, 14, 4], strides = [1, 1, 1]} : vector<16x16x4xbf16> to vector<14x14x4xbf16>
    %4 = vector.shape_cast %3 : vector<14x14x4xbf16> to vector<196x4xbf16>
    %5 = vector.extract_strided_slice %2 {offsets = [0, 1, 0], sizes = [14, 14, 4], strides = [1, 1, 1]} : vector<16x16x4xbf16> to vector<14x14x4xbf16>
    %6 = vector.shape_cast %5 : vector<14x14x4xbf16> to vector<196x4xbf16>
    %7 = vector.extract_strided_slice %2 {offsets = [0, 2, 0], sizes = [14, 14, 4], strides = [1, 1, 1]} : vector<16x16x4xbf16> to vector<14x14x4xbf16>
    %8 = vector.shape_cast %7 : vector<14x14x4xbf16> to vector<196x4xbf16>
    %9 = vector.extract_strided_slice %2 {offsets = [1, 0, 0], sizes = [14, 14, 4], strides = [1, 1, 1]} : vector<16x16x4xbf16> to vector<14x14x4xbf16>
    %10 = vector.shape_cast %9 : vector<14x14x4xbf16> to vector<196x4xbf16>
    %11 = vector.extract_strided_slice %2 {offsets = [1, 1, 0], sizes = [14, 14, 4], strides = [1, 1, 1]} : vector<16x16x4xbf16> to vector<14x14x4xbf16>
    %12 = vector.shape_cast %11 : vector<14x14x4xbf16> to vector<196x4xbf16>
    %13 = vector.extract_strided_slice %2 {offsets = [1, 2, 0], sizes = [14, 14, 4], strides = [1, 1, 1]} : vector<16x16x4xbf16> to vector<14x14x4xbf16>
    %14 = vector.shape_cast %13 : vector<14x14x4xbf16> to vector<196x4xbf16>
    %15 = vector.extract_strided_slice %2 {offsets = [2, 0, 0], sizes = [14, 14, 4], strides = [1, 1, 1]} : vector<16x16x4xbf16> to vector<14x14x4xbf16>
    %16 = vector.shape_cast %15 : vector<14x14x4xbf16> to vector<196x4xbf16>
    %17 = vector.extract_strided_slice %2 {offsets = [2, 1, 0], sizes = [14, 14, 4], strides = [1, 1, 1]} : vector<16x16x4xbf16> to vector<14x14x4xbf16>
    %18 = vector.shape_cast %17 : vector<14x14x4xbf16> to vector<196x4xbf16>
    %19 = vector.extract_strided_slice %2 {offsets = [2, 2, 0], sizes = [14, 14, 4], strides = [1, 1, 1]} : vector<16x16x4xbf16> to vector<14x14x4xbf16>
    %20 = vector.shape_cast %19 : vector<14x14x4xbf16> to vector<196x4xbf16>
    %21 = tpu.concatenate %4, %6, %8, %10, %12, %14, %16, %18, %20 in 1 : vector<196x4xbf16>, vector<196x4xbf16>, vector<196x4xbf16>, vector<196x4xbf16>, vector<196x4xbf16>, vector<196x4xbf16>, vector<196x4xbf16>, vector<196x4xbf16>, vector<196x4xbf16> -> vector<196x36xbf16>
    %c0_3 = arith.constant 0 : index
    %c0_4 = arith.constant 0 : index
    %22 = vector.load %arg3[%c0_3, %c0_4] : memref<36x8xbf16, #tpu.memory_space<vmem>>, vector<36x8xbf16>
    %cst = arith.constant dense<0.000000e+00> : vector<196x8xf32>
    %23 = tpu.matmul %21, %22, %cst {dimension_numbers = #tpu.dot_dimension_numbers<[1], [0], [0], [1], [0, 0, 1, 1], [], []>} : vector<196x36xbf16>, vector<36x8xbf16>, vector<196x8xf32> -> vector<196x8xf32>
    %cst_5 = arith.constant 0.000000e+00 : f32
    %24 = vector.broadcast %cst_5 : f32 to vector<60x8xf32>
    %25 = tpu.concatenate %23, %24 in 0 : vector<196x8xf32>, vector<60x8xf32> -> vector<256x8xf32>
    %26 = tpu.transpose %25, [1, 0] : vector<256x8xf32> -> vector<8x256xf32>
    %c0_6 = arith.constant 0 : index
    %c0_7 = arith.constant 0 : index
    %c0_8 = arith.constant 0 : index
    %27 = vector.load %arg4[%c0_6, %c0_7, %c0_8] : memref<1x8x256xf32, #tpu.memory_space<vmem>>, vector<1x8x256xf32>
    %28 = vector.shape_cast %27 : vector<1x8x256xf32> to vector<8x256xf32>
    %29 = vector.shape_cast %26 : vector<8x256xf32> to vector<1x8x256xf32>
    tpu.vector_store %arg4[%c0_6, %c0_7, %c0_8], %29 {strides = array<i32>} : memref<1x8x256xf32, #tpu.memory_space<vmem>>, vector<1x8x256xf32>,
    return
  }
  func.func @transform_0(%arg0: i32, %arg1: memref<1xi32, #tpu.memory_space<smem>>) -> (i32, i32, i32, i32) {
    %c0_i32 = arith.constant 0 : i32
    %c0_i32_0 = arith.constant 0 : i32
    %c0_i32_1 = arith.constant 0 : i32
    %c0_i32_2 = arith.constant 0 : i32
    return %arg0, %c0_i32, %c0_i32_0, %c0_i32_1 : i32, i32, i32, i32
  }
  func.func @transform_1(%arg0: i32, %arg1: memref<1xi32, #tpu.memory_space<smem>>) -> (i32, i32) {
    %c0_i32 = arith.constant 0 : i32
    %c0_i32_0 = arith.constant 0 : i32
    %c0_i32_1 = arith.constant 0 : i32
    return %c0_i32, %c0_i32_0 : i32, i32
  }
  func.func @transform_2(%arg0: i32, %arg1: memref<1xi32, #tpu.memory_space<smem>>) -> (i32, i32, i32) {
    %c0_i32 = arith.constant 0 : i32
    %c0_i32_0 = arith.constant 0 : i32
    %c0_i32_1 = arith.constant 0 : i32
    return %arg0, %c0_i32, %c0_i32_0 : i32, i32, i32
  }
}

</mosaic_0001>

<bundles_post_ra>
// kernel: tpu_custom_call.1
= control target key start
LH: loop header
LB: loop body
LE: loop exit
PB: predicated region body
PF: predicated region fallthrough
CT: control target
= control target key end

     0   :  { %9 = vsyncpa [#allocation5], 0  ;;  %s9994_s0 = inlined_call_operand.<no memory space> [shape: s32[1], index: 0, kind: input, shape index: {}]   ;;  %s9995_s1 = inlined_call_operand.vmem [shape: f32[2,16,16,4], index: 1, kind: input, shape index: {}]   ;;  %s9996_s2 = inlined_call_operand.vmem [shape: bf16[36,8], index: 2, kind: input, shape index: {}]   ;;  %s9997_s3 = inlined_call_operand.hbm [shape: f32[2,8,256], index: 3, kind: output, shape index: {}]  }
   0x1   :  { %11 = vsyncpa [#allocation5 + $0x1], 0  ;;  %s6801_s12 = smov 0   ;;  %s6803_s13 = smov 0  }
   0x2   :  { %s6805_s14 = smov 0   ;;  %s6807_s15 = smov 0  }
   0x3 LB: > { %s6822_s0 = sadd.s32 4294967295, %s6767_s15   ;;  %s6385_s16 = sadd.s32 4294967294, %s6767_s15   ;;  %s6767_s15 = sphi %s6807_s15, %s10372_s15   ;;  %s6763_s14 = sphi %s6805_s14, %s10371_s14   ;;  %s6759_s13 = sphi %s6803_s13, %s10370_s13   ;;  %s6755_s12 = sphi %s6801_s12, %s10369_s12  }
   0x4   : > { %s6826_s17 = sadd.s32 1, %s6767_s15   ;;  %s71_s18 = sadd.s32 1, %s6763_s14 }
   0x5   : > { %s68_s19 = ssub.s32 %s6767_s15, %s6826_s17  ;;  %p81_p0 = scmp.ne.s32.totalorder %s6763_s14, %s6759_s13 }
   0x6   : > { %p69_p1 = scmp.eq.s32.totalorder %s68_s19, 0  ;;  %p82_p2 = scmp.eq.s32.totalorder %s6822_s0, 1 }
   0x7   : > { %p87_p3 = scmp.ne.s32.totalorder %s6759_s13, %s6755_s12  ;;  %p88_p4 = scmp.eq.s32.totalorder %s6385_s16, 1 }
   0x8   : > { %s6837_s20 = scalar_select %p69_p1, %s6763_s14, %s71_s18  }
   0x9   : > { %p6839_p5 = por %p82_p2, %p81_p0  ;;  %p6843_p6 = por %p88_p4, %p87_p3 }
   0xa   : > { %p6388_p7 = scmp.ge.s32.totalorder %s6767_s15, 1  ;;  %p117_p8 = scmp.lt.s32.totalorder %s6767_s15, 3 }
   0xc   : > { %p118_p9 = pnand %p6388_p7, %p117_p8 }
   0xe   : > { %121 = sbr.rel (%p118_p9) target bundleno = 859 (0x35b), region = 28 }
  0x13   : > { %p139_p10 = scmp.lt.s32.totalorder %s6822_s0, 1  ;;  %v211_v0 = vlaneseq  ;;  %v6769_v1 = vmov 1966171168   ;;  %vm893_vm0 = vsmask.f32 256  ;;  %s6770_s28 = smov 20  }
  0x14   : > { %v209_v2 = vunpack.c.l.s4 %v6769_v1  ;;  %vm894_vm1 = vsmask.f32 1284  ;;  %vm896_vm2 = vsmask.f32 2312  ;;  %vm898_vm3 = vsmask.f32 3340 }
  0x15   : > { %s140_s23 = scalar_select %p139_p10, %s6822_s0, 1  ;;  %v212_v3 = vshrl.u32 %v211_v0, 7  ;;  %vm900_vm4 = vsmask.f32 4368  ;;  %vm7017_vm5 = vmor %vm893_vm0, %vm894_vm1  ;;  %vm902_vm6 = vsmask.f32 5396 }
  0x16   : > { %v210_v4 = vunpack.c.0.s8 %v209_v2  ;;  %s6771_s29 = smov 12   ;;  %vm7057_vm7 = vmor %vm7017_vm5, %vm896_vm2  ;;  %vm904_vm8 = vsmask.f32 6424  ;;  %s6772_s30 = smov 24   ;;  %vm906_vm10 = vsmask.f32 7452 }
  0x17   : > { %s6572_s24 = sshll.u32 %s140_s23, 8  ;;  %vm899_vm9 = vmor %vm7057_vm7, %vm898_vm3  ;;  %s6773_s4 = smov 8   ;;  %vm6103_vm15 = vcmask 1041408   ;;  %vm5827_vm0 = vcmask 31744   ;;  %vm5867_vm1 = vcmask 64512   ;;  %vm5894_vm2 = vcmask 97280  }
  0x18   : > { %s6854_s27 = scalar_lea.vmem %s9995_s1, %s6572_s24  ;;  %v6856_v5 = vsub.s32 %v210_v4, %v212_v3  ;;  %vm7103_vm11 = vmor %vm899_vm9, %vm900_vm4  ;;  %s6774_s5 = smov 32   ;;  %vm5921_vm3 = vcmask 130048   ;;  %vm5948_vm4 = vcmask 162816   ;;  %vm5975_vm5 = vcmask 195584  }
  0x19   : > { %v149_v6 = vld [vmem:[%s6854_s27 + $0x20] sm:$0xff]  ;;  %v150_v7 = vld [vmem:[%s6854_s27 + $0x28] sm:$0xff]  ;;  %v151_v8 = vld [vmem:[%s6854_s27 + $0x30] sm:$0xff]  ;;  %s6775_s6 = smov 4   ;;  %s6776_s7 = smov 16   ;;  %vm6779_vm7 = vmmov 0  }
  0x1a   : > { %v6862_v9 = vld [vmem:[%s6854_s27 + $0x38] sm:$0xff]  ;;  %v179_v10 = vpack.c.bf16 %v150_v7, %v149_v6  ;;  %v6394_v11 = vpack.c.bf16 %v150_v7, %v150_v7  ;;  %v147_v12 = vld [vmem:[%s6854_s27 + $0x10] sm:$0xff]  ;;  %v6870_v18 = vld [vmem:[%s6854_s27] sm:$0xff]  ;;  %s6777_s8 = smov 28   ;;  %vm6076_vm9 = vcmask 293888   ;;  %s136_s23 = sand.u32 1, %s6759_s13  }
  0x1b   : > { %v148_v13 = vld [vmem:[%s6854_s27 + $0x18] sm:$0xff]  ;;  %v180_v14 = vpack.c.bf16 %v6862_v9, %v151_v8  ;;  %v6395_v15 = vpack.c.bf16 %v6862_v9, %v6862_v9  ;;  %v6873_v19 = vld [vmem:[%s6854_s27 + $0x8] sm:$0xff]  ;;  %v6876_v20 = vld [vmem:[%s6854_s27 + $0x40] sm:$0xff]  ;;  %s6389_s24 = sshll.u32 %s136_s23, 4 }
  0x1c   : > { %v178_v16 = vpack.c.bf16 %v148_v13, %v147_v12  ;;  %v6393_v17 = vpack.c.bf16 %v148_v13, %v148_v13  ;;  %v310_v21 = vrot.slane %v179_v10, %v6856_v5  ;;  %v317_v22 = vrot.slane %v6394_v11, %v6856_v5  ;;  %v6885_v25 = vld [vmem:[%s6854_s27 + $0x48] sm:$0xff]  ;;  %vm903_vm12 = vmor %vm7103_vm11, %vm902_vm6  ;;  %s138_s25 = scalar_lea.vmem [#allocation4], %s6389_s24 }
  0x1d   : > { %v177_v23 = vpack.c.bf16 %v6873_v19, %v6870_v18  ;;  %v6392_v24 = vpack.c.bf16 %v6873_v19, %v6873_v19  ;;  %v358_v26 = vrot.slane %v180_v14, %v6856_v5  ;;  %v181_v29 = vpack.c.bf16 %v6885_v25, %v6876_v20  ;;  %vm905_vm13 = vmor %vm903_vm12, %vm904_vm8  ;;  %s6326_s26 = sshll.u32 %s138_s25, 4  ;;  %s9956_s26 = int_to_ptr.vmem [resolvable:$true] %s6326_s26 }
  0x1e   : > { %v262_v27 = vrot.slane %v178_v16, %v6856_v5  ;;  %v269_v28 = vrot.slane %v6393_v17, %v6856_v5  ;;  %v318_v30 = vcombine.high %v310_v21, %v310_v21  ;;  %v319_v31 = vcombine.high %v317_v22, %v317_v22  ;;  %vm7184_vm14 = vmor %vm905_vm13, %vm906_vm10 }
  0x1f   : > { %v6893_v32 = vrot.slane %v310_v21, %v6856_v5  ;;  %v6896_v33 = vrot.slane %v317_v22, %v6856_v5  ;;  %v366_v34 = vcombine.high %v358_v26, %v358_v26  ;;  %v6899_v35 = vrot.slane %v358_v26, %v6856_v5 }
  0x20   : > { %v270_v36 = vcombine.high %v262_v27, %v262_v27  ;;  %v271_v37 = vcombine.high %v269_v28, %v269_v28  ;;  %v6902_v38 = vrot.slane %v318_v30, %v6856_v5  ;;  %v6905_v39 = vrot.slane %v319_v31, %v6856_v5 }
  0x21   : > { %v6909_v40 = vcombine.high %v6896_v33, %v6896_v33  ;;  %v6912_v41 = vrot.slane %v262_v27, %v6856_v5  ;;  %v6915_v42 = vrot.slane %v366_v34, %v6856_v5  ;;  %v6919_v43 = vcombine.high %v6899_v35, %v6899_v35 }
  0x22   : > { %v6922_v44 = vrot.slane %v269_v28, %v6856_v5  ;;  %v6925_v45 = vrot.slane %v270_v36, %v6856_v5  ;;  %v6521_v46 = vcombine.high %v6893_v32, %v6902_v38  ;;  %v2019_v47 = vcombine.low %v6896_v33, %v6905_v39 }
  0x23   : > { %10111 = vst [vmem:[#allocation7_spill] sm:$0xff] %v6912_v41  ;;  %v2020_v48 = vcombine.low %v6909_v40, %v6899_v35  ;;  %v6541_v49 = vcombine.high %v6896_v33, %v6905_v39  ;;  %v2021_v50 = vcombine.low %v6915_v42, %v6919_v43  ;;  %v6938_v51 = vrot.slane %v271_v37, %v6856_v5 }
  0x24   : > { %v6942_v52 = vcombine.high %v6922_v44, %v6922_v44  ;;  %v6527_v53 = vcombine.high %v6912_v41, %v6925_v45  ;;  %v2028_v54 = vrot.slane %v6521_v46, %v6856_v5  ;;  %v2035_v55 = vrot.slane %v2019_v47, %v6856_v5 }
  0x25   : > { %v2042_v56 = vrot.slane %v2020_v48, %v6856_v5  ;;  %v4807_v57 = vrot.slane %v6541_v49, %v6856_v5  ;;  %v6951_v58 = vrot.slane %v2021_v50, %v6856_v5  ;;  %v3202_v59 = vcombine.low %v6922_v44, %v6938_v51 }
  0x26   : > { %v6956_v60 = vrot.slane %v6527_v53, %v6856_v5  ;;  %v3781_v61 = vcombine.low %v6912_v41, %v6925_v45  ;;  %v2050_v62 = vcombine.low %v2028_v54, %v2035_v55  ;;  %v3782_v63 = vcombine.low %v6942_v52, %v6893_v32 }
  0x27   : > { %v1972_v0 = vcombine.low %v6893_v32, %v6902_v38  ;;  %v5069_v1 = vcombine.low %v2035_v55, %v2042_v56  ;;  %v2051_v2 = vcombine.low %v2042_v56, %v6951_v58  ;;  %v4808_v3 = vcombine.low %v4807_v57, %v6951_v58 }
  0x28   : > { %v3218_v4 = vrot.slane %v3202_v59, %v6856_v5  ;;  %v3789_v6 = vrot.slane %v3781_v61, %v6856_v5  ;;  %v6969_v7 = vrot.slane %v2050_v62, %v6856_v5  ;;  %v3796_v8 = vrot.slane %v3782_v63, %v6856_v5 }
  0x29   : > { %v6973_v10 = vrot.slane %v1972_v0, %v6856_v5  ;;  %v5083_v11 = vrot.slane %v5069_v1, %v6856_v5  ;;  %v6977_v12 = vrot.slane %v2051_v2, %v6856_v5  ;;  %v4815_v13 = vrot.slane %v4808_v3, %v6856_v5 }
  0x2a   : > { %10112 = vst [vmem:[#allocation8_spill] sm:$0xff] %v6969_v7  ;;  %v3797_v14 = vcombine.low %v3789_v6, %v6956_v60  ;;  %v214_v16 = vrot.slane %v177_v23, %v6856_v5  ;;  %v3798_v17 = vcombine.low %v3218_v4, %v3796_v8  ;;  %v221_v19 = vrot.slane %v6392_v24, %v6856_v5 }
  0x2b   : > { %10113 = vst [vmem:[#allocation9_spill] sm:$0xff] %v6973_v10  ;;  %10114 = vst [vmem:[#allocation10_spill] sm:$0xff] %v6977_v12  ;;  %v5068_v18 = vcombine.low %v6973_v10, %v2028_v54  ;;  %v6986_v21 = vcombine.high %v6893_v32, %v6893_v32  ;;  %v4816_v22 = vcombine.low %v6969_v7, %v4815_v13  ;;  %vm6002_vm6 = vcmask 228352  }
  0x2c   : > { %v3805_v27 = vrot.slane %v3797_v14, %v6856_v5  ;;  %v222_v28 = vcombine.high %v214_v16, %v214_v16  ;;  %v3812_v23 = vrot.slane %v3798_v17, %v6856_v5  ;;  %v223_v31 = vcombine.high %v221_v19, %v221_v19 }
  0x2d   : > { %v5076_v30 = vrot.slane %v5068_v18, %v6856_v5  ;;  %v6995_v34 = vrot.slane %v214_v16, %v6856_v5  ;;  %5044 = vrot.lane.b32.xlu0 %v4816_v22, %s6770_s28  ;;  %v6999_v24 = vrot.slane %v221_v19, %v6856_v5  ;;  %v6528_v37 = vcombine.high %v6922_v44, %v6938_v51 }
  0x2e   : > { %v7002_v36 = vrot.slane %v222_v28, %v6856_v5  ;;  %v3204_v46 = vcombine.low %v6902_v38, %v6986_v21  ;;  %v3813_v47 = vcombine.low %v3805_v27, %v3812_v23  ;;  %v7009_v49 = vrot.slane %v223_v31, %v6856_v5 }
  0x2f   : > { %10115 = vst [vmem:[#allocation11_spill] sm:$0xff] %v6995_v34  ;;  %10116 = vst [vmem:[#allocation12_spill] sm:$0xff] %v6999_v24  ;;  %v5084_v48 = vcombine.low %v5076_v30, %v5083_v11  ;;  %v7013_v50 = vcombine.high %v6995_v34, %v6995_v34  ;;  %v7023_v54 = vcombine.high %v6999_v24, %v6999_v24  ;;  %vm6029_vm8 = vcmask 261120  }
  0x30   : > { %10117 = vst [vmem:[#allocation13_spill] sm:$0xff] %v7002_v36  ;;  %10118 = vst [vmem:[#allocation14_spill] sm:$0xff] %v7009_v49  ;;  %v7027_v55 = vcombine.high %v7002_v36, %v7002_v36  ;;  %v3225_v56 = vrot.slane %v6528_v37, %v6856_v5  ;;  %v7031_v57 = vrot.slane %v3204_v46, %v6856_v5  ;;  %4128 = vrot.lane.b32.xlu1 %v3813_v47, %s6771_s29  ;;  %vm6243_vm10 = vcmask 1043456  }
  0x31   : > { %10121 = vst [vmem:[#allocation15_spill] sm:$0xff] %v7023_v54  ;;  %v7036_v59 = vcombine.high %v7009_v49, %v7009_v49  ;;  %v3152_v61 = vcombine.low %v7002_v36, %v7013_v50  ;;  %v3233_v62 = vcombine.low %v6956_v60, %v3218_v4  ;;  %v7043_v63 = vcombine.high %v6912_v41, %v6912_v41 }
  0x32   : > { %v3153_v0 = vcombine.low %v7027_v55, %v6999_v24  ;;  %v3154_v1 = vcombine.low %v7009_v49, %v7023_v54  ;;  %v3234_v2 = vcombine.low %v3225_v56, %v7031_v57  ;;  %v7052_v3 = vcombine.high %v6925_v45, %v6925_v45 }
  0x33   : > { %v3155_v6 = vcombine.low %v7036_v59, %v6925_v45  ;;  %v3162_v8 = vrot.slane %v3152_v61, %v6856_v5  ;;  %v3241_v11 = vrot.slane %v3233_v62, %v6856_v5  ;;  %v7071_v17 = vcombine.high %v6938_v51, %v6938_v51 }
  0x34   : > { %v3169_v13 = vrot.slane %v3153_v0, %v6856_v5  ;;  %v3176_v14 = vrot.slane %v3154_v1, %v6856_v5  ;;  %v3248_v16 = vrot.slane %v3234_v2, %v6856_v5  ;;  %5319 = vrot.lane.b32.xlu1 %v5084_v48, %s6772_s30  ;;  %v1969_v19 = vcombine.low %v6925_v45, %v7043_v63 }
  0x35   : > { %v3183_v18 = vrot.slane %v3155_v6, %v6856_v5  ;;  %v1970_v22 = vcombine.low %v7052_v3, %v6922_v44  ;;  %v1971_v27 = vcombine.low %v6938_v51, %v6942_v52  ;;  %v4783_v31 = vcombine.low %v7071_v17, %v6902_v38 }
  0x36   : > { %v3184_v28 = vcombine.low %v3162_v8, %v3169_v13  ;;  %v3249_v23 = vcombine.low %v3241_v11, %v3248_v16  ;;  %v1979_v46 = vrot.slane %v1969_v19, %v6856_v5  ;;  %v7096_v61 = vcombine.high %v6902_v38, %v6902_v38 }
  0x37   : > { %v3185_v37 = vcombine.low %v3176_v14, %v3183_v18  ;;  %v1986_v47 = vrot.slane %v1970_v22, %v6856_v5  ;;  %v7090_v48 = vrot.slane %v1971_v27, %v6856_v5  ;;  %v4790_v56 = vrot.slane %v4783_v31, %v6856_v5 }
  0x38   : > { %v3192_v53 = vrot.slane %v3184_v28, %v6856_v5  ;;  %v7100_v62 = vcombine.high %v6905_v39, %v6905_v39  ;;  %3757 = vrot.lane.b32.xlu1 %v3249_v23, %s6773_s4  ;;  %v3251_v60 = vcombine.low %v6905_v39, %v6909_v40  ;;  %v3814_v6 = vcombine.low %v6899_v35, %v6915_v42 }
  0x39   : > { %10124 = vst [vmem:[#allocation16_spill] sm:$0xff] %v7090_v48  ;;  %v3199_v1 = vrot.slane %v3185_v37, %v6856_v5  ;;  %v2001_v2 = vcombine.low %v1979_v46, %v1986_v47  ;;  %v4791_v8 = vcombine.low %v7090_v48, %v4790_v56  ;;  %v3250_v13 = vcombine.low %v7096_v61, %v6896_v33 }
  0x3a   : > { %v3252_v14 = vcombine.low %v7100_v62, %v6915_v42  ;;  %v7123_v19 = vrot.slane %v3251_v60, %v6856_v5  ;;  %v3821_v22 = vrot.slane %v3814_v6, %v6856_v5  ;;  %v365_v31 = vrot.slane %v6395_v15, %v6856_v5 }
  0x3b   : > { %v3200_v16 = vcombine.low %v3192_v53, %v3199_v1  ;;  %v7120_v18 = vrot.slane %v2001_v2, %v6856_v5  ;;  %v4798_v27 = vrot.slane %v4791_v8, %v6856_v5  ;;  %v7131_v28 = vrot.slane %v3250_v13, %v6856_v5 }
  0x3c   : > { %v7134_v23 = vrot.slane %v3252_v14, %v6856_v5  ;;  %v3823_v37 = vcombine.low %v7123_v19, %v3821_v22  ;;  %v7144_v46 = vcombine.high %v6915_v42, %v6915_v42  ;;  %v6396_v47 = vpack.c.bf16 %v6885_v25, %v6885_v25 }
  0x3d   : > { %10127 = vst [vmem:[#allocation17_spill] sm:$0xff] %v7120_v18  ;;  %3755 = vrot.lane.b32.xlu0 %v3200_v16, %s6773_s4  ;;  %v406_v53 = vrot.slane %v181_v29, %v6856_v5  ;;  %v4799_v56 = vcombine.low %v7120_v18, %v4798_v27  ;;  %v3822_v9 = vcombine.low %v7031_v57, %v7131_v28  ;;  %v909_v22 = vshrl.u32 %v6995_v34, 16 }
  0x3e   : > { %v5638_v15 = vcombine.low %v7123_v19, %v7134_v23  ;;  %v367_v0 = vcombine.high %v365_v31, %v365_v31  ;;  %v3837_v1 = vrot.slane %v3823_v37, %v6856_v5  ;;  %v7160_v2 = vrot.slane %v365_v31, %v6856_v5 }
  0x3f   : > { %v7163_v60 = vrot.slane %v6396_v47, %v6856_v5  ;;  %v414_v20 = vcombine.high %v406_v53, %v406_v53  ;;  %v3830_v25 = vrot.slane %v3822_v9, %v6856_v5  ;;  %v7171_v6 = vrot.slane %v406_v53, %v6856_v5 }
  0x40   : > { %v5645_v29 = vrot.slane %v5638_v15, %v6856_v5  ;;  %v7168_v57 = vrot.slane %v367_v0, %v6856_v5  ;;  %v7176_v8 = vcombine.high %v7160_v2, %v7160_v2  ;;  %v2067_v14 = vcombine.low %v7144_v46, %v7160_v2 }
  0x41   : > { %5042 = vrot.lane.b32.xlu0 %v4799_v56, %s6770_s28  ;;  %v7179_v13 = vrot.slane %v414_v20, %v6856_v5  ;;  %v3838_v31 = vcombine.low %v3830_v25, %v3837_v1  ;;  %v914_v37 = vshll.u32 %v7002_v36, 16  ;;  %v917_v47 = vshrl.u32 %v7002_v36, 16 }
  0x42   : > { %v5646_v27 = vcombine.low %v3830_v25, %v5645_v29  ;;  %v2068_v53 = vcombine.low %v7168_v57, %v7176_v8  ;;  %v7196_v9 = vrot.slane %v2067_v14, %v6856_v5  ;;  %v922_v15 = vshll.u32 %v7013_v50, 16 }
  0x43   : > { %v2069_v56 = vcombine.low %v7171_v6, %v7179_v13  ;;  %v916_v0 = vsel %vm7184_vm14, %v909_v22, %v914_v37  ;;  %v925_v1 = vshrl.u32 %v7013_v50, 16  ;;  %v930_v20 = vshll.u32 %v7027_v55, 16 }
  0x44   : > { %5801 = vrot.lane.b32.xlu1 %v5646_v27, %s6774_s5  ;;  %v933_v25 = vshrl.u32 %v7027_v55, 16  ;;  %v7207_v29 = vrot.slane %v2068_v53, %v6856_v5  ;;  %v5085_v27 = vcombine.low %v6951_v58, %v7196_v9  ;;  %v924_v22 = vsel %vm7184_vm14, %v917_v47, %v922_v15 }
  0x45   : > { %4130 = vrot.lane.b32.xlu0 %v3838_v31, %s6771_s29  ;;  %v7210_v14 = vrot.slane %v2069_v56, %v6856_v5  ;;  %v932_v50 = vsel %vm7184_vm14, %v925_v1, %v930_v20  ;;  %v938_v37 = vshll.u32 %v6999_v24, 16  ;;  %v941_v55 = vshrl.u32 %v6999_v24, 16 }
  0x46   : > { %v946_v31 = vshll.u32 %v7009_v49, 16  ;;  %v5093_v56 = vrot.slane %v5085_v27, %v6856_v5  ;;  %v949_v26 = vshrl.u32 %v7009_v49, 16  ;;  %v954_v58 = vshll.u32 %v7023_v54, 16 }
  0x47   : > { %10130 = vst [vmem:[#allocation18_spill] sm:$0xff] %v7210_v14  ;;  %v5086_v53 = vcombine.low %v7207_v29, %v7210_v14  ;;  %v940_v47 = vsel %vm7184_vm14, %v933_v25, %v938_v37  ;;  %v957_v1 = vshrl.u32 %v7023_v54, 16  ;;  %v966_v20 = vshrl.u32 %v6912_v41, 16 }
  0x48   : > { %v948_v15 = vsel %vm7184_vm14, %v941_v55, %v946_v31  ;;  %v956_v30 = vsel %vm7184_vm14, %v949_v26, %v954_v58  ;;  %v971_v27 = vshll.u32 %v6925_v45, 16  ;;  %v2523_v4 = vcombine.low %v916_v0, %v924_v22 }
  0x49   : > { %v5100_v11 = vrot.slane %v5086_v53, %v6856_v5  ;;  %v10131_v14 = vshll.u32 %v7036_v59, 16  ;;  %v2524_v37 = vcombine.low %v932_v50, %v940_v47  ;;  %v2525_v12 = vcombine.low %v948_v15, %v956_v30 }
  0x4a   : > { %v974_v55 = vshrl.u32 %v6925_v45, 16  ;;  %v973_v7 = vsel %vm7184_vm14, %v966_v20, %v971_v27  ;;  %v2533_v53 = vrot.slane %v2523_v4, %v6856_v5  ;;  %v979_v26 = vshll.u32 %v7043_v63, 16 }
  0x4b   : > { %v964_v25 = vsel %vm7184_vm14, %v957_v1, %v10131_v14  ;;  %v5101_v31 = vcombine.low %v5093_v56, %v5100_v11  ;;  %v2540_v0 = vrot.slane %v2524_v37, %v6856_v5  ;;  %v2547_v59 = vrot.slane %v2525_v12, %v6856_v5 }
  0x4c   : > { %v2526_v58 = vcombine.low %v964_v25, %v973_v7  ;;  %v982_v22 = vshrl.u32 %v7043_v63, 16  ;;  %v7251_v45 = vsel %vm7184_vm14, %v974_v55, %v979_v26  ;;  %v987_v30 = vshll.u32 %v7052_v3, 16 }
  0x4d   : > { %5321 = vrot.lane.b32.xlu1 %v5101_v31, %s6772_s30  ;;  %v990_v11 = vshrl.u32 %v7052_v3, 16  ;;  %v995_v4 = vshll.u32 %v6922_v44, 16  ;;  %v2555_v50 = vcombine.low %v2533_v53, %v2540_v0  ;;  %v998_v56 = vshrl.u32 %v6922_v44, 16 }
  0x4e   : > { %v2554_v14 = vrot.slane %v2526_v58, %v6856_v5  ;;  %v1003_v12 = vshll.u32 %v6938_v51, 16  ;;  %v7261_v63 = vsel %vm7184_vm14, %v982_v22, %v987_v30  ;;  %v1006_v15 = vshrl.u32 %v6938_v51, 16 }
  0x4f   : > { %v7265_v47 = vsel %vm7184_vm14, %v990_v11, %v995_v4  ;;  %v1011_v3 = vshll.u32 %v6942_v52, 16  ;;  %v2563_v20 = vrot.slane %v2555_v50, %v6856_v5  ;;  %v1014_v27 = vshrl.u32 %v6942_v52, 16 }
  0x50   : > { %v2556_v1 = vcombine.low %v2547_v59, %v2554_v14  ;;  %v7272_v44 = vsel %vm7184_vm14, %v998_v56, %v1003_v12  ;;  %v1023_v37 = vshrl.u32 %v6893_v32, 16  ;;  %v1028_v55 = vshll.u32 %v6902_v38, 16 }
  0x51   : > { %v7277_v25 = vsel %vm7184_vm14, %v1006_v15, %v1011_v3  ;;  %v4154_v51 = vcombine.low %v973_v7, %v7251_v45  ;;  %v10132_v53 = vshll.u32 %v7071_v17, 16  ;;  %v4155_v52 = vcombine.low %v7261_v63, %v7265_v47 }
  0x52   : > { %v2570_v31 = vrot.slane %v2556_v1, %v6856_v5  ;;  %v4156_v58 = vcombine.low %v7272_v44, %v7277_v25  ;;  %v1030_v32 = vsel %vm7184_vm14, %v1023_v37, %v1028_v55  ;;  %v1031_v7 = vshrl.u32 %v6902_v38, 16 }
  0x53   : > { %v7287_v26 = vsel %vm7184_vm14, %v1014_v27, %v10132_v53  ;;  %v4164_v0 = vrot.slane %v4154_v51, %v6856_v5  ;;  %v1036_v59 = vshll.u32 %v6986_v21, 16  ;;  %v4171_v30 = vrot.slane %v4155_v52, %v6856_v5 }
  0x54   : > { %v2571_v17 = vcombine.low %v2563_v20, %v2570_v31  ;;  %v4157_v22 = vcombine.low %v7287_v26, %v1030_v32  ;;  %v4178_v11 = vrot.slane %v4156_v58, %v6856_v5  ;;  %v1039_v14 = vshrl.u32 %v6986_v21, 16 }
  0x55   : > { %v1038_v4 = vsel %vm7184_vm14, %v1031_v7, %v1036_v59  ;;  %v1044_v50 = vshll.u32 %v7096_v61, 16  ;;  %v1047_v56 = vshrl.u32 %v7096_v61, 16  ;;  %v4186_v12 = vcombine.low %v4164_v0, %v4171_v30 }
  0x56   : > { %3126 = vrot.lane.b32.xlu0 %v2571_v17, %s6775_s6  ;;  %v4185_v38 = vrot.slane %v4157_v22, %v6856_v5  ;;  %v1052_v15 = vshll.u32 %v6896_v33, 16  ;;  %v1055_v3 = vshrl.u32 %v6896_v33, 16  ;;  %v1060_v20 = vshll.u32 %v6905_v39, 16 }
  0x57   : > { %v1046_v1 = vsel %vm7184_vm14, %v1039_v14, %v1044_v50  ;;  %v1063_v21 = vshrl.u32 %v6905_v39, 16  ;;  %v1068_v27 = vshll.u32 %v6909_v40, 16  ;;  %v4194_v37 = vrot.slane %v4186_v12, %v6856_v5 }
  0x58   : > { %v4187_v61 = vcombine.low %v4178_v11, %v4185_v38  ;;  %v1054_v55 = vsel %vm7184_vm14, %v1047_v56, %v1052_v15  ;;  %v1071_v51 = vshrl.u32 %v6909_v40, 16  ;;  %v1062_v33 = vsel %vm7184_vm14, %v1055_v3, %v1060_v20 }
  0x59   : > { %v1070_v31 = vsel %vm7184_vm14, %v1063_v21, %v1068_v27  ;;  %v1080_v53 = vshrl.u32 %v6899_v35, 16  ;;  %v1085_v39 = vshll.u32 %v6915_v42, 16  ;;  %v10133_v58 = vshll.u32 %v7100_v62, 16  ;;  %v161_v27 = vld [vmem:[%s6854_s27 + $0x80] sm:$0xff] }
  0x5a   : > { %v4201_v52 = vrot.slane %v4187_v61, %v6856_v5  ;;  %v2575_v7 = vcombine.low %v1030_v32, %v1038_v4  ;;  %v2621_v59 = vcombine.low %v1046_v1, %v1054_v55  ;;  %v2622_v17 = vcombine.low %v1062_v33, %v1070_v31 }
  0x5b   : > { %v1078_v0 = vsel %vm7184_vm14, %v1071_v51, %v10133_v58  ;;  %v1087_v40 = vsel %vm7184_vm14, %v1080_v53, %v1085_v39  ;;  %v1088_v22 = vshrl.u32 %v6915_v42, 16  ;;  %v1093_v30 = vshll.u32 %v6919_v43, 16  ;;  %v163_v51 = vld [vmem:[%s6854_s27 + $0x90] sm:$0xff] }
  0x5c   : > { %v4202_v11 = vcombine.low %v4194_v37, %v4201_v52  ;;  %v2603_v14 = vrot.slane %v2575_v7, %v6856_v5  ;;  %v2623_v50 = vcombine.low %v1078_v0, %v1087_v40  ;;  %v7336_v62 = vrot.slane %v2621_v59, %v6856_v5 }
  0x5d   : > { %v7339_v32 = vrot.slane %v2622_v17, %v6856_v5  ;;  %v7343_v56 = vsel %vm7184_vm14, %v1088_v22, %v1093_v30  ;;  %v4203_v38 = vcombine.low %v1038_v4, %v1046_v1  ;;  %v4204_v12 = vcombine.low %v1054_v55, %v1062_v33  ;;  %v162_v55 = vld [vmem:[%s6854_s27 + $0x88] sm:$0xff]  ;;  %v7361_v33 = vld [vmem:[%s6854_s27 + $0x98] sm:$0xff] }
  0x5e   : > { %4757 = vrot.lane.b32.xlu1 %v4202_v11, %s6776_s7  ;;  %v7347_v15 = vrot.slane %v2623_v50, %v6856_v5  ;;  %v5345_v3 = vcombine.low %v2603_v14, %v7336_v62  ;;  %v4205_v20 = vcombine.low %v1070_v31, %v1078_v0  ;;  %v4206_v21 = vcombine.low %v1087_v40, %v7343_v56 }
  0x5f   : > { %v4213_v61 = vrot.slane %v4203_v38, %v6856_v5  ;;  %v4220_v37 = vrot.slane %v4204_v12, %v6856_v5  ;;  %v2572_v4 = vcombine.low %v7251_v45, %v7261_v63  ;;  %v2573_v1 = vcombine.low %v7265_v47, %v7272_v44 }
  0x60   : > { %v5346_v31 = vcombine.low %v7339_v32, %v7347_v15  ;;  %v5353_v53 = vrot.slane %v5345_v3, %v6856_v5  ;;  %v4227_v39 = vrot.slane %v4205_v20, %v6856_v5  ;;  %v4234_v52 = vrot.slane %v4206_v21, %v6856_v5 }
  0x61   : > { %v4235_v58 = vcombine.low %v4213_v61, %v4220_v37  ;;  %v2574_v45 = vcombine.low %v7277_v25, %v7287_v26  ;;  %v2582_v63 = vrot.slane %v2572_v4, %v6856_v5  ;;  %v2589_v47 = vrot.slane %v2573_v1, %v6856_v5 }
  0x62   : > { %v5360_v44 = vrot.slane %v5346_v31, %v6856_v5  ;;  %v4236_v0 = vcombine.low %v4227_v39, %v4234_v52  ;;  %v185_v7 = vpack.c.bf16 %v162_v55, %v161_v27  ;;  %v186_v59 = vpack.c.bf16 %v7361_v33, %v163_v51 }
  0x63   : > { %v4243_v40 = vrot.slane %v4235_v58, %v6856_v5  ;;  %v2596_v17 = vrot.slane %v2574_v45, %v6856_v5  ;;  %v2604_v22 = vcombine.low %v2582_v63, %v2589_v47  ;;  %v6400_v30 = vpack.c.bf16 %v162_v55, %v162_v55 }
  0x64   : > { %v5361_v11 = vcombine.low %v5353_v53, %v5360_v44  ;;  %v4250_v50 = vrot.slane %v4236_v0, %v6856_v5  ;;  %v598_v25 = vrot.slane %v185_v7, %v6856_v5  ;;  %v646_v20 = vrot.slane %v186_v59, %v6856_v5 }
  0x65   : > { %v2605_v38 = vcombine.low %v2596_v17, %v2603_v14  ;;  %v2612_v12 = vrot.slane %v2604_v22, %v6856_v5  ;;  %v605_v3 = vrot.slane %v6400_v30, %v6856_v5  ;;  %v7389_v37 = vcombine.high %v7171_v6, %v7171_v6 }
  0x66   : > { %5612 = vrot.lane.b32.xlu0 %v5361_v11, %s6777_s8  ;;  %v4251_v21 = vcombine.low %v4243_v40, %v4250_v50  ;;  %v606_v27 = vcombine.high %v598_v25, %v598_v25  ;;  %v7385_v61 = vrot.slane %v598_v25, %v6856_v5  ;;  %v654_v55 = vcombine.high %v646_v20, %v646_v20 }
  0x67   : > { %v2619_v14 = vrot.slane %v2605_v38, %v6856_v5  ;;  %v607_v4 = vcombine.high %v605_v3, %v605_v3  ;;  %v7393_v1 = vrot.slane %v605_v3, %v6856_v5  ;;  %v7404_v53 = vrot.slane %v646_v20, %v6856_v5 }
  0x68   : > { %10134 = vst [vmem:[#allocation19_spill] sm:$0xff] %v7385_v61  ;;  %4759 = vrot.lane.b32.xlu1 %v4251_v21, %s6776_s7  ;;  %v7397_v51 = vrot.slane %v606_v27, %v6856_v5  ;;  %v7401_v31 = vcombine.high %v7385_v61, %v7385_v61  ;;  %v1365_v39 = vshrl.u32 %v7385_v61, 16  ;;  %v7415_v63 = vrot.slane %v654_v55, %v6856_v5 }
  0x69   : > { %10135 = vst [vmem:[#allocation20_spill] sm:$0xff] %v7393_v1  ;;  %10137 = vst [vmem:[#allocation22_spill] sm:$0xff] %v7404_v53  ;;  %v2620_v52 = vcombine.low %v2612_v12, %v2619_v14  ;;  %v7408_v58 = vrot.slane %v607_v4, %v6856_v5  ;;  %v7412_v45 = vcombine.high %v7393_v1, %v7393_v1  ;;  %v1394_v17 = vshll.u32 %v7393_v1, 16 }
  0x6a   : > { %10136 = vst [vmem:[#allocation21_spill] sm:$0xff] %v7397_v51  ;;  %v7419_v47 = vcombine.high %v7397_v51, %v7397_v51  ;;  %v1370_v44 = vshll.u32 %v7397_v51, 16  ;;  %v1373_v0 = vshrl.u32 %v7397_v51, 16  ;;  %v1378_v7 = vshll.u32 %v7401_v31, 16 }
  0x6b   : > { %10138 = vst [vmem:[#allocation23_spill] sm:$0xff] %v7408_v58  ;;  %10139 = vst [vmem:[#allocation24_spill] sm:$0xff] %v7412_v45  ;;  %3128 = vrot.lane.b32.xlu0 %v2620_v52, %s6775_s6  ;;  %v7427_v59 = vcombine.high %v7408_v58, %v7408_v58  ;;  %v1381_v40 = vshrl.u32 %v7401_v31, 16  ;;  %v1397_v22 = vshrl.u32 %v7393_v1, 16  ;;  %v1402_v38 = vshll.u32 %v7408_v58, 16 }
  0x6c   : > { %v7434_v30 = vsel %vm7184_vm14, %v1365_v39, %v1370_v44  ;;  %v7438_v11 = vsel %vm7184_vm14, %v1373_v0, %v1378_v7  ;;  %v1386_v50 = vshll.u32 %v7419_v47, 16  ;;  %v1389_v25 = vshrl.u32 %v7419_v47, 16 }
  0x6d   : > { %10140 = vst [vmem:[#allocation25_spill] sm:$0xff] %v7434_v30  ;;  %10141 = vst [vmem:[#allocation26_spill] sm:$0xff] %v7438_v11  ;;  %v1405_v12 = vshrl.u32 %v7408_v58, 16  ;;  %v1410_v3 = vshll.u32 %v7412_v45, 16  ;;  %v1413_v20 = vshrl.u32 %v7412_v45, 16  ;;  %v1418_v14 = vshll.u32 %v7427_v59, 16 }
  0x6e   : > { %v7448_v21 = vsel %vm7184_vm14, %v1381_v40, %v1386_v50  ;;  %v7452_v27 = vsel %vm7184_vm14, %v1389_v25, %v1394_v17  ;;  %v1422_v4 = vshrl.u32 %v7404_v53, 16  ;;  %v7458_v55 = vsel %vm7184_vm14, %v1397_v22, %v1402_v38 }
  0x6f   : > { %10142 = vst [vmem:[#allocation27_spill] sm:$0xff] %v7448_v21  ;;  %10143 = vst [vmem:[#allocation28_spill] sm:$0xff] %v7452_v27  ;;  %v7462_v39 = vsel %vm7184_vm14, %v1405_v12, %v1410_v3  ;;  %v1427_v52 = vshll.u32 %v7415_v63, 16  ;;  %v2866_v44 = vcombine.low %v7434_v30, %v7438_v11  ;;  %v7469_v0 = vsel %vm7184_vm14, %v1413_v20, %v1418_v14 }
  0x70   : > { %10144 = vst [vmem:[#allocation29_spill] sm:$0xff] %v7458_v55  ;;  %10145 = vst [vmem:[#allocation30_spill] sm:$0xff] %v7462_v39  ;;  %v2867_v7 = vcombine.low %v7448_v21, %v7452_v27  ;;  %v2868_v40 = vcombine.low %v7458_v55, %v7462_v39  ;;  %v7477_v17 = vcombine.high %v7168_v57, %v7168_v57  ;;  %v1096_v25 = vshrl.u32 %v6919_v43, 16 }
  0x71   : > { %10146 = vst [vmem:[#allocation31_spill] sm:$0xff] %v7469_v0  ;;  %v7481_v22 = vsel %vm7184_vm14, %v1422_v4, %v1427_v52  ;;  %v7484_v50 = vrot.slane %v2866_v44, %v6856_v5  ;;  %v1101_v38 = vshll.u32 %v7144_v46, 16  ;;  %v1104_v14 = vshrl.u32 %v7144_v46, 16 }
  0x72   : > { %v2869_v12 = vcombine.low %v7469_v0, %v7481_v22  ;;  %v7491_v3 = vrot.slane %v2867_v7, %v6856_v5  ;;  %v7494_v20 = vrot.slane %v2868_v40, %v6856_v5  ;;  %v1109_v52 = vshll.u32 %v7160_v2, 16 }
  0x73   : > { %10147 = vst [vmem:[#allocation32_spill] sm:$0xff] %v7484_v50  ;;  %v7499_v4 = vsel %vm7184_vm14, %v1096_v25, %v1101_v38  ;;  %v1112_v43 = vshrl.u32 %v7160_v2, 16  ;;  %v1117_v44 = vshll.u32 %v7168_v57, 16  ;;  %v1120_v40 = vshrl.u32 %v7168_v57, 16 }
  0x74   : > { %10148 = vst [vmem:[#allocation33_spill] sm:$0xff] %v7491_v3  ;;  %10149 = vst [vmem:[#allocation34_spill] sm:$0xff] %v7494_v20  ;;  %v7505_v26 = vrot.slane %v2869_v12, %v6856_v5  ;;  %v2898_v7 = vcombine.low %v7484_v50, %v7491_v3  ;;  %v1125_v46 = vshll.u32 %v7176_v8, 16  ;;  %v7513_v25 = vsel %vm7184_vm14, %v1104_v14, %v1109_v52 }
  0x75   : > { %v7517_v38 = vsel %vm7184_vm14, %v1112_v43, %v1117_v44  ;;  %v1128_v39 = vshrl.u32 %v7176_v8, 16  ;;  %v1133_v12 = vshll.u32 %v7477_v17, 16  ;;  %v1137_v14 = vshrl.u32 %v7171_v6, 16 }
  0x76   : > { %10150 = vst [vmem:[#allocation35_spill] sm:$0xff] %v7505_v26  ;;  %v2899_v0 = vcombine.low %v7494_v20, %v7505_v26  ;;  %v2906_v27 = vrot.slane %v2898_v7, %v6856_v5  ;;  %v7526_v55 = vsel %vm7184_vm14, %v1120_v40, %v1125_v46  ;;  %v1142_v43 = vshll.u32 %v7179_v13, 16 }
  0x77   : > { %v7531_v52 = vsel %vm7184_vm14, %v1128_v39, %v1133_v12  ;;  %v1145_v44 = vshrl.u32 %v7179_v13, 16  ;;  %v1150_v11 = vshll.u32 %v7389_v37, 16  ;;  %v2624_v7 = vcombine.low %v7343_v56, %v7499_v4 }
  0x78   : > { %v2913_v26 = vrot.slane %v2899_v0, %v6856_v5  ;;  %v2670_v40 = vcombine.low %v7513_v25, %v7517_v38  ;;  %v2671_v46 = vcombine.low %v7526_v55, %v7531_v52  ;;  %v7545_v39 = vsel %vm7184_vm14, %v1137_v14, %v1142_v43 }
  0x79   : > { %v7549_v12 = vsel %vm7184_vm14, %v1145_v44, %v1150_v11  ;;  %v2653_v0 = vcombine.low %v7336_v62, %v7339_v32  ;;  %v6529_v56 = vcombine.high %v6899_v35, %v6915_v42  ;;  %v2652_v30 = vrot.slane %v2624_v7, %v6856_v5 }
  0x7a   : > { %v2914_v21 = vcombine.low %v2906_v27, %v2913_v26  ;;  %v2672_v50 = vcombine.low %v7545_v39, %v7549_v12  ;;  %v7559_v3 = vrot.slane %v2670_v40, %v6856_v5  ;;  %v7562_v14 = vrot.slane %v2671_v46, %v6856_v5 }
  0x7b   : > { %v2661_v11 = vrot.slane %v2653_v0, %v6856_v5  ;;  %v3281_v43 = vrot.slane %v6529_v56, %v6856_v5  ;;  %v3299_v62 = vcombine.low %v7160_v2, %v7168_v57  ;;  %v2654_v32 = vcombine.low %v7347_v15, %v2652_v30 }
  0x7c   : > { %3140 = vrot.lane.b32.xlu1 %v2914_v21, %s6775_s6  ;;  %v7570_v35 = vrot.slane %v2672_v50, %v6856_v5  ;;  %v5362_v42 = vcombine.low %v2652_v30, %v7559_v3  ;;  %v6530_v26 = vcombine.high %v7160_v2, %v7168_v57  ;;  %v3301_v27 = vcombine.low %v7179_v13, %v7389_v37 }
  0x7d   : > { %v7579_v44 = vrot.slane %v3299_v62, %v6856_v5  ;;  %v3282_v21 = vcombine.low %v7131_v28, %v7123_v19  ;;  %v3283_v50 = vcombine.low %v7134_v23, %v3281_v43  ;;  %v2668_v2 = vrot.slane %v2654_v32, %v6856_v5  ;;  %v165_v62 = vld [vmem:[%s6854_s27 + $0xa0] sm:$0xff] }
  0x7e   : > { %v5363_v7 = vcombine.low %v7562_v14, %v7570_v35  ;;  %v5370_v15 = vrot.slane %v5362_v42, %v6856_v5  ;;  %v7589_v57 = vrot.slane %v6530_v26, %v6856_v5  ;;  %v7592_v30 = vrot.slane %v3301_v27, %v6856_v5  ;;  %v7604_v42 = vld [vmem:[%s6854_s27 + $0xa8] sm:$0xff] }
  0x7f   : > { %v3847_v40 = vcombine.low %v3281_v43, %v7579_v44  ;;  %v3290_v46 = vrot.slane %v3282_v21, %v6856_v5  ;;  %v3297_v19 = vrot.slane %v3283_v50, %v6856_v5  ;;  %v2669_v23 = vcombine.low %v2661_v11, %v2668_v2 }
  0x80   : > { %v5377_v28 = vrot.slane %v5363_v7, %v6856_v5  ;;  %v3495_v0 = vcombine.low %v7397_v51, %v7401_v31  ;;  %v3496_v56 = vcombine.low %v7419_v47, %v7393_v1  ;;  %v5647_v43 = vcombine.low %v7589_v57, %v7592_v30 }
  0x81   : > { %v3855_v32 = vrot.slane %v3847_v40, %v6856_v5  ;;  %v3298_v26 = vcombine.low %v3290_v46, %v3297_v19  ;;  %v3497_v27 = vcombine.low %v7408_v58, %v7412_v45  ;;  %3130 = vrot.lane.b32.xlu1 %v2669_v23, %s6775_s6  ;;  %v3498_v31 = vcombine.low %v7427_v59, %v7415_v63 }
  0x82   : > { %v5378_v21 = vcombine.low %v5370_v15, %v5377_v28  ;;  %v7615_v47 = vrot.slane %v3495_v0, %v6856_v5  ;;  %v7618_v11 = vrot.slane %v3496_v56, %v6856_v5  ;;  %v5654_v50 = vrot.slane %v5647_v43, %v6856_v5 }
  0x83   : > { %v7622_v7 = vrot.slane %v3497_v27, %v6856_v5  ;;  %v3839_v2 = vcombine.low %v7176_v8, %v7171_v6  ;;  %v187_v15 = vpack.c.bf16 %v7604_v42, %v165_v62  ;;  %v7629_v59 = vrot.slane %v3498_v31, %v6856_v5 }
  0x84   : > { %10151 = vst [vmem:[#allocation36_spill] sm:$0xff] %v7615_v47  ;;  %10152 = vst [vmem:[#allocation37_spill] sm:$0xff] %v7618_v11  ;;  %5614 = vrot.lane.b32.xlu0 %v5378_v21, %s6777_s8  ;;  %v3527_v40 = vcombine.low %v7615_v47, %v7618_v11  ;;  %v10155_v46 = vpack.c.bf16 %v7361_v33, %v7361_v33  ;;  %v5655_v23 = vcombine.low %v3855_v32, %v5654_v50 }
  0x85   : > { %10153 = vst [vmem:[#allocation38_spill] sm:$0xff] %v7622_v7  ;;  %10154 = vst [vmem:[#allocation39_spill] sm:$0xff] %v7629_v59  ;;  %v3846_v8 = vrot.slane %v3839_v2, %v6856_v5  ;;  %v694_v0 = vrot.slane %v187_v15, %v6856_v5  ;;  %v6535_v56 = vcombine.high %v7404_v53, %v7415_v63  ;;  %3759 = vrot.lane.b32.xlu1 %v3298_v26, %s6773_s4 }
  0x86   : > { %v653_v19 = vrot.slane %v10155_v46, %v6856_v5  ;;  %v3528_v62 = vcombine.low %v7622_v7, %v7629_v59  ;;  %v3535_v43 = vrot.slane %v3527_v40, %v6856_v5  ;;  %v3964_v46 = vcombine.low %v7404_v53, %v7415_v63 }
  0x87   : > { %v3848_v21 = vcombine.low %v3846_v8, %v7592_v30  ;;  %v702_v31 = vcombine.high %v694_v0, %v694_v0  ;;  %v7652_v50 = vrot.slane %v694_v0, %v6856_v5  ;;  %v7655_v2 = vrot.slane %v6535_v56, %v6856_v5 }
  0x88   : > { %v655_v33 = vcombine.high %v653_v19, %v653_v19  ;;  %v7648_v27 = vrot.slane %v653_v19, %v6856_v5  ;;  %5803 = vrot.lane.b32.xlu0 %v5655_v23, %s6774_s5  ;;  %v3542_v26 = vrot.slane %v3528_v62, %v6856_v5  ;;  %v7674_v23 = vcombine.high %v7179_v13, %v7179_v13 }
  0x89   : > { %10156 = vst [vmem:[#allocation40_spill] sm:$0xff] %v7655_v2  ;;  %v3862_v19 = vrot.slane %v3848_v21, %v6856_v5  ;;  %v7670_v8 = vrot.slane %v702_v31, %v6856_v5  ;;  %v1153_v0 = vshrl.u32 %v7389_v37, 16  ;;  %v3972_v28 = vrot.slane %v3964_v46, %v6856_v5 }
  0x8a   : > { %v7660_v15 = vrot.slane %v655_v33, %v6856_v5  ;;  %v7664_v40 = vcombine.high %v7648_v27, %v7648_v27  ;;  %v3543_v56 = vcombine.low %v3535_v43, %v3542_v26  ;;  %v1158_v21 = vshll.u32 %v7674_v23, 16 }
  0x8b   : > { %v3863_v59 = vcombine.low %v3855_v32, %v3862_v19  ;;  %v4252_v31 = vcombine.low %v7499_v4, %v7513_v25  ;;  %v4253_v47 = vcombine.low %v7517_v38, %v7526_v55  ;;  %v3980_v26 = vcombine.low %v3972_v28, %v7655_v2 }
  0x8c   : > { %v3545_v62 = vcombine.low %v7648_v27, %v7660_v15  ;;  %v3965_v33 = vcombine.low %v7664_v40, %v7652_v50  ;;  %3769 = vrot.lane.b32.xlu0 %v3543_v56, %s6773_s4  ;;  %v4254_v32 = vcombine.low %v7531_v52, %v7545_v39  ;;  %v7698_v4 = vsel %vm7184_vm14, %v1153_v0, %v1158_v21 }
  0x8d   : > { %4132 = vrot.lane.b32.xlu1 %v3863_v59, %s6771_s29  ;;  %v4262_v55 = vrot.slane %v4252_v31, %v6856_v5  ;;  %v4269_v25 = vrot.slane %v4253_v47, %v6856_v5  ;;  %v684_v38 = vcombine.high %v7404_v53, %v7404_v53  ;;  %v3988_v28 = vrot.slane %v3980_v26, %v6856_v5 }
  0x8e   : > { %v7689_v37 = vrot.slane %v3545_v62, %v6856_v5  ;;  %v3979_v43 = vrot.slane %v3965_v33, %v6856_v5  ;;  %v4255_v52 = vcombine.low %v7549_v12, %v7698_v4  ;;  %v4276_v39 = vrot.slane %v4254_v32, %v6856_v5 }
  0x8f   : > { %v4284_v59 = vcombine.low %v4262_v55, %v4269_v25  ;;  %v686_v19 = vcombine.high %v7415_v63, %v7415_v63  ;;  %v888_v0 = vcombine.high %v7660_v15, %v7660_v15  ;;  %v1430_v47 = vshrl.u32 %v7415_v63, 16 }
  0x90   : > { %10157 = vst [vmem:[#allocation41_spill] sm:$0xff] %v7689_v37  ;;  %v3981_v46 = vcombine.low %v7689_v37, %v3979_v43  ;;  %v4283_v62 = vrot.slane %v4255_v52, %v6856_v5  ;;  %v1435_v33 = vshll.u32 %v684_v38, 16  ;;  %v1438_v21 = vshrl.u32 %v684_v38, 16 }
  0x91   : > { %v4292_v31 = vrot.slane %v4284_v59, %v6856_v5  ;;  %v1443_v12 = vshll.u32 %v686_v19, 16  ;;  %v1446_v43 = vshrl.u32 %v686_v19, 16  ;;  %v1451_v26 = vshll.u32 %v7648_v27, 16 }
  0x92   : > { %v3995_v56 = vrot.slane %v3981_v46, %v6856_v5  ;;  %v4285_v55 = vcombine.low %v4276_v39, %v4283_v62  ;;  %v7720_v25 = vsel %vm7184_vm14, %v1430_v47, %v1435_v33  ;;  %v1454_v11 = vshrl.u32 %v7648_v27, 16 }
  0x93   : > { %v7725_v46 = vsel %vm7184_vm14, %v1438_v21, %v1443_v12  ;;  %v7729_v52 = vsel %vm7184_vm14, %v1446_v43, %v1451_v26  ;;  %v1459_v59 = vshll.u32 %v7660_v15, 16  ;;  %v1462_v7 = vshrl.u32 %v7660_v15, 16 }
  0x94   : > { %v3996_v32 = vcombine.low %v3988_v28, %v3995_v56  ;;  %v4299_v28 = vrot.slane %v4285_v55, %v6856_v5  ;;  %v1467_v39 = vshll.u32 %v7664_v40, 16  ;;  %v1470_v47 = vshrl.u32 %v7664_v40, 16 }
  0x95   : > { %v1475_v56 = vshll.u32 %v888_v0, 16  ;;  %v7739_v62 = vsel %vm7184_vm14, %v1454_v11, %v1459_v59  ;;  %v1479_v33 = vshrl.u32 %v7652_v50, 16  ;;  %v1484_v21 = vshll.u32 %v7670_v8, 16 }
  0x96   : > { %4142 = vrot.lane.b32.xlu0 %v3996_v32, %s6771_s29  ;;  %v4497_v12 = vcombine.low %v7481_v22, %v7720_v25  ;;  %v4300_v43 = vcombine.low %v4292_v31, %v4299_v28  ;;  %v7747_v26 = vsel %vm7184_vm14, %v1462_v7, %v1467_v39  ;;  %v4498_v11 = vcombine.low %v7725_v46, %v7729_v52 }
  0x97   : > { %v7751_v32 = vsel %vm7184_vm14, %v1470_v47, %v1475_v56  ;;  %v7757_v55 = vsel %vm7184_vm14, %v1479_v33, %v1484_v21  ;;  %v4499_v22 = vcombine.low %v7739_v62, %v7747_v26  ;;  %v6522_v7 = vcombine.high %v7171_v6, %v7179_v13 }
  0x98   : > { %v4507_v31 = vrot.slane %v4497_v12, %v6856_v5  ;;  %4761 = vrot.lane.b32.xlu1 %v4300_v43, %s6776_s7  ;;  %v4500_v59 = vcombine.low %v7751_v32, %v7757_v55  ;;  %v4514_v28 = vrot.slane %v4498_v11, %v6856_v5  ;;  %v2099_v39 = vcombine.low %v7196_v9, %v7207_v29  ;;  %v155_v12 = vld [vmem:[%s6854_s27 + $0x50] sm:$0xff]  ;;  %v156_v43 = vld [vmem:[%s6854_s27 + $0x58] sm:$0xff] }
  0x99   : > { %v4817_v47 = vcombine.low %v7477_v17, %v7179_v13  ;;  %v4521_v56 = vrot.slane %v4499_v22, %v6856_v5  ;;  %v7774_v33 = vrot.slane %v6522_v7, %v6856_v5  ;;  %v2312_v6 = vcombine.low %v7415_v63, %v684_v38 }
  0x9a   : > { %v2313_v21 = vcombine.low %v686_v19, %v7648_v27  ;;  %v4528_v20 = vrot.slane %v4500_v59, %v6856_v5  ;;  %v4529_v11 = vcombine.low %v4507_v31, %v4514_v28  ;;  %v7782_v45 = vrot.slane %v2099_v39, %v6856_v5 }
  0x9b   : > { %10158 = vst [vmem:[#allocation42_spill] sm:$0xff] %v7774_v33  ;;  %v4824_v9 = vrot.slane %v4817_v47, %v6856_v5  ;;  %v2314_v13 = vcombine.low %v7660_v15, %v7664_v40  ;;  %v7788_v29 = vrot.slane %v2312_v6, %v6856_v5  ;;  %v4918_v17 = vcombine.low %v888_v0, %v7670_v8 }
  0x9c   : > { %10159 = vst [vmem:[#allocation43_spill] sm:$0xff] %v7782_v45  ;;  %v7791_v63 = vrot.slane %v2313_v21, %v6856_v5  ;;  %v4530_v38 = vcombine.low %v4521_v56, %v4528_v20  ;;  %v4537_v19 = vrot.slane %v4529_v11, %v6856_v5  ;;  %v182_v31 = vpack.c.bf16 %v156_v43, %v155_v12  ;;  %v167_v11 = vld [vmem:[%s6854_s27 + $0xb0] sm:$0xff] }
  0x9d   : > { %10160 = vst [vmem:[#allocation44_spill] sm:$0xff] %v7788_v29  ;;  %v4825_v22 = vcombine.low %v4824_v9, %v7774_v33  ;;  %v7797_v7 = vrot.slane %v2314_v13, %v6856_v5  ;;  %v4925_v59 = vrot.slane %v4918_v17, %v6856_v5  ;;  %v415_v28 = vcombine.high %v7163_v60, %v7163_v60  ;;  %v7820_v9 = vld [vmem:[%s6854_s27 + $0xb8] sm:$0xff] }
  0x9e   : > { %10161 = vst [vmem:[#allocation45_spill] sm:$0xff] %v7791_v63  ;;  %v2344_v40 = vcombine.low %v7788_v29, %v7791_v63  ;;  %v4544_v20 = vrot.slane %v4530_v38, %v6856_v5  ;;  %v7808_v39 = vrot.slane %v7163_v60, %v6856_v5  ;;  %v6397_v47 = vpack.c.bf16 %v156_v43, %v156_v43 }
  0x9f   : > { %10162 = vst [vmem:[#allocation46_spill] sm:$0xff] %v7797_v7  ;;  %v4832_v0 = vrot.slane %v4825_v22, %v6856_v5  ;;  %v4926_v6 = vcombine.low %v7797_v7, %v4925_v59  ;;  %v7815_v21 = vrot.slane %v415_v28, %v6856_v5  ;;  %v454_v12 = vrot.slane %v182_v31, %v6856_v5 }
  0xa0   : > { %v7811_v56 = vrot.slane %v2344_v40, %v6856_v5  ;;  %10164 = vst [vmem:[#allocation48_spill] sm:$0xff] %v7820_v9  ;;  %v4545_v13 = vcombine.low %v4537_v19, %v4544_v20  ;;  %v7825_v60 = vcombine.high %v7808_v39, %v7808_v39  ;;  %v7828_v43 = vrot.slane %v6397_v47, %v6856_v5 }
  0xa1   : > { %v4833_v17 = vcombine.low %v7782_v45, %v4832_v0  ;;  %v4933_v38 = vrot.slane %v4926_v6, %v6856_v5  ;;  %v462_v22 = vcombine.high %v454_v12, %v454_v12  ;;  %v7832_v40 = vrot.slane %v454_v12, %v6856_v5 }
  0xa2   : > { %10163 = vst [vmem:[#allocation47_spill] sm:$0xff] %v7811_v56  ;;  %10165 = vst [vmem:[#allocation49_spill] sm:$0xff] %v7828_v43  ;;  %v2116_v31 = vcombine.low %v7808_v39, %v7815_v21  ;;  %4771 = vrot.lane.b32.xlu0 %v4545_v13, %s6776_s7  ;;  %v7840_v19 = vrot.slane %v7828_v43, %v6856_v5  ;;  %v188_v59 = vpack.c.bf16 %v7820_v9, %v167_v11 }
  0xa3   : > { %5046 = vrot.lane.b32.xlu1 %v4833_v17, %s6770_s28  ;;  %v10166_v28 = vpack.c.bf16 %v7604_v42, %v7604_v42  ;;  %v1161_v0 = vshrl.u32 %v7674_v23, 16  ;;  %v4934_v47 = vcombine.low %v7811_v56, %v4933_v38  ;;  %v7850_v6 = vrot.slane %v462_v22, %v6856_v5 }
  0xa4   : > { %v492_v12 = vcombine.high %v7832_v40, %v7832_v40  ;;  %v2117_v13 = vcombine.low %v7825_v60, %v7832_v40  ;;  %v7857_v11 = vrot.slane %v2116_v31, %v6856_v5  ;;  %v742_v63 = vrot.slane %v188_v59, %v6856_v5 }
  0xa5   : > { %v701_v20 = vrot.slane %v10166_v28, %v6856_v5  ;;  %v2315_v45 = vcombine.low %v7652_v50, %v7670_v8  ;;  %v7900_v53 = vcombine.high %v7850_v6, %v7850_v6  ;;  %v1166_v58 = vshll.u32 %v7808_v39, 16 }
  0xa6   : > { %10167 = vst [vmem:[#allocation50_spill] sm:$0xff] %v7857_v11  ;;  %v2118_v38 = vcombine.low %v7850_v6, %v492_v12  ;;  %v7866_v22 = vrot.slane %v2117_v13, %v6856_v5  ;;  %5056 = vrot.lane.b32.xlu0 %v4934_v47, %s6770_s28  ;;  %v5102_v31 = vcombine.low %v7774_v33, %v7857_v11  ;;  %v1174_v51 = vshll.u32 %v7815_v21, 16 }
  0xa7   : > { %v703_v17 = vcombine.high %v701_v20, %v701_v20  ;;  %v7860_v42 = vrot.slane %v701_v20, %v6856_v5  ;;  %v6525_v13 = vcombine.high %v7652_v50, %v7670_v8  ;;  %v750_v29 = vcombine.high %v742_v63, %v742_v63 }
  0xa8   : > { %10168 = vst [vmem:[#allocation51_spill] sm:$0xff] %v7866_v22  ;;  %v7884_v59 = vrot.slane %v2118_v38, %v6856_v5  ;;  %v7887_v56 = vrot.slane %v742_v63, %v6856_v5  ;;  %v7890_v47 = vrot.slane %v2315_v45, %v6856_v5  ;;  %v1177_v18 = vshrl.u32 %v7815_v21, 16 }
  0xa9   : > { %v7875_v20 = vrot.slane %v703_v17, %v6856_v5  ;;  %v7879_v28 = vcombine.high %v7860_v42, %v7860_v42  ;;  %v5110_v17 = vrot.slane %v5102_v31, %v6856_v5  ;;  %v7896_v7 = vrot.slane %v6525_v13, %v6856_v5 }
  0xaa   : > { %10169 = vst [vmem:[#allocation52_spill] sm:$0xff] %v7884_v59  ;;  %10170 = vst [vmem:[#allocation53_spill] sm:$0xff] %v7890_v47  ;;  %v5103_v38 = vcombine.low %v7866_v22, %v7884_v59  ;;  %v7905_v63 = vrot.slane %v750_v29, %v6856_v5  ;;  %v7911_v31 = vcombine.high %v7815_v21, %v7815_v21  ;;  %v1169_v22 = vshrl.u32 %v7808_v39, 16 }
  0xab   : > { %v2362_v33 = vcombine.low %v7860_v42, %v7875_v20  ;;  %10171 = vst [vmem:[#allocation54_spill] sm:$0xff] %v7896_v7  ;;  %v2363_v45 = vcombine.low %v7879_v28, %v7887_v56  ;;  %v5187_v1 = vcombine.low %v7890_v47, %v7896_v7  ;;  %v1182_v47 = vshll.u32 %v7825_v60, 16 }
  0xac   : > { %v5117_v29 = vrot.slane %v5103_v38, %v6856_v5  ;;  %v1185_v10 = vshrl.u32 %v7825_v60, 16  ;;  %v1190_v41 = vshll.u32 %v7911_v31, 16  ;;  %v1202_v24 = vshrl.u32 %v7850_v6, 16 }
  0xad   : > { %v7914_v13 = vrot.slane %v2362_v33, %v6856_v5  ;;  %v7922_v61 = vrot.slane %v2363_v45, %v6856_v5  ;;  %v5195_v48 = vrot.slane %v5187_v1, %v6856_v5  ;;  %v7929_v33 = vsel %vm7184_vm14, %v1161_v0, %v1166_v58 }
  0xae   : > { %v5118_v54 = vcombine.low %v5110_v17, %v5117_v29  ;;  %v7937_v45 = vsel %vm7184_vm14, %v1169_v22, %v1174_v51  ;;  %v7942_v1 = vsel %vm7184_vm14, %v1177_v18, %v1182_v47  ;;  %v1194_v58 = vshrl.u32 %v7832_v40, 16 }
  0xaf   : > { %10172 = vst [vmem:[#allocation55_spill] sm:$0xff] %v7914_v13  ;;  %10173 = vst [vmem:[#allocation56_spill] sm:$0xff] %v7922_v61  ;;  %v5188_v38 = vcombine.low %v7914_v13, %v7922_v61  ;;  %v1199_v0 = vshll.u32 %v7850_v6, 16  ;;  %v7951_v51 = vsel %vm7184_vm14, %v1185_v10, %v1190_v41  ;;  %v1207_v22 = vshll.u32 %v492_v12, 16 }
  0xb0   : > { %5323 = vrot.lane.b32.xlu1 %v5118_v54, %s6772_s30  ;;  %v1210_v29 = vshrl.u32 %v492_v12, 16  ;;  %v1215_v47 = vshll.u32 %v7900_v53, 16  ;;  %v2673_v61 = vcombine.low %v7698_v4, %v7929_v33  ;;  %v2719_v54 = vcombine.low %v7937_v45, %v7942_v1 }
  0xb1   : > { %v5202_v17 = vrot.slane %v5188_v38, %v6856_v5  ;;  %v7955_v18 = vsel %vm7184_vm14, %v1194_v58, %v1199_v0  ;;  %v7964_v38 = vsel %vm7184_vm14, %v1202_v24, %v1207_v22  ;;  %v732_v10 = vcombine.high %v7652_v50, %v7652_v50 }
  0xb2   : > { %v2720_v41 = vcombine.low %v7951_v51, %v7955_v18  ;;  %v7972_v12 = vsel %vm7184_vm14, %v1210_v29, %v1215_v47  ;;  %v7975_v4 = vrot.slane %v2673_v61, %v6856_v5  ;;  %v7978_v58 = vrot.slane %v2719_v54, %v6856_v5 }
  0xb3   : > { %v5203_v49 = vcombine.low %v5195_v48, %v5202_v17  ;;  %v734_v24 = vcombine.high %v7670_v8, %v7670_v8  ;;  %v2721_v48 = vcombine.low %v7964_v38, %v7972_v12  ;;  %v889_v0 = vcombine.high %v7875_v20, %v7875_v20 }
  0xb4   : > { %10174 = vst [vmem:[#allocation57_spill] sm:$0xff] %v7978_v58  ;;  %v7986_v50 = vrot.slane %v2720_v41, %v6856_v5  ;;  %v1487_v61 = vshrl.u32 %v7670_v8, 16  ;;  %v5379_v17 = vcombine.low %v7975_v4, %v7978_v58  ;;  %v1492_v22 = vshll.u32 %v732_v10, 16 }
  0xb5   : > { %5333 = vrot.lane.b32.xlu0 %v5203_v49, %s6772_s30  ;;  %v1495_v29 = vshrl.u32 %v732_v10, 16  ;;  %v1500_v47 = vshll.u32 %v734_v24, 16  ;;  %v7994_v54 = vrot.slane %v2721_v48, %v6856_v5  ;;  %v1503_v49 = vshrl.u32 %v734_v24, 16 }
  0xb6   : > { %10175 = vst [vmem:[#allocation58_spill] sm:$0xff] %v7986_v50  ;;  %v1508_v34 = vshll.u32 %v7860_v42, 16  ;;  %v1511_v41 = vshrl.u32 %v7860_v42, 16  ;;  %v5387_v36 = vrot.slane %v5379_v17, %v6856_v5  ;;  %v8001_v9 = vsel %vm7184_vm14, %v1487_v61, %v1492_v22 }
  0xb7   : > { %10176 = vst [vmem:[#allocation59_spill] sm:$0xff] %v7994_v54  ;;  %v8005_v58 = vsel %vm7184_vm14, %v1495_v29, %v1500_v47  ;;  %v1516_v43 = vshll.u32 %v7875_v20, 16  ;;  %v5380_v48 = vcombine.low %v7986_v50, %v7994_v54  ;;  %v1519_v59 = vshrl.u32 %v7875_v20, 16 }
  0xb8   : > { %v8012_v11 = vsel %vm7184_vm14, %v1503_v49, %v1508_v34  ;;  %v1524_v17 = vshll.u32 %v7879_v28, 16  ;;  %v1527_v22 = vshrl.u32 %v7879_v28, 16  ;;  %v1532_v29 = vshll.u32 %v889_v0, 16 }
  0xb9   : > { %v8018_v61 = vsel %vm7184_vm14, %v1511_v41, %v1516_v43  ;;  %v1536_v47 = vshrl.u32 %v7887_v56, 16  ;;  %v5394_v7 = vrot.slane %v5380_v48, %v6856_v5  ;;  %v1541_v34 = vshll.u32 %v7905_v63, 16 }
  0xba   : > { %v8025_v54 = vsel %vm7184_vm14, %v1519_v59, %v1524_v17  ;;  %v2918_v49 = vcombine.low %v7757_v55, %v8001_v9  ;;  %v8032_v43 = vsel %vm7184_vm14, %v1527_v22, %v1532_v29  ;;  %v2964_v41 = vcombine.low %v8005_v58, %v8012_v11 }
  0xbb   : > { %10177 = vst [vmem:[#allocation60_spill] sm:$0xff] %v8025_v54  ;;  %v2965_v50 = vcombine.low %v8018_v61, %v8025_v54  ;;  %v2915_v48 = vcombine.low %v7720_v25, %v7725_v46  ;;  %v5395_v59 = vcombine.low %v5387_v36, %v5394_v7  ;;  %v8042_v17 = vsel %vm7184_vm14, %v1536_v47, %v1541_v34 }
  0xbc   : > { %v2946_v55 = vrot.slane %v2918_v49, %v6856_v5  ;;  %v2916_v22 = vcombine.low %v7729_v52, %v7739_v62  ;;  %v2966_v29 = vcombine.low %v8032_v43, %v8042_v17  ;;  %v8050_v13 = vrot.slane %v2964_v41, %v6856_v5 }
  0xbd   : > { %v8053_v54 = vrot.slane %v2965_v50, %v6856_v5  ;;  %v2917_v36 = vcombine.low %v7747_v26, %v7751_v32  ;;  %5616 = vrot.lane.b32.xlu1 %v5395_v59, %s6777_s8  ;;  %v8059_v25 = vrot.slane %v2915_v48, %v6856_v5  ;;  %v3547_v52 = vcombine.low %v7670_v8, %v732_v10 }
  0xbe   : > { %v8062_v46 = vrot.slane %v2916_v22, %v6856_v5  ;;  %v3593_v62 = vcombine.low %v734_v24, %v7860_v42  ;;  %v8067_v7 = vrot.slane %v2966_v29, %v6856_v5  ;;  %v5464_v50 = vcombine.low %v2946_v55, %v8050_v13 }
  0xbf   : > { %10178 = vst [vmem:[#allocation61_spill] sm:$0xff] %v8059_v25  ;;  %v8071_v47 = vrot.slane %v2917_v36, %v6856_v5  ;;  %v3594_v26 = vcombine.low %v7875_v20, %v7879_v28  ;;  %v8078_v34 = vrot.slane %v3547_v52, %v6856_v5  ;;  %v3595_v8 = vcombine.low %v889_v0, %v7905_v63 }
  0xc0   : > { %10179 = vst [vmem:[#allocation62_spill] sm:$0xff] %v8062_v46  ;;  %v2947_v32 = vcombine.low %v8059_v25, %v8062_v46  ;;  %v8082_v10 = vrot.slane %v3593_v62, %v6856_v5  ;;  %v5465_v24 = vcombine.low %v8053_v54, %v8067_v7  ;;  %v5472_v49 = vrot.slane %v5464_v50, %v6856_v5 }
  0xc1   : > { %10180 = vst [vmem:[#allocation63_spill] sm:$0xff] %v8071_v47  ;;  %v2948_v41 = vcombine.low %v8071_v47, %v2946_v55  ;;  %v8089_v28 = vrot.slane %v3594_v26, %v6856_v5  ;;  %v8093_v59 = vrot.slane %v3595_v8, %v6856_v5  ;;  %v2702_v22 = vcombine.low %v7559_v3, %v7562_v14 }
  0xc2   : > { %v2955_v48 = vrot.slane %v2947_v32, %v6856_v5  ;;  %v4005_v0 = vcombine.low %v8078_v34, %v8082_v10  ;;  %v5479_v29 = vrot.slane %v5465_v24, %v6856_v5  ;;  %v2703_v55 = vcombine.low %v7570_v35, %v7975_v4 }
  0xc3   : > { %v2962_v36 = vrot.slane %v2948_v41, %v6856_v5  ;;  %v3302_v52 = vcombine.low %v7674_v23, %v7808_v39  ;;  %v5709_v50 = vcombine.low %v8089_v28, %v8093_v59  ;;  %v2710_v26 = vrot.slane %v2702_v22, %v6856_v5 }
  0xc4   : > { %v8106_v62 = vrot.slane %v4005_v0, %v6856_v5  ;;  %v3348_v3 = vcombine.low %v7815_v21, %v7825_v60  ;;  %v5480_v14 = vcombine.low %v5472_v49, %v5479_v29  ;;  %v2717_v8 = vrot.slane %v2703_v55, %v6856_v5 }
  0xc5   : > { %v2963_v32 = vcombine.low %v2955_v48, %v2962_v36  ;;  %v3330_v35 = vrot.slane %v3302_v52, %v6856_v5  ;;  %v5716_v4 = vrot.slane %v5709_v50, %v6856_v5  ;;  %v3349_v23 = vcombine.low %v7911_v31, %v7850_v6 }
  0xc6   : > { %v6531_v24 = vcombine.high %v7832_v40, %v7850_v6  ;;  %v8121_v41 = vrot.slane %v3348_v3, %v6856_v5  ;;  %5626 = vrot.lane.b32.xlu0 %v5480_v14, %s6777_s8  ;;  %v2718_v60 = vcombine.low %v2710_v26, %v2717_v8  ;;  %v3331_v49 = vcombine.low %v7579_v44, %v7589_v57 }
  0xc7   : > { %3142 = vrot.lane.b32.xlu1 %v2963_v32, %s6775_s6  ;;  %v3332_v48 = vcombine.low %v7592_v30, %v3330_v35  ;;  %v1218_v0 = vshrl.u32 %v7900_v53, 16  ;;  %v5717_v31 = vcombine.low %v8106_v62, %v5716_v4  ;;  %v8131_v22 = vrot.slane %v3349_v23, %v6856_v5 }
  0xc8   : > { %v8134_v29 = vrot.slane %v6531_v24, %v6856_v5  ;;  %v3872_v36 = vcombine.low %v3330_v35, %v8121_v41  ;;  %v3339_v55 = vrot.slane %v3331_v49, %v6856_v5  ;;  %v6536_v44 = vcombine.high %v7648_v27, %v7660_v15 }
  0xc9   : > { %v3346_v52 = vrot.slane %v3332_v48, %v6856_v5  ;;  %v3576_v57 = vcombine.low %v7655_v2, %v7689_v37  ;;  %v3864_v26 = vcombine.low %v7832_v40, %v7850_v6  ;;  %v3997_v3 = vcombine.low %v7887_v56, %v7905_v63 }
  0xca   : > { %v3880_v30 = vrot.slane %v3872_v36, %v6856_v5  ;;  %v5656_v50 = vcombine.low %v8131_v22, %v8134_v29  ;;  %5815 = vrot.lane.b32.xlu0 %v5717_v31, %s6774_s5  ;;  %v8153_v27 = vrot.slane %v6536_v44, %v6856_v5  ;;  %v1223_v32 = vshll.u32 %v7840_v19, 16 }
  0xcb   : > { %3132 = vrot.lane.b32.xlu1 %v2718_v60, %s6775_s6  ;;  %v3347_v14 = vcombine.low %v3339_v55, %v3346_v52  ;;  %v3584_v15 = vrot.slane %v3576_v57, %v6856_v5  ;;  %v3871_v35 = vrot.slane %v3864_v26, %v6856_v5  ;;  %v4004_v40 = vrot.slane %v3997_v3, %v6856_v5 }
  0xcc   : > { %10181 = vst [vmem:[#allocation64_spill] sm:$0xff] %v8153_v27  ;;  %v5663_v8 = vrot.slane %v5656_v50, %v6856_v5  ;;  %v4301_v6 = vcombine.low %v7929_v33, %v7937_v45  ;;  %v3577_v4 = vcombine.low %v8153_v27, %v8078_v34  ;;  %v8166_v23 = vsel %vm7184_vm14, %v1218_v0, %v1223_v32 }
  0xcd   : > { %v4302_v24 = vcombine.low %v7942_v1, %v7951_v51  ;;  %v4303_v60 = vcombine.low %v7955_v18, %v7964_v38  ;;  %v3873_v48 = vcombine.low %v3871_v35, %v8134_v29  ;;  %v4006_v31 = vcombine.low %v8089_v28, %v4004_v40 }
  0xce   : > { %v5664_v49 = vcombine.low %v3880_v30, %v5663_v8  ;;  %v4304_v33 = vcombine.low %v7972_v12, %v8166_v23  ;;  %v3591_v45 = vrot.slane %v3577_v4, %v6856_v5  ;;  %v4311_v34 = vrot.slane %v4301_v6, %v6856_v5  ;;  %v10182_v8 = vld [vmem:[#allocation60_spill] sm:$0xff] }
  0xcf   : > { %3761 = vrot.lane.b32.xlu1 %v3347_v14, %s6773_s4  ;;  %v4318_v0 = vrot.slane %v4302_v24, %v6856_v5  ;;  %v4325_v1 = vrot.slane %v4303_v60, %v6856_v5  ;;  %v3887_v51 = vrot.slane %v3873_v48, %v6856_v5  ;;  %v4020_v18 = vrot.slane %v4006_v31, %v6856_v5  ;;  %v10184_v60 = vld [vmem:[#allocation54_spill] sm:$0xff] }
  0xd0   : > { %5805 = vrot.lane.b32.xlu0 %v5664_v49, %s6774_s5  ;;  %v4332_v38 = vrot.slane %v4304_v33, %v6856_v5  ;;  %v8187_v12 = vcombine.high %v7887_v56, %v7887_v56  ;;  %v3592_v36 = vcombine.low %v3584_v15, %v3591_v45  ;;  %v1544_v52 = vshrl.u32 %v7905_v63, 16  ;;  %v158_v33 = vld [vmem:[%s6854_s27 + $0x68] sm:$0xff] }
  0xd1   : > { %v4333_v55 = vcombine.low %v4311_v34, %v4318_v0  ;;  %v4546_v44 = vcombine.low %v8001_v9, %v8005_v58  ;;  %v3888_v57 = vcombine.low %v3880_v30, %v3887_v51  ;;  %v4021_v50 = vcombine.low %v8106_v62, %v4020_v18  ;;  %v10185_v45 = vld [vmem:[#allocation52_spill] sm:$0xff] }
  0xd2   : > { %v4334_v26 = vcombine.low %v4325_v1, %v4332_v38  ;;  %v1549_v3 = vshll.u32 %v8187_v12, 16  ;;  %v4547_v32 = vcombine.low %v8012_v11, %v8018_v61  ;;  %v4548_v15 = vcombine.low %v10182_v8, %v8032_v43 }
  0xd3   : > { %v4341_v14 = vrot.slane %v4333_v55, %v6856_v5  ;;  %v4556_v35 = vrot.slane %v4546_v44, %v6856_v5  ;;  %4134 = vrot.lane.b32.xlu1 %v3888_v57, %s6771_s29  ;;  %v2119_v11 = vcombine.low %v7900_v53, %v7840_v19  ;;  %v1226_v61 = vshrl.u32 %v7840_v19, 16  ;;  %v10183_v53 = vld [vmem:[#allocation55_spill] sm:$0xff] }
  0xd4   : > { %3771 = vrot.lane.b32.xlu0 %v3592_v36, %s6773_s4  ;;  %v4348_v9 = vrot.slane %v4334_v26, %v6856_v5  ;;  %v8205_v58 = vsel %vm7184_vm14, %v1544_v52, %v1549_v3  ;;  %v4563_v62 = vrot.slane %v4547_v32, %v6856_v5  ;;  %v4570_v30 = vrot.slane %v4548_v15, %v6856_v5  ;;  %v169_v55 = vld [vmem:[%s6854_s27 + $0xc0] sm:$0xff]  ;;  %v170_v52 = vld [vmem:[%s6854_s27 + $0xc8] sm:$0xff] }
  0xd5   : > { %v4549_v43 = vcombine.low %v8042_v17, %v8205_v58  ;;  %v6542_v40 = vcombine.high %v7808_v39, %v7815_v21  ;;  %v8217_v4 = vrot.slane %v2119_v11, %v6856_v5  ;;  %v2364_v24 = vcombine.low %v7905_v63, %v8187_v12  ;;  %v157_v21 = vld [vmem:[%s6854_s27 + $0x60] sm:$0xff] }
  0xd6   : > { %v4349_v6 = vcombine.low %v4341_v14, %v4348_v9  ;;  %v2393_v49 = vcombine.low %v10184_v60, %v10183_v53  ;;  %v4578_v17 = vcombine.low %v4556_v35, %v4563_v62  ;;  %v6545_v39 = vcombine.high %v7860_v42, %v7875_v20  ;;  %v10188_v20 = vld [vmem:[#allocation50_spill] sm:$0xff] }
  0xd7   : > { %v4577_v48 = vrot.slane %v4549_v43, %v6856_v5  ;;  %v4841_v31 = vrot.slane %v6542_v40, %v6856_v5  ;;  %v2149_v34 = vcombine.low %v10185_v45, %v8217_v4  ;;  %v8234_v0 = vrot.slane %v2364_v24, %v6856_v5  ;;  %v10191_v43 = vld [vmem:[#allocation48_spill] sm:$0xff] }
  0xd8   : > { %4144 = vrot.lane.b32.xlu0 %v4021_v50, %s6771_s29  ;;  %4763 = vrot.lane.b32.xlu1 %v4349_v6, %s6776_s7  ;;  %v8237_v1 = vrot.slane %v2393_v49, %v6856_v5  ;;  %v4586_v42 = vrot.slane %v4578_v17, %v6856_v5  ;;  %v4942_v36 = vrot.slane %v6545_v39, %v6856_v5  ;;  %v10190_v50 = vld [vmem:[#allocation49_spill] sm:$0xff] }
  0xd9   : > { %10186 = vst [vmem:[#allocation60_spill] sm:$0xff] %v8234_v0  ;;  %v4579_v18 = vcombine.low %v4570_v30, %v4577_v48  ;;  %v4842_v38 = vcombine.low %v10188_v20, %v4841_v31  ;;  %v8246_v44 = vrot.slane %v2149_v34, %v6856_v5  ;;  %v183_v57 = vpack.c.bf16 %v158_v33, %v157_v21 }
  0xda   : > { %10187 = vst [vmem:[#allocation55_spill] sm:$0xff] %v8237_v1  ;;  %v463_v26 = vcombine.high %v10190_v50, %v10190_v50  ;;  %v8252_v3 = vcombine.high %v7840_v19, %v7840_v19  ;;  %v4943_v8 = vcombine.low %v4942_v36, %v8234_v0  ;;  %v6398_v15 = vpack.c.bf16 %v158_v33, %v158_v33 }
  0xdb   : > { %10189 = vst [vmem:[#allocation54_spill] sm:$0xff] %v8246_v44  ;;  %v4593_v14 = vrot.slane %v4579_v18, %v6856_v5  ;;  %v4849_v32 = vrot.slane %v4842_v38, %v6856_v5  ;;  %v502_v9 = vrot.slane %v183_v57, %v6856_v5  ;;  %v189_v11 = vpack.c.bf16 %v170_v52, %v169_v55 }
  0xdc   : > { %v8258_v35 = vrot.slane %v463_v26, %v6856_v5  ;;  %v10192_v62 = vpack.c.bf16 %v10191_v43, %v10191_v43  ;;  %v4950_v24 = vrot.slane %v4943_v8, %v6856_v5  ;;  %v8268_v53 = vrot.slane %v6398_v15, %v6856_v5 }
  0xdd   : > { %v4594_v40 = vcombine.low %v4586_v42, %v4593_v14  ;;  %v4850_v6 = vcombine.low %v4849_v32, %v8246_v44  ;;  %v510_v60 = vcombine.high %v502_v9, %v502_v9  ;;  %v8271_v49 = vrot.slane %v502_v9, %v6856_v5 }
  0xde   : > { %v749_v30 = vrot.slane %v10192_v62, %v6856_v5  ;;  %v2165_v48 = vcombine.low %v8258_v35, %v8252_v3  ;;  %v4951_v31 = vcombine.low %v8237_v1, %v4950_v24  ;;  %v8282_v21 = vrot.slane %v8268_v53, %v6856_v5 }
  0xdf   : > { %4773 = vrot.lane.b32.xlu0 %v4594_v40, %s6776_s7  ;;  %5048 = vrot.lane.b32.xlu1 %v4850_v6, %s6770_s28  ;;  %v1231_v33 = vshll.u32 %v8258_v35, 16  ;;  %v8286_v45 = vrot.slane %v510_v60, %v6856_v5  ;;  %v8299_v38 = vcombine.high %v7905_v63, %v7905_v63  ;;  %v6404_v36 = vpack.c.bf16 %v170_v52, %v170_v52 }
  0xe0   : > { %v751_v17 = vcombine.high %v749_v30, %v749_v30  ;;  %10193 = vst [vmem:[#allocation52_spill] sm:$0xff] %v8282_v21  ;;  %v8289_v34 = vrot.slane %v2165_v48, %v6856_v5  ;;  %v8292_v18 = vrot.slane %v749_v30, %v6856_v5  ;;  %v790_v55 = vrot.slane %v189_v11, %v6856_v5 }
  0xe1   : > { %v8304_v57 = vcombine.high %v8271_v49, %v8271_v49  ;;  %v2166_v50 = vcombine.low %v8271_v49, %v8286_v45  ;;  %v6523_v26 = vcombine.high %v8271_v49, %v8286_v45  ;;  %v8318_v52 = vrot.slane %v6404_v36, %v6856_v5 }
  0xe2   : > { %10194 = vst [vmem:[#allocation49_spill] sm:$0xff] %v8289_v34  ;;  %v8295_v42 = vrot.slane %v751_v17, %v6856_v5  ;;  %v5119_v14 = vcombine.low %v8217_v4, %v8289_v34  ;;  %v8314_v32 = vcombine.high %v8292_v18, %v8292_v18  ;;  %v798_v8 = vcombine.high %v790_v55, %v790_v55 }
  0xe3   : > { %5058 = vrot.lane.b32.xlu0 %v4951_v31, %s6770_s28  ;;  %v8321_v15 = vrot.slane %v790_v55, %v6856_v5  ;;  %v2410_v9 = vcombine.low %v8299_v38, %v8292_v18  ;;  %v8326_v11 = vrot.slane %v2166_v50, %v6856_v5  ;;  %v8329_v4 = vrot.slane %v6523_v26, %v6856_v5 }
  0xe4   : > { %v5127_v43 = vrot.slane %v5119_v14, %v6856_v5  ;;  %v2411_v62 = vcombine.low %v8295_v42, %v8314_v32  ;;  %v8335_v30 = vrot.slane %v798_v8, %v6856_v5  ;;  %v8342_v6 = vcombine.high %v8286_v45, %v8286_v45 }
  0xe5   : > { %10195 = vst [vmem:[#allocation48_spill] sm:$0xff] %v8326_v11  ;;  %v8338_v40 = vrot.slane %v2410_v9, %v6856_v5  ;;  %v8346_v24 = vcombine.high %v8258_v35, %v8258_v35  ;;  %v5120_v60 = vcombine.low %v8326_v11, %v8329_v4  ;;  %v8357_v17 = vsel %vm7184_vm14, %v1226_v61, %v1231_v33 }
  0xe6   : > { %v8351_v48 = vrot.slane %v2411_v62, %v6856_v5  ;;  %v1234_v31 = vshrl.u32 %v8258_v35, 16  ;;  %v2412_v36 = vcombine.low %v8321_v15, %v8335_v30  ;;  %v1239_v50 = vshll.u32 %v8252_v3, 16 }
  0xe7   : > { %v5204_v55 = vcombine.low %v8234_v0, %v8338_v40  ;;  %v1242_v26 = vshrl.u32 %v8252_v3, 16  ;;  %v5134_v14 = vrot.slane %v5120_v60, %v6856_v5  ;;  %v1247_v8 = vshll.u32 %v8346_v24, 16 }
  0xe8   : > { %v1251_v9 = vshrl.u32 %v8271_v49, 16  ;;  %v1256_v61 = vshll.u32 %v8286_v45, 16  ;;  %v8371_v33 = vrot.slane %v2412_v36, %v6856_v5  ;;  %v8376_v39 = vsel %vm7184_vm14, %v1234_v31, %v1239_v50 }
  0xe9   : > { %v5212_v62 = vrot.slane %v5204_v55, %v6856_v5  ;;  %v1259_v51 = vshrl.u32 %v8286_v45, 16  ;;  %v5135_v11 = vcombine.low %v5127_v43, %v5134_v14  ;;  %v8381_v60 = vsel %vm7184_vm14, %v1242_v26, %v1247_v8 }
  0xea   : > { %10196 = vst [vmem:[#allocation65_spill] sm:$0xff] %v8371_v33  ;;  %v8385_v44 = vsel %vm7184_vm14, %v1251_v9, %v1256_v61  ;;  %v1264_v36 = vshll.u32 %v8304_v57, 16  ;;  %v5205_v55 = vcombine.low %v8351_v48, %v8371_v33  ;;  %v1267_v1 = vshrl.u32 %v8304_v57, 16 }
  0xeb   : > { %v1272_v31 = vshll.u32 %v8342_v6, 16  ;;  %v1275_v50 = vshrl.u32 %v8342_v6, 16  ;;  %5325 = vrot.lane.b32.xlu1 %v5135_v11, %s6772_s30  ;;  %v1280_v26 = vshll.u32 %v8282_v21, 16  ;;  %v2722_v14 = vcombine.low %v8166_v23, %v8357_v17 }
  0xec   : > { %v8396_v43 = vsel %vm7184_vm14, %v1259_v51, %v1264_v36  ;;  %v2768_v8 = vcombine.low %v8376_v39, %v8381_v60  ;;  %v5219_v9 = vrot.slane %v5205_v55, %v6856_v5  ;;  %v8412_v51 = vcombine.high %v8321_v15, %v8321_v15 }
  0xed   : > { %v8406_v61 = vsel %vm7184_vm14, %v1267_v1, %v1272_v31  ;;  %v2769_v11 = vcombine.low %v8385_v44, %v8396_v43  ;;  %v8416_v36 = vsel %vm7184_vm14, %v1275_v50, %v1280_v26  ;;  %v8419_v23 = vrot.slane %v2722_v14, %v6856_v5 }
  0xee   : > { %v8422_v55 = vrot.slane %v2768_v8, %v6856_v5  ;;  %v8426_v1 = vcombine.high %v8295_v42, %v8295_v42  ;;  %v5220_v31 = vcombine.low %v5212_v62, %v5219_v9  ;;  %v2770_v33 = vcombine.low %v8406_v61, %v8416_v36 }
  0xef   : > { %v8431_v20 = vrot.slane %v2769_v11, %v6856_v5  ;;  %v1557_v50 = vshll.u32 %v8299_v38, 16  ;;  %v1560_v14 = vshrl.u32 %v8299_v38, 16  ;;  %v1565_v8 = vshll.u32 %v8292_v18, 16 }
  0xf0   : > { %10197 = vst [vmem:[#allocation66_spill] sm:$0xff] %v8422_v55  ;;  %v5396_v26 = vcombine.low %v8419_v23, %v8422_v55  ;;  %v1568_v0 = vshrl.u32 %v8292_v18, 16  ;;  %5335 = vrot.lane.b32.xlu0 %v5220_v31, %s6772_s30  ;;  %v8441_v62 = vrot.slane %v2770_v33, %v6856_v5  ;;  %v10200_v9 = vshrl.u32 %v8187_v12, 16 }
  0xf1   : > { %10198 = vst [vmem:[#allocation67_spill] sm:$0xff] %v8431_v20  ;;  %v1573_v37 = vshll.u32 %v8295_v42, 16  ;;  %v1576_v27 = vshrl.u32 %v8295_v42, 16  ;;  %v8454_v2 = vsel %vm7184_vm14, %v1560_v14, %v1565_v8  ;;  %v1581_v31 = vshll.u32 %v8314_v32, 16 }
  0xf2   : > { %10199 = vst [vmem:[#allocation68_spill] sm:$0xff] %v8441_v62  ;;  %v8447_v11 = vsel %vm7184_vm14, %v10200_v9, %v1557_v50  ;;  %v5404_v38 = vrot.slane %v5396_v26, %v6856_v5  ;;  %v1584_v33 = vshrl.u32 %v8314_v32, 16  ;;  %v5397_v12 = vcombine.low %v8431_v20, %v8441_v62 }
  0xf3   : > { %v8462_v50 = vsel %vm7184_vm14, %v1568_v0, %v1573_v37  ;;  %v1589_v9 = vshll.u32 %v8426_v1, 16  ;;  %v1593_v46 = vshrl.u32 %v8321_v15, 16  ;;  %v8468_v26 = vsel %vm7184_vm14, %v1576_v27, %v1581_v31 }
  0xf4   : > { %v1598_v14 = vshll.u32 %v8335_v30, 16  ;;  %v1601_v8 = vshrl.u32 %v8335_v30, 16  ;;  %v1606_v47 = vshll.u32 %v8412_v51, 16  ;;  %v5411_v25 = vrot.slane %v5397_v12, %v6856_v5 }
  0xf5   : > { %v8476_v37 = vsel %vm7184_vm14, %v1584_v33, %v1589_v9  ;;  %v2967_v0 = vcombine.low %v8205_v58, %v8447_v11  ;;  %v3013_v62 = vcombine.low %v8454_v2, %v8462_v50  ;;  %v2996_v33 = vcombine.low %v8050_v13, %v8053_v54  ;;  %v8508_v54 = vpop.permute.xlu0 %5044 }
  0xf6   : > { %v8484_v27 = vsel %vm7184_vm14, %v1593_v46, %v1598_v14  ;;  %v8488_v31 = vsel %vm7184_vm14, %v1601_v8, %v1606_v47  ;;  %v3014_v12 = vcombine.low %v8468_v26, %v8476_v37  ;;  %v5412_v9 = vcombine.low %v5404_v38, %v5411_v25  ;;  %10201 = vst [vmem:[#allocation69_spill] sm:$0xff] %v8508_v54 }
  0xf7   : > { %v2995_v58 = vrot.slane %v2967_v0, %v6856_v5  ;;  %v3015_v55 = vcombine.low %v8484_v27, %v8488_v31  ;;  %v8498_v20 = vrot.slane %v3013_v62, %v6856_v5  ;;  %v3004_v47 = vrot.slane %v2996_v33, %v6856_v5  ;;  %v10205_v33 = vld [vmem:[#allocation57_spill] sm:$0xff] }
  0xf8   : > { %v8501_v46 = vrot.slane %v3014_v12, %v6856_v5  ;;  %v6537_v14 = vcombine.high %v7887_v56, %v7905_v63  ;;  %v3642_v13 = vcombine.low %v8292_v18, %v8295_v42  ;;  %5618 = vrot.lane.b32.xlu1 %v5412_v9, %s6777_s8  ;;  %v6538_v8 = vcombine.high %v8292_v18, %v8295_v42  ;;  %v10204_v12 = vld [vmem:[#allocation58_spill] sm:$0xff] }
  0xf9   : > { %v8512_v25 = vrot.slane %v3015_v55, %v6856_v5  ;;  %v5481_v62 = vcombine.low %v2995_v58, %v8498_v20  ;;  %v2997_v38 = vcombine.low %v8067_v7, %v2995_v58  ;;  %v3644_v56 = vcombine.low %v8335_v30, %v8412_v51 }
  0xfa   : > { %v3624_v0 = vrot.slane %v6537_v14, %v6856_v5  ;;  %v8522_v63 = vrot.slane %v3642_v13, %v6856_v5  ;;  %v2751_v9 = vcombine.low %v10205_v33, %v10204_v12  ;;  %v8531_v18 = vrot.slane %v6538_v8, %v6856_v5  ;;  %v10206_v14 = vld [vmem:[#allocation59_spill] sm:$0xff]  ;;  %v8545_v8 = vpop.permute.xlu1 %4128 }
  0xfb   : > { %10202 = vst [vmem:[#allocation70_spill] sm:$0xff] %v8512_v25  ;;  %v5482_v55 = vcombine.low %v8501_v46, %v8512_v25  ;;  %v5489_v54 = vrot.slane %v5481_v62, %v6856_v5  ;;  %v3011_v7 = vrot.slane %v2997_v38, %v6856_v5  ;;  %v8534_v42 = vrot.slane %v3644_v56, %v6856_v5 }
  0xfc   : > { %10203 = vst [vmem:[#allocation71_spill] sm:$0xff] %v8522_v63  ;;  %v4030_v58 = vcombine.low %v3624_v0, %v8522_v63  ;;  %v2752_v13 = vcombine.low %v10206_v14, %v8419_v23  ;;  %v2759_v12 = vrot.slane %v2751_v9, %v6856_v5  ;;  %v3351_v62 = vcombine.low %v7840_v19, %v8258_v35 }
  0xfd   : > { %v5496_v33 = vrot.slane %v5482_v55, %v6856_v5  ;;  %v3012_v25 = vcombine.low %v3004_v47, %v3011_v7  ;;  %v6532_v38 = vcombine.high %v7840_v19, %v8258_v35  ;;  %v5718_v63 = vcombine.low %v8531_v18, %v8534_v42  ;;  %v8555_v47 = vpop.permute.xlu0 %3755 }
  0xfe   : > { %v8548_v56 = vrot.slane %v4030_v58, %v6856_v5  ;;  %v2766_v23 = vrot.slane %v2752_v13, %v6856_v5  ;;  %v3398_v9 = vcombine.low %v8286_v45, %v8304_v57  ;;  %v3379_v19 = vrot.slane %v3351_v62, %v6856_v5 }
  0xff   : > { %v5497_v55 = vcombine.low %v5489_v54, %v5496_v33  ;;  %3144 = vrot.lane.b32.xlu1 %v3012_v25, %s6775_s6  ;;  %v3399_v35 = vcombine.low %v8342_v6, %v8282_v21  ;;  %v8562_v7 = vrot.slane %v6532_v38, %v6856_v5  ;;  %v5725_v58 = vrot.slane %v5718_v63, %v6856_v5 }
 0x100   : > { %v2767_v14 = vcombine.low %v2759_v12, %v2766_v23  ;;  %v8566_v13 = vrot.slane %v3398_v9, %v6856_v5  ;;  %v3380_v57 = vcombine.low %v8121_v41, %v8131_v22  ;;  %v3381_v6 = vcombine.low %v8134_v29, %v3379_v19 }
 0x101   : > { %5628 = vrot.lane.b32.xlu0 %v5497_v55, %s6777_s8  ;;  %v8572_v54 = vrot.slane %v3399_v35, %v6856_v5  ;;  %v5665_v25 = vcombine.low %v3379_v19, %v8562_v7  ;;  %v3625_v33 = vcombine.low %v8082_v10, %v8089_v28  ;;  %v5726_v63 = vcombine.low %v8548_v56, %v5725_v58  ;;  %v8589_v28 = vpop.permute.xlu1 %5319  ;;  %v8601_v9 = vpop.permute.xlu0 %5042 }
 0x102   : > { %v3388_v12 = vrot.slane %v3380_v57, %v6856_v5  ;;  %v3626_v62 = vcombine.low %v8093_v59, %v3624_v0  ;;  %v3889_v41 = vcombine.low %v8252_v3, %v8271_v49  ;;  %v3395_v29 = vrot.slane %v3381_v6, %v6856_v5 }
 0x103   : > { %3134 = vrot.lane.b32.xlu1 %v2767_v14, %s6775_s6  ;;  %v3898_v22 = vcombine.low %v8566_v13, %v8572_v54  ;;  %v5672_v38 = vrot.slane %v5665_v25, %v6856_v5  ;;  %v3633_v10 = vrot.slane %v3625_v33, %v6856_v5  ;;  %v4022_v3 = vcombine.low %v8314_v32, %v8321_v15 }
 0x104   : > { %v3640_v23 = vrot.slane %v3626_v62, %v6856_v5  ;;  %v3896_v59 = vrot.slane %v3889_v41, %v6856_v5  ;;  %v10207_v49 = vcombine.high %v8268_v53, %v8268_v53  ;;  %v3396_v35 = vcombine.low %v3388_v12, %v3395_v29 }
 0x105   : > { %5817 = vrot.lane.b32.xlu0 %v5726_v63, %s6774_s5  ;;  %v3912_v55 = vrot.slane %v3898_v22, %v6856_v5  ;;  %v1283_v58 = vshrl.u32 %v8282_v21, 16  ;;  %v4350_v14 = vcombine.low %v8357_v17, %v8376_v39  ;;  %v4029_v25 = vrot.slane %v4022_v3, %v6856_v5  ;;  %v8632_v41 = vpop.permute.xlu1 %3757 }
 0x106   : > { %v8599_v0 = vrot.slane %v10207_v49, %v6856_v5  ;;  %v3641_v57 = vcombine.low %v3633_v10, %v3640_v23  ;;  %v3897_v32 = vcombine.low %v3379_v19, %v3896_v59  ;;  %v4351_v33 = vcombine.low %v8381_v60, %v8385_v44  ;;  %v8638_v23 = vpop.permute.xlu0 %4130 }
 0x107   : > { %v5673_v6 = vcombine.low %v5672_v38, %v3912_v55  ;;  %3763 = vrot.lane.b32.xlu1 %v3396_v35, %s6773_s4  ;;  %v4352_v63 = vcombine.low %v8396_v43, %v8406_v61  ;;  %v4360_v12 = vrot.slane %v4350_v14, %v6856_v5  ;;  %v4031_v39 = vcombine.low %v4029_v25, %v8534_v42 }
 0x108   : > { %v1288_v53 = vshll.u32 %v8599_v0, 16  ;;  %v3905_v62 = vrot.slane %v3897_v32, %v6856_v5  ;;  %v8624_v19 = vcombine.high %v8335_v30, %v8335_v30  ;;  %v4367_v60 = vrot.slane %v4351_v33, %v6856_v5 }
 0x109   : > { %5807 = vrot.lane.b32.xlu0 %v5673_v6, %s6774_s5  ;;  %v4374_v43 = vrot.slane %v4352_v63, %v6856_v5  ;;  %v1609_v61 = vshrl.u32 %v8412_v51, 16  ;;  %v4045_v38 = vrot.slane %v4031_v39, %v6856_v5  ;;  %v4595_v10 = vcombine.low %v8447_v11, %v8454_v2  ;;  %v160_v6 = vld [vmem:[%s6854_s27 + $0x78] sm:$0xff]  ;;  %v8673_v33 = vpop.permute.xlu1 %5801 }
 0x10a   : > { %v8620_v17 = vsel %vm7184_vm14, %v1283_v58, %v1288_v53  ;;  %v3913_v22 = vcombine.low %v3905_v62, %v3912_v55  ;;  %v1614_v29 = vshll.u32 %v8624_v19, 16  ;;  %v4382_v59 = vcombine.low %v4360_v12, %v4367_v60  ;;  %v159_v53 = vld [vmem:[%s6854_s27 + $0x70] sm:$0xff]  ;;  %10208 = vst [vmem:[#allocation58_spill] sm:$0xff] %v8673_v33  ;;  %v172_v62 = vld [vmem:[%s6854_s27 + $0xd8] sm:$0xff]  ;;  %v8685_v39 = vpop.permute.xlu0 %3126 }
 0x10b   : > { %v4353_v44 = vcombine.low %v8416_v36, %v8620_v17  ;;  %v4596_v3 = vcombine.low %v8462_v50, %v8468_v26  ;;  %v4597_v51 = vcombine.low %v8476_v37, %v8484_v27  ;;  %v4046_v49 = vcombine.low %v8548_v56, %v4045_v38  ;;  %v171_v12 = vld [vmem:[%s6854_s27 + $0xd0] sm:$0xff] }
 0x10c   : > { %4136 = vrot.lane.b32.xlu1 %v3913_v22, %s6771_s29  ;;  %v8649_v55 = vsel %vm7184_vm14, %v1609_v61, %v1614_v29  ;;  %v4605_v2 = vrot.slane %v4595_v10, %v6856_v5  ;;  %v2168_v11 = vcombine.low %v8282_v21, %v8599_v0  ;;  %v4390_v26 = vrot.slane %v4382_v59, %v6856_v5 }
 0x10d   : > { %v4381_v36 = vrot.slane %v4353_v44, %v6856_v5  ;;  %3773 = vrot.lane.b32.xlu0 %v3641_v57, %s6773_s4  ;;  %v4598_v37 = vcombine.low %v8488_v31, %v8649_v55  ;;  %v4612_v27 = vrot.slane %v4596_v3, %v6856_v5  ;;  %v4619_v56 = vrot.slane %v4597_v51, %v6856_v5 }
 0x10e   : > { %v8661_v35 = vrot.slane %v2168_v11, %v6856_v5  ;;  %v4851_v58 = vcombine.low %v8346_v24, %v8286_v45  ;;  %v6526_v14 = vcombine.high %v8321_v15, %v8335_v30  ;;  %v2442_v25 = vcombine.low %v8338_v40, %v8351_v48 }
 0x10f   : > { %v4383_v50 = vcombine.low %v4374_v43, %v4381_v36  ;;  %v4626_v32 = vrot.slane %v4598_v37, %v6856_v5  ;;  %v4627_v31 = vcombine.low %v4605_v2, %v4612_v27  ;;  %v4952_v15 = vcombine.low %v8426_v1, %v8335_v30 }
 0x110   : > { %v2198_v63 = vcombine.low %v8329_v4, %v8661_v35  ;;  %v4858_v45 = vrot.slane %v4851_v58, %v6856_v5  ;;  %v8679_v24 = vrot.slane %v6526_v14, %v6856_v5  ;;  %v8690_v4 = vrot.slane %v2442_v25, %v6856_v5  ;;  %v8720_v58 = vpop.permute.xlu0 %5612 }
 0x111   : > { %v4397_v57 = vrot.slane %v4383_v50, %v6856_v5  ;;  %4146 = vrot.lane.b32.xlu0 %v4046_v49, %s6771_s29  ;;  %v4628_v48 = vcombine.low %v4619_v56, %v4626_v32  ;;  %v4635_v44 = vrot.slane %v4627_v31, %v6856_v5  ;;  %v4959_v30 = vrot.slane %v4952_v15, %v6856_v5  ;;  %v8713_v50 = vpop.permute.xlu1 %5321 }
 0x112   : > { %10209 = vst [vmem:[#allocation57_spill] sm:$0xff] %v8679_v24  ;;  %10210 = vst [vmem:[#allocation59_spill] sm:$0xff] %v8690_v4  ;;  %v8693_v60 = vrot.slane %v2198_v63, %v6856_v5  ;;  %v4859_v43 = vcombine.low %v8289_v34, %v4858_v45  ;;  %v184_v1 = vpack.c.bf16 %v160_v6, %v159_v53 }
 0x113   : > { %v4398_v40 = vcombine.low %v4390_v26, %v4397_v57  ;;  %v4642_v61 = vrot.slane %v4628_v48, %v6856_v5  ;;  %v8701_v22 = vcombine.high %v8282_v21, %v8282_v21  ;;  %v6399_v38 = vpack.c.bf16 %v160_v6, %v160_v6  ;;  %10213 = vst [vmem:[#allocation74_spill] sm:$0xff] %v8713_v50 }
 0x114   : > { %10211 = vst [vmem:[#allocation72_spill] sm:$0xff] %v8693_v60  ;;  %v190_v29 = vpack.c.bf16 %v172_v62, %v171_v12  ;;  %v4866_v10 = vrot.slane %v4859_v43, %v6856_v5  ;;  %v4960_v36 = vcombine.low %v4959_v30, %v8679_v24  ;;  %v550_v59 = vrot.slane %v184_v1, %v6856_v5 }
 0x115   : > { %4765 = vrot.lane.b32.xlu1 %v4398_v40, %s6776_s7  ;;  %v799_v3 = vcombine.high %v8318_v52, %v8318_v52  ;;  %v4643_v51 = vcombine.low %v4635_v44, %v4642_v61  ;;  %v557_v49 = vrot.slane %v6399_v38, %v6856_v5  ;;  %v8711_v2 = vrot.slane %v8318_v52, %v6856_v5  ;;  %v8772_v38 = vpop.permute.xlu1 %4757 }
 0x116   : > { %v6405_v11 = vpack.c.bf16 %v172_v62, %v172_v62  ;;  %v4867_v26 = vcombine.low %v4866_v10, %v8693_v60  ;;  %v4967_v37 = vrot.slane %v4960_v36, %v6856_v5  ;;  %v558_v27 = vcombine.high %v550_v59, %v550_v59 }
 0x117   : > { %10212 = vst [vmem:[#allocation73_spill] sm:$0xff] %v8711_v2  ;;  %v8718_v56 = vrot.slane %v550_v59, %v6856_v5  ;;  %4775 = vrot.lane.b32.xlu0 %v4643_v51, %s6776_s7  ;;  %v559_v14 = vcombine.high %v557_v49, %v557_v49  ;;  %v8724_v57 = vrot.slane %v557_v49, %v6856_v5  ;;  %v1291_v59 = vshrl.u32 %v8599_v0, 16 }
 0x118   : > { %v8727_v52 = vrot.slane %v799_v3, %v6856_v5  ;;  %v8731_v32 = vcombine.high %v8711_v2, %v8711_v2  ;;  %v4968_v31 = vcombine.low %v8690_v4, %v4967_v37  ;;  %v8736_v25 = vrot.slane %v558_v27, %v6856_v5  ;;  %v8781_v3 = vpop.permute.xlu0 %3128 }
 0x119   : > { %5050 = vrot.lane.b32.xlu1 %v4867_v26, %s6770_s28  ;;  %v588_v53 = vcombine.high %v8718_v56, %v8718_v56  ;;  %v2214_v6 = vcombine.low %v8701_v22, %v8718_v56  ;;  %v838_v63 = vrot.slane %v190_v29, %v6856_v5  ;;  %v8744_v45 = vrot.slane %v6405_v11, %v6856_v5  ;;  %v8823_v4 = vpop.permute.xlu1 %4759 }
 0x11a   : > { %10214 = vst [vmem:[#allocation75_spill] sm:$0xff] %v8727_v52  ;;  %v2459_v15 = vcombine.low %v8711_v2, %v8727_v52  ;;  %v8749_v12 = vrot.slane %v559_v14, %v6856_v5  ;;  %v590_v62 = vcombine.high %v8736_v25, %v8736_v25  ;;  %v8759_v44 = vcombine.high %v8599_v0, %v8599_v0 }
 0x11b   : > { %10215 = vst [vmem:[#allocation76_spill] sm:$0xff] %v8744_v45  ;;  %v2215_v40 = vcombine.low %v8736_v25, %v588_v53  ;;  %v8755_v48 = vrot.slane %v2214_v6, %v6856_v5  ;;  %5060 = vrot.lane.b32.xlu0 %v4968_v31, %s6770_s28  ;;  %v846_v43 = vcombine.high %v838_v63, %v838_v63  ;;  %v1296_v27 = vshll.u32 %v8701_v22, 16 }
 0x11c   : > { %v8763_v30 = vrot.slane %v838_v63, %v6856_v5  ;;  %v8767_v1 = vrot.slane %v8744_v45, %v6856_v5  ;;  %v8770_v61 = vrot.slane %v2459_v15, %v6856_v5  ;;  %v2216_v29 = vcombine.low %v590_v62, %v8724_v57  ;;  %10222 = vst [vmem:[#allocation83_spill] sm:$0xff] %v8823_v4  ;;  %v8830_v45 = vpop.permute.xlu0 %5614 }
 0x11d   : > { %10216 = vst [vmem:[#allocation77_spill] sm:$0xff] %v8755_v48  ;;  %v8776_v10 = vrot.slane %v2215_v40, %v6856_v5  ;;  %v5136_v36 = vcombine.low %v8661_v35, %v8755_v48  ;;  %v8784_v51 = vrot.slane %v846_v43, %v6856_v5  ;;  %v1299_v14 = vshrl.u32 %v8701_v22, 16  ;;  %10223 = vst [vmem:[#allocation84_spill] sm:$0xff] %v8830_v45 }
 0x11e   : > { %10217 = vst [vmem:[#allocation78_spill] sm:$0xff] %v8770_v61  ;;  %v8788_v49 = vcombine.high %v8763_v30, %v8763_v30  ;;  %v2460_v11 = vcombine.low %v8731_v32, %v8763_v30  ;;  %v5221_v26 = vcombine.low %v8679_v24, %v8770_v61  ;;  %v8795_v37 = vrot.slane %v2216_v29, %v6856_v5 }
 0x11f   : > { %10218 = vst [vmem:[#allocation79_spill] sm:$0xff] %v8776_v10  ;;  %v5144_v35 = vrot.slane %v5136_v36, %v6856_v5  ;;  %v1304_v15 = vshll.u32 %v8759_v44, 16  ;;  %v8811_v43 = vsel %vm7184_vm14, %v1291_v59, %v1296_v27  ;;  %v1308_v29 = vshrl.u32 %v8718_v56, 16 }
 0x120   : > { %10219 = vst [vmem:[#allocation80_spill] sm:$0xff] %v8795_v37  ;;  %v2461_v31 = vcombine.low %v8784_v51, %v8788_v49  ;;  %v8803_v6 = vrot.slane %v2460_v11, %v6856_v5  ;;  %v5229_v63 = vrot.slane %v5221_v26, %v6856_v5  ;;  %v5137_v40 = vcombine.low %v8776_v10, %v8795_v37 }
 0x121   : > { %v1313_v36 = vshll.u32 %v8736_v25, 16  ;;  %v8820_v11 = vsel %vm7184_vm14, %v1299_v14, %v1304_v15  ;;  %v1316_v26 = vshrl.u32 %v8736_v25, 16  ;;  %v1321_v60 = vshll.u32 %v588_v53, 16 }
 0x122   : > { %10220 = vst [vmem:[#allocation81_spill] sm:$0xff] %v8803_v6  ;;  %v8816_v48 = vrot.slane %v2461_v31, %v6856_v5  ;;  %v5151_v34 = vrot.slane %v5137_v40, %v6856_v5  ;;  %v1324_v27 = vshrl.u32 %v588_v53, 16  ;;  %v1329_v24 = vshll.u32 %v590_v62, 16 }
 0x123   : > { %v8828_v59 = vsel %vm7184_vm14, %v1308_v29, %v1313_v36  ;;  %v8836_v14 = vsel %vm7184_vm14, %v1316_v26, %v1321_v60  ;;  %v1332_v15 = vshrl.u32 %v590_v62, 16  ;;  %v1337_v61 = vshll.u32 %v8724_v57, 16 }
 0x124   : > { %10221 = vst [vmem:[#allocation82_spill] sm:$0xff] %v8816_v48  ;;  %v5222_v31 = vcombine.low %v8803_v6, %v8816_v48  ;;  %v5152_v10 = vcombine.low %v5144_v35, %v5151_v34  ;;  %v8841_v40 = vsel %vm7184_vm14, %v1324_v27, %v1329_v24  ;;  %v1340_v53 = vshrl.u32 %v8724_v57, 16 }
 0x125   : > { %v1345_v29 = vshll.u32 %v8749_v12, 16  ;;  %v8848_v6 = vsel %vm7184_vm14, %v1332_v15, %v1337_v61  ;;  %v2771_v60 = vcombine.low %v8620_v17, %v8811_v43  ;;  %v2817_v34 = vcombine.low %v8820_v11, %v8828_v59 }
 0x126   : > { %v5236_v36 = vrot.slane %v5222_v31, %v6856_v5  ;;  %5327 = vrot.lane.b32.xlu1 %v5152_v10, %s6772_s30  ;;  %v2818_v62 = vcombine.low %v8836_v14, %v8841_v40  ;;  %v8863_v35 = vcombine.high %v8784_v51, %v8784_v51  ;;  %v891_v61 = vcombine.high %v8727_v52, %v8727_v52  ;;  %v8875_v31 = vpop.permute.xlu1 %3140 }
 0x127   : > { %v8857_v24 = vsel %vm7184_vm14, %v1340_v53, %v1345_v29  ;;  %v8868_v26 = vrot.slane %v2771_v60, %v6856_v5  ;;  %v8873_v27 = vrot.slane %v2817_v34, %v6856_v5  ;;  %10225 = vst [vmem:[#allocation86_spill] sm:$0xff] %v8875_v31  ;;  %v1617_v53 = vshrl.u32 %v8624_v19, 16 }
 0x128   : > { %v5237_v17 = vcombine.low %v5229_v63, %v5236_v36  ;;  %v2819_v10 = vcombine.low %v8848_v6, %v8857_v24  ;;  %v8878_v15 = vrot.slane %v2818_v62, %v6856_v5  ;;  %v1622_v29 = vshll.u32 %v8711_v2, 16  ;;  %v8883_v36 = vpop.permute.xlu0 %5803 }
 0x129   : > { %10224 = vst [vmem:[#allocation85_spill] sm:$0xff] %v8873_v27  ;;  %v1625_v63 = vshrl.u32 %v8711_v2, 16  ;;  %10227 = vst [vmem:[#allocation88_spill] sm:$0xff] %v8883_v36  ;;  %v5413_v34 = vcombine.low %v8868_v26, %v8873_v27  ;;  %v1630_v31 = vshll.u32 %v8727_v52, 16  ;;  %v1633_v62 = vshrl.u32 %v8727_v52, 16 }
 0x12a   : > { %10226 = vst [vmem:[#allocation87_spill] sm:$0xff] %v8878_v15  ;;  %5337 = vrot.lane.b32.xlu0 %v5237_v17, %s6772_s30  ;;  %v8887_v60 = vrot.slane %v2819_v10, %v6856_v5  ;;  %v8895_v48 = vsel %vm7184_vm14, %v1617_v53, %v1622_v29  ;;  %v1638_v37 = vshll.u32 %v8731_v32, 16  ;;  %v1641_v36 = vshrl.u32 %v8731_v32, 16  ;;  %v8921_v4 = vpop.permute.xlu1 %3130 }
 0x12b   : > { %v1646_v45 = vshll.u32 %v891_v61, 16  ;;  %v5421_v10 = vrot.slane %v5413_v34, %v6856_v5  ;;  %v8904_v27 = vsel %vm7184_vm14, %v1625_v63, %v1630_v31  ;;  %v1650_v50 = vshrl.u32 %v8763_v30, 16  ;;  %10229 = vst [vmem:[#allocation90_spill] sm:$0xff] %v8921_v4 }
 0x12c   : > { %10228 = vst [vmem:[#allocation89_spill] sm:$0xff] %v8887_v60  ;;  %v5414_v17 = vcombine.low %v8878_v15, %v8887_v60  ;;  %v8909_v53 = vsel %vm7184_vm14, %v1633_v62, %v1638_v37  ;;  %v1655_v21 = vshll.u32 %v8784_v51, 16  ;;  %v1658_v60 = vshrl.u32 %v8784_v51, 16 }
 0x12d   : > { %v8913_v29 = vsel %vm7184_vm14, %v1641_v36, %v1646_v45  ;;  %v1663_v15 = vshll.u32 %v8788_v49, 16  ;;  %v1666_v31 = vshrl.u32 %v8788_v49, 16  ;;  %v1671_v63 = vshll.u32 %v8863_v35, 16 }
 0x12e   : > { %v5428_v34 = vrot.slane %v5414_v17, %v6856_v5  ;;  %v8925_v37 = vsel %vm7184_vm14, %v1650_v50, %v1655_v21  ;;  %v3016_v45 = vcombine.low %v8649_v55, %v8895_v48  ;;  %v3062_v36 = vcombine.low %v8904_v27, %v8909_v53  ;;  %v8933_v17 = vpop.permute.xlu0 %3769 }
 0x12f   : > { %v3045_v62 = vcombine.low %v8498_v20, %v8501_v46  ;;  %10230 = vst [vmem:[#allocation91_spill] sm:$0xff] %v8933_v17  ;;  %v8937_v33 = vsel %vm7184_vm14, %v1658_v60, %v1663_v15  ;;  %v8941_v21 = vsel %vm7184_vm14, %v1666_v31, %v1671_v63  ;;  %v3063_v55 = vcombine.low %v8913_v29, %v8925_v37  ;;  %v10240_v17 = vld [vmem:[#allocation66_spill] sm:$0xff] }
 0x130   : > { %v5429_v49 = vcombine.low %v5421_v10, %v5428_v34  ;;  %v3044_v50 = vrot.slane %v3016_v45, %v6856_v5  ;;  %v3064_v4 = vcombine.low %v8937_v33, %v8941_v21  ;;  %v8949_v20 = vrot.slane %v3062_v36, %v6856_v5  ;;  %v10234_v45 = vld [vmem:[#allocation70_spill] sm:$0xff] }
 0x131   : > { %v3053_v46 = vrot.slane %v3045_v62, %v6856_v5  ;;  %v8954_v15 = vrot.slane %v3063_v55, %v6856_v5  ;;  %v3645_v60 = vcombine.low %v8624_v19, %v8711_v2  ;;  %v3691_v10 = vcombine.low %v8727_v52, %v8731_v32  ;;  %v10251_v52 = vld [vmem:[#allocation15_spill] sm:$0xff] }
 0x132   : > { %10231 = vst [vmem:[#allocation92_spill] sm:$0xff] %v8949_v20  ;;  %5620 = vrot.lane.b32.xlu1 %v5429_v49, %s6777_s8  ;;  %v3692_v34 = vcombine.low %v891_v61, %v8784_v51  ;;  %v8962_v31 = vrot.slane %v3064_v4, %v6856_v5  ;;  %v5498_v63 = vcombine.low %v3044_v50, %v8949_v20  ;;  %v8977_v61 = vpop.permute.xlu1 %3759  ;;  %v10239_v20 = vld [vmem:[#allocation67_spill] sm:$0xff] }
 0x133   : > { %10232 = vst [vmem:[#allocation93_spill] sm:$0xff] %v8954_v15  ;;  %v3046_v36 = vcombine.low %v10234_v45, %v3044_v50  ;;  %v6539_v62 = vcombine.high %v8763_v30, %v8784_v51  ;;  %v8969_v49 = vrot.slane %v3645_v60, %v6856_v5  ;;  %v8972_v19 = vrot.slane %v3691_v10, %v6856_v5  ;;  %v8987_v10 = vpop.permute.xlu0 %4142 }
 0x134   : > { %10233 = vst [vmem:[#allocation94_spill] sm:$0xff] %v8962_v31  ;;  %v8975_v32 = vrot.slane %v3692_v34, %v6856_v5  ;;  %10237 = vst [vmem:[#allocation96_spill] sm:$0xff] %v8977_v61  ;;  %v5499_v4 = vcombine.low %v8954_v15, %v8962_v31  ;;  %v5506_v55 = vrot.slane %v5498_v63, %v6856_v5  ;;  %v10097_v60 = vmov 0.0   ;;  %v10241_v31 = vld [vmem:[#allocation68_spill] sm:$0xff] }
 0x135   : > { %10235 = vst [vmem:[#allocation70_spill] sm:$0xff] %v8972_v19  ;;  %v3060_v50 = vrot.slane %v3046_v36, %v6856_v5  ;;  %v8984_v45 = vrot.slane %v6539_v62, %v6856_v5  ;;  %6590 = vmatprep.subr.bf16.mxu0 %v10097_v60  ;;  %10238 = vst [vmem:[#allocation97_spill] sm:$0xff] %v8987_v10  ;;  %v4055_v34 = vcombine.low %v8969_v49, %v8972_v19 }
 0x136   : > { %10236 = vst [vmem:[#allocation95_spill] sm:$0xff] %v8975_v32  ;;  %v2800_v61 = vcombine.low %v10240_v17, %v10239_v20  ;;  %v2801_v15 = vcombine.low %v10241_v31, %v8868_v26  ;;  %v3400_v63 = vcombine.low %v8599_v0, %v8701_v22  ;;  %6648 = vmatprep.subr.bf16.mxu1 %v10097_v60  ;;  %v6704_v17 = vld [vmem:[%s9996_s2 + $0x10] ss:$0 sps:$4 sm:$0x33]  }
 0x137   : > { %v5513_v36 = vrot.slane %v5499_v4, %v6856_v5  ;;  %v3061_v62 = vcombine.low %v3053_v46, %v3060_v50  ;;  %v5727_v10 = vcombine.low %v8975_v32, %v8984_v45  ;;  %v3446_v19 = vcombine.low %v8759_v44, %v8736_v25  ;;  %v9025_v32 = vpop.permute.xlu1 %4132 }
 0x138   : > { %v9007_v26 = vrot.slane %v4055_v34, %v6856_v5  ;;  %v2808_v22 = vrot.slane %v2800_v61, %v6856_v5  ;;  %v2815_v20 = vrot.slane %v2801_v15, %v6856_v5  ;;  %v9012_v31 = vrot.slane %v3400_v63, %v6856_v5  ;;  %v10243_v15 = vld [vmem:[#allocation13_spill] sm:$0xff]  ;;  %v10244_v61 = vld [vmem:[#allocation11_spill] sm:$0xff]  ;;  %10245 = vst [vmem:[#allocation66_spill] sm:$0xff] %v9025_v32  ;;  %v10248_v32 = vld [vmem:[#allocation14_spill] sm:$0xff] }
 0x139   : > { %v5514_v46 = vcombine.low %v5506_v55, %v5513_v36  ;;  %3146 = vrot.lane.b32.xlu1 %v3061_v62, %s6775_s6  ;;  %v5734_v4 = vrot.slane %v5727_v10, %v6856_v5  ;;  %v6533_v44 = vcombine.high %v8718_v56, %v8736_v25  ;;  %v3448_v50 = vcombine.low %v8724_v57, %v8749_v12 }
 0x13a   : > { %v2816_v34 = vcombine.low %v2808_v22, %v2815_v20  ;;  %v9021_v60 = vrot.slane %v3446_v19, %v6856_v5  ;;  %v1920_v63 = vcombine.low %v10244_v61, %v10243_v15  ;;  %v6105_v62 = vsel %vm6103_vm15, %v6704_v17, 0  ;;  %v9035_v22 = vpop.permute.xlu0 %4771 }
 0x13b   : > { %5630 = vrot.lane.b32.xlu0 %v5514_v46, %s6777_s8  ;;  %v5735_v55 = vcombine.low %v9007_v26, %v5734_v4  ;;  %v9030_v10 = vrot.slane %v6533_v44, %v6856_v5  ;;  %v9033_v36 = vrot.slane %v3448_v50, %v6856_v5  ;;  %6591 = vmatpush3.bf16.msra.mxu0 %v6105_v62  ;;  %v10249_v46 = vld [vmem:[#allocation12_spill] sm:$0xff]  ;;  %v10250_v4 = vld [vmem:[#allocation7_spill] sm:$0xff] }
 0x13c   : > { %10242 = vst [vmem:[#allocation67_spill] sm:$0xff] %v9021_v60  ;;  %v5674_v19 = vcombine.low %v9012_v31, %v9021_v60  ;;  %v6520_v20 = vcombine.high %v10244_v61, %v10243_v15  ;;  %v1922_v2 = vcombine.low %v10249_v46, %v10248_v32  ;;  %v1923_v44 = vcombine.low %v10251_v52, %v10250_v4  ;;  %v6705_v50 = vld [vmem:[%s9996_s2 + $0x8] sm:$0xff]  }
 0x13d   : > { %10246 = vst [vmem:[#allocation68_spill] sm:$0xff] %v9030_v10  ;;  %10247 = vst [vmem:[#allocation13_spill] sm:$0xff] %v9033_v36  ;;  %3136 = vrot.lane.b32.xlu1 %v2816_v34, %s6775_s6  ;;  %v3923_v17 = vcombine.low %v9030_v10, %v9033_v36  ;;  %v1930_v60 = vrot.slane %v1920_v63, %v6856_v5  ;;  %v10252_v15 = vmov 0.0   ;;  %6651 = vmatpush3.bf16.msra.mxu1 %v6105_v62  ;;  %v9072_v62 = vpop.permute.xlu1 %4761 }
 0x13e   : > { %6592 = vmatprep.subr.bf16.mxu0 %v10252_v15  ;;  %v5681_v32 = vrot.slane %v5674_v19, %v6856_v5  ;;  %v1937_v61 = vrot.slane %v6520_v20, %v6856_v5  ;;  %v1944_v52 = vrot.slane %v1922_v2, %v6856_v5  ;;  %v1951_v46 = vrot.slane %v1923_v44, %v6856_v5  ;;  %v10253_v19 = vld [vmem:[#allocation71_spill] sm:$0xff] }
 0x13f   : > { %5819 = vrot.lane.b32.xlu0 %v5735_v55, %s6774_s5  ;;  %v9059_v34 = vrot.slane %v3923_v17, %v6856_v5  ;;  %v3429_v63 = vcombine.low %v8562_v7, %v8566_v13  ;;  %v3430_v4 = vcombine.low %v8572_v54, %v9012_v31  ;;  %v3674_v36 = vcombine.low %v10253_v19, %v8531_v18  ;;  %v6706_v55 = vld [vmem:[%s9996_s2] sm:$0xff]  }
 0x140   : > { %v1952_v20 = vcombine.low %v1930_v60, %v1937_v61  ;;  %v1953_v10 = vcombine.low %v1944_v52, %v1951_v46  ;;  %v3675_v2 = vcombine.low %v8534_v42, %v8969_v49  ;;  %6593 = vmatpush3.bf16.msra.mxu0 %v6705_v50  ;;  %6649 = vmatprep.subr.bf16.mxu1 %v10252_v15  ;;  %v9080_v42 = vpop.permute.xlu0 %5056  ;;  %v10255_v52 = vld [vmem:[#allocation16_spill] sm:$0xff] }
 0x141   : > { %v5682_v7 = vcombine.low %v5681_v32, %v9059_v34  ;;  %v3437_v13 = vrot.slane %v3429_v63, %v6856_v5  ;;  %v3444_v18 = vrot.slane %v3430_v4, %v6856_v5  ;;  %v3682_v54 = vrot.slane %v3674_v36, %v6856_v5  ;;  %6594 = vmatprep.subr.bf16.mxu0 %v10252_v15 }
 0x142   : > { %v1960_v49 = vrot.slane %v1952_v20, %v6856_v5  ;;  %v1967_v60 = vrot.slane %v1953_v10, %v6856_v5  ;;  %v3689_v44 = vrot.slane %v3675_v2, %v6856_v5  ;;  %6652 = vmatpush3.bf16.msra.mxu1 %v6705_v50  ;;  %v3914_v61 = vcombine.low %v8718_v56, %v8736_v25  ;;  %v10254_v50 = vld [vmem:[#allocation9_spill] sm:$0xff] }
 0x143   : > { %5809 = vrot.lane.b32.xlu0 %v5682_v7, %s6774_s5  ;;  %v3445_v17 = vcombine.low %v3437_v13, %v3444_v18  ;;  %6650 = vmatprep.subr.bf16.mxu1 %v10252_v15  ;;  %v4047_v10 = vcombine.low %v8763_v30, %v8784_v51  ;;  %v2002_v46 = vcombine.low %v10255_v52, %v10254_v50  ;;  %v1348_v4 = vshrl.u32 %v8749_v12, 16  ;;  %v9107_v51 = vpop.permute.xlu1 %5046 }
 0x144   : > { %v1968_v36 = vcombine.low %v1960_v49, %v1967_v60  ;;  %v3690_v32 = vcombine.low %v3682_v54, %v3689_v44  ;;  %6595 = vmatpush3.bf16.msra.mxu0 %v6706_v55  ;;  %v9096_v63 = vcombine.high %v8724_v57, %v8724_v57  ;;  %v3921_v56 = vrot.slane %v3914_v61, %v6856_v5  ;;  %v9116_v13 = vpop.permute.xlu0 %5333 }
 0x145   : > { %3765 = vrot.lane.b32.xlu1 %v3445_v17, %s6773_s4  ;;  %v4054_v25 = vrot.slane %v4047_v10, %v6856_v5  ;;  %6596 = vmatprep.mubr.msk.bf16.mxu0 %vm6779_vm7, %v10252_v15  ;;  %v4399_v30 = vcombine.low %v8811_v43, %v8820_v11  ;;  %v4400_v7 = vcombine.low %v8828_v59, %v8836_v14  ;;  %v10256_v59 = vld [vmem:[#allocation17_spill] sm:$0xff]  ;;  %v1674_v50 = vshrl.u32 %v8863_v35, 16 }
 0x146   : > { %v5830_v19 = vsel %vm5827_vm0, %v1968_v36, %v8685_v39  ;;  %v2016_v39 = vrot.slane %v2002_v46, %v6856_v5  ;;  %v1353_v2 = vshll.u32 %v9096_v63, 16  ;;  %6653 = vmatpush3.bf16.msra.mxu1 %v6706_v55  ;;  %v3922_v11 = vcombine.low %v9012_v31, %v3921_v56  ;;  %6624 = vmatprep.mubr.msk.bf16.mxu1 %vm6779_vm7, %v10252_v15 }
 0x147   : > { %v5869_v20 = vsel %vm5867_vm1, %v5830_v19, %v8555_v47  ;;  %3775 = vrot.lane.b32.xlu0 %v3690_v32, %s6773_s4  ;;  %v4056_v18 = vcombine.low %v4054_v25, %v8984_v45  ;;  %v4401_v47 = vcombine.low %v8841_v40, %v8848_v6  ;;  %v4416_v44 = vrot.slane %v4400_v7, %v6856_v5  ;;  %v9152_v61 = vpop.permute.xlu1 %5323  ;;  %v10259_v25 = vld [vmem:[#allocation19_spill] sm:$0xff]  ;;  %v10261_v7 = vld [vmem:[#allocation20_spill] sm:$0xff] }
 0x148   : > { %v5896_v43 = vsel %vm5894_vm2, %v5869_v20, %v8545_v8  ;;  %v2017_v14 = vcombine.low %v10256_v59, %v2016_v39  ;;  %v9131_v55 = vsel %vm7184_vm14, %v1348_v4, %v1353_v2  ;;  %v4409_v8 = vrot.slane %v4399_v30, %v6856_v5  ;;  %v9158_v52 = vpop.permute.xlu0 %5626  ;;  %v10260_v2 = vld [vmem:[#allocation23_spill] sm:$0xff] }
 0x149   : > { %v5923_v54 = vsel %vm5921_vm3, %v5896_v43, %v8772_v38  ;;  %v3930_v49 = vrot.slane %v3922_v11, %v6856_v5  ;;  %v4070_v6 = vrot.slane %v4056_v18, %v6856_v5  ;;  %v4402_v40 = vcombine.low %v8857_v24, %v9131_v55  ;;  %v10262_v11 = vld [vmem:[#allocation22_spill] sm:$0xff]  ;;  %v10263_v18 = vld [vmem:[#allocation24_spill] sm:$0xff] }
 0x14a   : > { %v5950_v31 = vsel %vm5948_vm4, %v5923_v54, %v8601_v9  ;;  %v5833_v60 = vsel %vm5827_vm0, %v2017_v14, %v8781_v3  ;;  %v4423_v17 = vrot.slane %v4401_v47, %v6856_v5  ;;  %v4431_v10 = vcombine.low %v4409_v8, %v4416_v44  ;;  %v10264_v8 = vld [vmem:[#allocation83_spill] sm:$0xff] }
 0x14b   : > { %v5977_v38 = vsel %vm5975_vm5, %v5950_v31, %v8589_v28  ;;  %v3938_v36 = vcombine.low %v3930_v49, %v9059_v34  ;;  %v4071_v32 = vcombine.low %v9007_v26, %v4070_v6  ;;  %v5871_v24 = vsel %vm5867_vm1, %v5833_v60, %v8632_v41  ;;  %v9191_v54 = vpop.permute.xlu1 %5616 }
 0x14c   : > { %v6004_v9 = vsel %vm6002_vm6, %v5977_v38, %v8720_v58  ;;  %v5898_v28 = vsel %vm5894_vm2, %v5871_v24, %v8638_v23  ;;  %v4430_v3 = vrot.slane %v4402_v40, %v6856_v5  ;;  %v1679_v58 = vshll.u32 %v8767_v1, 16  ;;  %v9199_v49 = vpop.permute.xlu0 %5815 }
 0x14d   : > { %4138 = vrot.lane.b32.xlu1 %v3938_v36, %s6771_s29  ;;  %4148 = vrot.lane.b32.xlu0 %v4071_v32, %s6771_s29  ;;  %v4644_v41 = vcombine.low %v8895_v48, %v8904_v27  ;;  %v4645_v26 = vcombine.low %v8909_v53, %v8913_v29  ;;  %v4646_v23 = vcombine.low %v8925_v37, %v8937_v33  ;;  %v10257_v53 = vld [vmem:[#allocation58_spill] sm:$0xff]  ;;  %v10258_v37 = vld [vmem:[#allocation21_spill] sm:$0xff]  ;;  %v10267_v32 = vld [vmem:[#allocation52_spill] sm:$0xff] }
 0x14e   : > { %v4432_v34 = vcombine.low %v4423_v17, %v4430_v3  ;;  %v4439_v46 = vrot.slane %v4431_v10, %v6856_v5  ;;  %v9172_v4 = vsel %vm7184_vm14, %v1674_v50, %v1679_v58  ;;  %v6031_v29 = vsel %vm6029_vm8, %v6004_v9, %v10257_v53  ;;  %v10266_v17 = vld [vmem:[#allocation69_spill] sm:$0xff]  ;;  %v10268_v10 = vld [vmem:[#allocation74_spill] sm:$0xff] }
 0x14f   : > { %v4654_v19 = vrot.slane %v4644_v41, %v6856_v5  ;;  %v4661_v56 = vrot.slane %v4645_v26, %v6856_v5  ;;  %v4668_v48 = vrot.slane %v4646_v23, %v6856_v5  ;;  %v4647_v33 = vcombine.low %v8941_v21, %v9172_v4  ;;  %6597 = vmatmul.mubr.msk.bf16.vlgmr.msra.gmra.mxu0 %vm6076_vm9, %v6031_v29  ;;  %v10269_v26 = vld [vmem:[#allocation84_spill] sm:$0xff] }
 0x150   : > { %v4446_v27 = vrot.slane %v4432_v34, %v6856_v5  ;;  %v2263_v30 = vcombine.low %v10259_v25, %v10258_v37  ;;  %v6524_v39 = vcombine.high %v10259_v25, %v10258_v37  ;;  %v2265_v43 = vcombine.low %v10261_v7, %v10260_v2  ;;  %6600 = vmatprep.mubr.msk.bf16.mxu0 %vm6779_vm7, %v10252_v15  ;;  %v10273_v29 = vld [vmem:[#allocation80_spill] sm:$0xff] }
 0x151   : > { %v4676_v20 = vcombine.low %v4654_v19, %v4661_v56  ;;  %v2266_v47 = vcombine.low %v10263_v18, %v10262_v11  ;;  %v4675_v59 = vrot.slane %v4647_v33, %v6856_v5  ;;  %v5925_v31 = vsel %vm5921_vm3, %v5898_v28, %v10264_v8  ;;  %v10276_v11 = vld [vmem:[#allocation8_spill] sm:$0xff]  ;;  %v10277_v18 = vld [vmem:[#allocation10_spill] sm:$0xff] }
 0x152   : > { %v4447_v21 = vcombine.low %v4439_v46, %v4446_v27  ;;  %v2273_v14 = vrot.slane %v2263_v30, %v6856_v5  ;;  %v9203_v40 = vrot.slane %v6524_v39, %v6856_v5  ;;  %v9206_v38 = vrot.slane %v2265_v43, %v6856_v5  ;;  %v10271_v27 = vld [vmem:[#allocation73_spill] sm:$0xff]  ;;  %v10275_v43 = vld [vmem:[#allocation90_spill] sm:$0xff]  ;;  %v174_v8 = vld [vmem:[%s6854_s27 + $0xe8] sm:$0xff] }
 0x153   : > { %v4684_v6 = vrot.slane %v4676_v20, %v6856_v5  ;;  %v9209_v60 = vrot.slane %v2266_v47, %v6856_v5  ;;  %v4677_v44 = vcombine.low %v4668_v48, %v4675_v59  ;;  %v5952_v9 = vsel %vm5948_vm4, %v5925_v31, %v10266_v17  ;;  %v10270_v48 = vld [vmem:[#allocation75_spill] sm:$0xff]  ;;  %v9248_v31 = vpop.permute.xlu0 %5805  ;;  %v10279_v17 = vld [vmem:[#allocation82_spill] sm:$0xff] }
 0x154   : > { %4767 = vrot.lane.b32.xlu1 %v4447_v21, %s6776_s7  ;;  %v2217_v36 = vcombine.low %v8749_v12, %v9096_v63  ;;  %v6543_v24 = vcombine.high %v10267_v32, %v8599_v0  ;;  %v2295_v28 = vcombine.low %v2273_v14, %v9203_v40  ;;  %v5979_v50 = vsel %vm5975_vm5, %v5952_v9, %v10268_v10  ;;  %v10274_v20 = vld [vmem:[#allocation79_spill] sm:$0xff] }
 0x155   : > { %10265 = vst [vmem:[#allocation11_spill] sm:$0xff] %v9209_v60  ;;  %v2296_v3 = vcombine.low %v9206_v38, %v9209_v60  ;;  %v2462_v58 = vcombine.low %v8863_v35, %v8767_v1  ;;  %v4691_v41 = vrot.slane %v4677_v44, %v6856_v5  ;;  %v6006_v23 = vsel %vm6002_vm6, %v5979_v50, %v10269_v26  ;;  %v9237_v35 = vpop.permute.xlu1 %3142  ;;  %v173_v59 = vld [vmem:[%s6854_s27 + $0xe0] sm:$0xff]  ;;  %v10282_v50 = vld [vmem:[#allocation86_spill] sm:$0xff]  ;;  %v10301_v60 = vld [vmem:[#allocation92_spill] sm:$0xff] }
 0x156   : > { %v2245_v0 = vrot.slane %v2217_v36, %v6856_v5  ;;  %v4875_v34 = vrot.slane %v6543_v24, %v6856_v5  ;;  %v2303_v46 = vrot.slane %v2295_v28, %v6856_v5  ;;  %v6546_v33 = vcombine.high %v10271_v27, %v10270_v48  ;;  %10272 = vst [vmem:[#allocation14_spill] sm:$0xff] %v9237_v35  ;;  %v10280_v36 = vld [vmem:[#allocation88_spill] sm:$0xff]  ;;  %v10284_v26 = vld [vmem:[#allocation78_spill] sm:$0xff] }
 0x157   : > { %v2310_v19 = vrot.slane %v2296_v3, %v6856_v5  ;;  %v9233_v56 = vrot.slane %v2462_v58, %v6856_v5  ;;  %v4692_v53 = vcombine.low %v4684_v6, %v4691_v41  ;;  %v10278_v47 = vcombine.low %v10276_v11, %v10277_v18  ;;  %v10287_v11 = vld [vmem:[#allocation96_spill] sm:$0xff] }
 0x158   : > { %v2247_v30 = vcombine.low %v10273_v29, %v2245_v0  ;;  %v4876_v39 = vcombine.low %v4875_v34, %v10274_v20  ;;  %v4976_v6 = vrot.slane %v6546_v33, %v6856_v5  ;;  %v6033_v32 = vsel %vm6029_vm8, %v6006_v23, %v10280_v36 }
 0x159   : > { %v5836_v21 = vsel %vm5827_vm0, %v10278_v47, %v10275_v43  ;;  %v2311_v44 = vcombine.low %v2303_v46, %v2310_v19  ;;  %v2492_v9 = vcombine.low %v10279_v17, %v9233_v56  ;;  %4777 = vrot.lane.b32.xlu0 %v4692_v53, %s6776_s7  ;;  %v5153_v3 = vcombine.low %v2245_v0, %v2273_v14  ;;  %v10285_v0 = vld [vmem:[#allocation76_spill] sm:$0xff]  ;;  %v10288_v47 = vld [vmem:[#allocation91_spill] sm:$0xff] }
 0x15a   : > { %v9257_v24 = vrot.slane %v2247_v30, %v6856_v5  ;;  %v4883_v28 = vrot.slane %v4876_v39, %v6856_v5  ;;  %v5154_v10 = vcombine.low %v9203_v40, %v9206_v38  ;;  %v4977_v34 = vcombine.low %v10284_v26, %v4976_v6  ;;  %6601 = vmatmul.mubr.msk.bf16.gmra.mxu0 %vm6076_vm9, %v6033_v32  ;;  %v9282_v30 = vpop.permute.xlu1 %3132 }
 0x15b   : > { %v5851_v58 = vsel %vm5827_vm0, %v2311_v44, %v10282_v50  ;;  %v9265_v41 = vrot.slane %v2492_v9, %v6856_v5  ;;  %v191_v23 = vpack.c.bf16 %v174_v8, %v173_v59  ;;  %v5161_v19 = vrot.slane %v5153_v3, %v6856_v5  ;;  %6604 = vmatprep.mubr.msk.bf16.mxu0 %vm6779_vm7, %v10252_v15  ;;  %v9296_v44 = vpop.permute.xlu0 %3771  ;;  %v10291_v3 = vld [vmem:[#allocation33_spill] sm:$0xff] }
 0x15c   : > { %10281 = vst [vmem:[#allocation12_spill] sm:$0xff] %v9257_v24  ;;  %v4884_v46 = vcombine.low %v4883_v28, %v9257_v24  ;;  %v5168_v14 = vrot.slane %v5154_v10, %v6856_v5  ;;  %v847_v48 = vcombine.high %v10285_v0, %v10285_v0  ;;  %v4984_v27 = vrot.slane %v4977_v34, %v6856_v5  ;;  %v10290_v28 = vld [vmem:[#allocation34_spill] sm:$0xff] }
 0x15d   : > { %10283 = vst [vmem:[#allocation7_spill] sm:$0xff] %v9265_v41  ;;  %v9279_v33 = vcombine.high %v8767_v1, %v8767_v1  ;;  %v6504_v53 = vpack.c.bf16 %v174_v8, %v174_v8  ;;  %v1714_v29 = vrot.slane %v191_v23, %v6856_v5  ;;  %10286 = vst [vmem:[#allocation15_spill] sm:$0xff] %v9282_v30  ;;  %v1356_v32 = vshrl.u32 %v9096_v63, 16 }
 0x15e   : > { %5052 = vrot.lane.b32.xlu1 %v4884_v46, %s6770_s28  ;;  %v5169_v39 = vcombine.low %v5161_v19, %v5168_v14  ;;  %v9286_v43 = vrot.slane %v847_v48, %v6856_v5  ;;  %v9290_v18 = vsel %vm5867_vm1, %v5836_v21, %v10287_v11  ;;  %v9294_v59 = vsel %vm5867_vm1, %v5851_v58, %v10288_v47 }
 0x15f   : > { %10289 = vst [vmem:[#allocation71_spill] sm:$0xff] %v9296_v44  ;;  %v4985_v8 = vcombine.low %v4984_v27, %v9265_v41  ;;  %v9300_v17 = vrot.slane %v6504_v53, %v6856_v5  ;;  %v1722_v9 = vcombine.high %v1714_v29, %v1714_v29  ;;  %v9303_v6 = vrot.slane %v1714_v29, %v6856_v5 }
 0x160   : > { %v2508_v36 = vcombine.low %v9286_v43, %v9279_v33  ;;  %v9309_v21 = vcombine.high %v8749_v12, %v8749_v12  ;;  %v5431_v10 = vcombine.low %v10291_v3, %v10290_v28  ;;  %v9326_v23 = vcombine.high %v9286_v43, %v9286_v43 }
 0x161   : > { %5062 = vrot.lane.b32.xlu0 %v4985_v8, %s6770_s28  ;;  %v9319_v58 = vrot.slane %v9300_v17, %v6856_v5  ;;  %v9322_v34 = vrot.slane %v1722_v9, %v6856_v5  ;;  %v1682_v0 = vshrl.u32 %v8767_v1, 16  ;;  %v1687_v53 = vshll.u32 %v9286_v43, 16 }
 0x162   : > { %5329 = vrot.lane.b32.xlu1 %v5169_v39, %s6772_s30  ;;  %v9330_v46 = vrot.slane %v2508_v36, %v6856_v5  ;;  %v1361_v19 = vshll.u32 %v9309_v21, 16  ;;  %v5445_v14 = vrot.slane %v5431_v10, %v6856_v5  ;;  %v1690_v29 = vshrl.u32 %v9286_v43, 16  ;;  %v9341_v39 = vpop.permute.xlu1 %3761  ;;  %v9351_v36 = vpop.permute.xlu0 %4144 }
 0x163   : > { %v6547_v48 = vcombine.high %v9303_v6, %v9322_v34  ;;  %v5238_v27 = vcombine.low %v9303_v6, %v9322_v34  ;;  %10292 = vst [vmem:[#allocation9_spill] sm:$0xff] %v9341_v39  ;;  %v1695_v8 = vshll.u32 %v9279_v33, 16  ;;  %v1698_v9 = vshrl.u32 %v9279_v33, 16  ;;  %10293 = vst [vmem:[#allocation16_spill] sm:$0xff] %v9351_v36 }
 0x164   : > { %v5246_v11 = vcombine.low %v9233_v56, %v9330_v46  ;;  %v9347_v47 = vsel %vm7184_vm14, %v1356_v32, %v1361_v19  ;;  %v9361_v56 = vsel %vm7184_vm14, %v1682_v0, %v1687_v53  ;;  %v1703_v50 = vshll.u32 %v9326_v23, 16 }
 0x165   : > { %v9354_v28 = vrot.slane %v6547_v48, %v6856_v5  ;;  %v5245_v3 = vrot.slane %v5238_v27, %v6856_v5  ;;  %v2820_v10 = vcombine.low %v9131_v55, %v9347_v47  ;;  %v9366_v19 = vsel %vm7184_vm14, %v1690_v29, %v1695_v8 }
 0x166   : > { %v5254_v32 = vrot.slane %v5246_v11, %v6856_v5  ;;  %v1752_v48 = vcombine.high %v9303_v6, %v9303_v6  ;;  %v1754_v55 = vcombine.high %v9322_v34, %v9322_v34  ;;  %v1757_v0 = vshrl.u32 %v9303_v6, 16  ;;  %v9387_v36 = vpop.permute.xlu1 %4134  ;;  %v9398_v30 = vpop.permute.xlu0 %4773 }
 0x167   : > { %v5247_v27 = vcombine.low %v5245_v3, %v9354_v28  ;;  %v9373_v24 = vrot.slane %v2820_v10, %v6856_v5  ;;  %v9380_v53 = vsel %vm7184_vm14, %v1698_v9, %v1703_v50  ;;  %v1762_v29 = vshll.u32 %v9322_v34, 16  ;;  %v10294_v3 = vld [vmem:[#allocation32_spill] sm:$0xff]  ;;  %10295 = vst [vmem:[#allocation17_spill] sm:$0xff] %v9387_v36  ;;  %10296 = vst [vmem:[#allocation58_spill] sm:$0xff] %v9398_v30  ;;  %v10300_v36 = vld [vmem:[#allocation93_spill] sm:$0xff] }
 0x168   : > { %v1765_v11 = vshrl.u32 %v9322_v34, 16  ;;  %v1770_v8 = vshll.u32 %v1752_v48, 16  ;;  %v1773_v20 = vshrl.u32 %v1752_v48, 16  ;;  %v1778_v26 = vshll.u32 %v1754_v55, 16 }
 0x169   : > { %v5261_v41 = vrot.slane %v5247_v27, %v6856_v5  ;;  %v5430_v10 = vcombine.low %v9373_v24, %v10294_v3  ;;  %v9391_v44 = vsel %vm7184_vm14, %v1757_v0, %v1762_v29  ;;  %v1781_v9 = vshrl.u32 %v1754_v55, 16 }
 0x16a   : > { %v9395_v50 = vsel %vm7184_vm14, %v1765_v11, %v1770_v8  ;;  %v1786_v39 = vshll.u32 %v9319_v58, 16  ;;  %v9403_v35 = vsel %vm7184_vm14, %v1773_v20, %v1778_v26  ;;  %v3065_v0 = vcombine.low %v9172_v4, %v9361_v56 }
 0x16b   : > { %v5262_v27 = vcombine.low %v5254_v32, %v5261_v41  ;;  %v5438_v3 = vrot.slane %v5430_v10, %v6856_v5  ;;  %v3111_v11 = vcombine.low %v9366_v19, %v9380_v53  ;;  %v5515_v8 = vcombine.low %v9391_v44, %v9395_v50  ;;  %v10297_v41 = vld [vmem:[#allocation66_spill] sm:$0xff] }
 0x16c   : > { %v9409_v29 = vsel %vm7184_vm14, %v1781_v9, %v1786_v39  ;;  %v5900_v32 = vsel %vm5894_vm2, %v9290_v18, %v10297_v41  ;;  %v3093_v26 = vrot.slane %v3065_v0, %v6856_v5  ;;  %v10298_v39 = vld [vmem:[#allocation97_spill] sm:$0xff]  ;;  %v3094_v18 = vcombine.low %v10301_v60, %v10300_v36  ;;  %v9439_v41 = vpop.permute.xlu1 %4763 }
 0x16d   : > { %5339 = vrot.lane.b32.xlu0 %v5262_v27, %s6772_s30  ;;  %v5446_v20 = vcombine.low %v5438_v3, %v5445_v14  ;;  %v5516_v4 = vcombine.low %v9403_v35, %v9409_v29  ;;  %v5910_v10 = vsel %vm5894_vm2, %v9294_v59, %v10298_v39  ;;  %v9426_v9 = vrot.slane %v3111_v11, %v6856_v5  ;;  %v10302_v3 = vld [vmem:[#allocation94_spill] sm:$0xff]  ;;  %v9447_v39 = vpop.permute.xlu0 %5058 }
 0x16e   : > { %v5523_v30 = vrot.slane %v5515_v8, %v6856_v5  ;;  %v3694_v14 = vcombine.low %v8767_v1, %v9286_v43  ;;  %v3095_v0 = vcombine.low %v10302_v3, %v3093_v26  ;;  %v6540_v59 = vcombine.high %v8767_v1, %v9286_v43  ;;  %10303 = vst [vmem:[#allocation19_spill] sm:$0xff] %v9439_v41 }
 0x16f   : > { %10299 = vst [vmem:[#allocation21_spill] sm:$0xff] %v9426_v9  ;;  %5622 = vrot.lane.b32.xlu1 %v5446_v20, %s6777_s8  ;;  %v5530_v27 = vrot.slane %v5516_v4, %v6856_v5  ;;  %v4073_v11 = vcombine.low %v9322_v34, %v1752_v48  ;;  %v5531_v8 = vcombine.low %v3093_v26, %v9426_v9  ;;  %10304 = vst [vmem:[#allocation23_spill] sm:$0xff] %v9447_v39 }
 0x170   : > { %v3102_v60 = vrot.slane %v3094_v18, %v6856_v5  ;;  %v9444_v36 = vrot.slane %v3694_v14, %v6856_v5  ;;  %v4074_v20 = vcombine.low %v1754_v55, %v9319_v58  ;;  %v3109_v3 = vrot.slane %v3095_v0, %v6856_v5  ;;  %v10305_v0 = vld [vmem:[#allocation87_spill] sm:$0xff] }
 0x171   : > { %v5532_v4 = vcombine.low %v5523_v30, %v5530_v27  ;;  %v9451_v1 = vrot.slane %v6540_v59, %v6856_v5  ;;  %v4088_v43 = vrot.slane %v4073_v11, %v6856_v5  ;;  %v5539_v48 = vrot.slane %v5531_v8, %v6856_v5  ;;  %v10306_v59 = vld [vmem:[#allocation85_spill] sm:$0xff] }
 0x172   : > { %v4095_v26 = vrot.slane %v4074_v20, %v6856_v5  ;;  %v5927_v18 = vsel %vm5921_vm3, %v5900_v32, %v9072_v62  ;;  %v5937_v55 = vsel %vm5921_vm3, %v5910_v10, %v9035_v22  ;;  %v3110_v30 = vcombine.low %v3102_v60, %v3109_v3  ;;  %v10307_v8 = vld [vmem:[#allocation89_spill] sm:$0xff]  ;;  %v10308_v62 = vld [vmem:[#allocation38_spill] sm:$0xff]  ;;  %v9476_v3 = vpop.permute.xlu1 %5048 }
 0x173   : > { %v5546_v14 = vrot.slane %v5532_v4, %v6856_v5  ;;  %v5736_v27 = vcombine.low %v9444_v36, %v9451_v1  ;;  %v2849_v39 = vcombine.low %v10306_v59, %v10305_v0  ;;  %v2850_v41 = vcombine.low %v10307_v8, %v9373_v24  ;;  %v10309_v32 = vld [vmem:[#allocation37_spill] sm:$0xff]  ;;  %v10314_v59 = vld [vmem:[#allocation36_spill] sm:$0xff] }
 0x174   : > { %v4097_v11 = vcombine.low %v4088_v43, %v4095_v26  ;;  %v6534_v20 = vcombine.high %v8724_v57, %v8749_v12  ;;  %v3948_v9 = vcombine.low %v10309_v32, %v10308_v62  ;;  %3148 = vrot.lane.b32.xlu1 %v3110_v30, %s6775_s6  ;;  %v5954_v4 = vsel %vm5948_vm4, %v5927_v18, %v9107_v51  ;;  %v10310_v51 = vld [vmem:[#allocation68_spill] sm:$0xff]  ;;  %v10311_v26 = vld [vmem:[#allocation67_spill] sm:$0xff]  ;;  %v10313_v30 = vld [vmem:[#allocation70_spill] sm:$0xff] }
 0x175   : > { %v5547_v22 = vcombine.low %v5539_v48, %v5546_v14  ;;  %v5743_v10 = vrot.slane %v5736_v27, %v6856_v5  ;;  %v2857_v60 = vrot.slane %v2849_v39, %v6856_v5  ;;  %v2864_v57 = vrot.slane %v2850_v41, %v6856_v5  ;;  %v9486_v48 = vpop.permute.xlu0 %5335  ;;  %v10312_v14 = vld [vmem:[#allocation95_spill] sm:$0xff]  ;;  %v10315_v8 = vld [vmem:[#allocation13_spill] sm:$0xff] }
 0x176   : > { %v9479_v24 = vrot.slane %v4097_v11, %v6856_v5  ;;  %v3477_v12 = vrot.slane %v6534_v20, %v6856_v5  ;;  %v9484_v43 = vrot.slane %v3948_v9, %v6856_v5  ;;  %v5964_v39 = vsel %vm5948_vm4, %v5937_v55, %v9080_v42 }
 0x177   : > { %5632 = vrot.lane.b32.xlu0 %v5547_v22, %s6777_s8  ;;  %v3478_v18 = vcombine.low %v10311_v26, %v10310_v51  ;;  %v3723_v27 = vcombine.low %v10313_v30, %v10312_v14  ;;  %v3724_v41 = vcombine.low %v8984_v45, %v9444_v36  ;;  %v2865_v9 = vcombine.low %v2857_v60, %v2864_v57  ;;  %v9521_v51 = vpop.permute.xlu1 %5325  ;;  %v10319_v30 = vld [vmem:[#allocation29_spill] sm:$0xff] }
 0x178   : > { %v5744_v0 = vcombine.low %v5743_v10, %v9479_v24  ;;  %v5683_v11 = vcombine.low %v3477_v12, %v10314_v59  ;;  %v3479_v20 = vcombine.low %v10315_v8, %v3477_v12  ;;  %v5981_v32 = vsel %vm5975_vm5, %v5954_v4, %v9152_v61 }
 0x179   : > { %v3486_v62 = vrot.slane %v3478_v18, %v6856_v5  ;;  %v3731_v42 = vrot.slane %v3723_v27, %v6856_v5  ;;  %v3738_v55 = vrot.slane %v3724_v41, %v6856_v5  ;;  %3138 = vrot.lane.b32.xlu1 %v2865_v9, %s6775_s6  ;;  %v5991_v10 = vsel %vm5975_vm5, %v5964_v39, %v9116_v13  ;;  %v9527_v18 = vpop.permute.xlu0 %5628  ;;  %v10320_v27 = vld [vmem:[#allocation28_spill] sm:$0xff]  ;;  %v10321_v41 = vld [vmem:[#allocation31_spill] sm:$0xff] }
 0x17a   : > { %v5690_v45 = vrot.slane %v5683_v11, %v6856_v5  ;;  %v3493_v22 = vrot.slane %v3479_v20, %v6856_v5  ;;  %v3939_v60 = vcombine.low %v9096_v63, %v10259_v25  ;;  %v4072_v12 = vcombine.low %v9279_v33, %v9303_v6  ;;  %v10316_v25 = vld [vmem:[#allocation25_spill] sm:$0xff]  ;;  %v10317_v6 = vld [vmem:[#allocation27_spill] sm:$0xff] }
 0x17b   : > { %5821 = vrot.lane.b32.xlu0 %v5744_v0, %s6774_s5  ;;  %v3739_v57 = vcombine.low %v3731_v42, %v3738_v55  ;;  %v9517_v61 = vsel %vm6002_vm6, %v5981_v32, %v9191_v54  ;;  %v6018_v4 = vsel %vm6002_vm6, %v5991_v10, %v9158_v52  ;;  %v4448_v26 = vcombine.low %v9347_v47, %v10316_v25  ;;  %v10318_v54 = vld [vmem:[#allocation26_spill] sm:$0xff] }
 0x17c   : > { %v5691_v13 = vcombine.low %v5690_v45, %v9484_v43  ;;  %v3494_v39 = vcombine.low %v3486_v62, %v3493_v22  ;;  %v3946_v63 = vrot.slane %v3939_v60, %v6856_v5  ;;  %v4081_v33 = vrot.slane %v4072_v12, %v6856_v5  ;;  %v10322_v0 = vld [vmem:[#allocation30_spill] sm:$0xff] }
 0x17d   : > { %v4449_v14 = vcombine.low %v10318_v54, %v10317_v6  ;;  %v4450_v52 = vcombine.low %v10320_v27, %v10319_v30  ;;  %v4451_v9 = vcombine.low %v10322_v0, %v10321_v41  ;;  %v4458_v8 = vrot.slane %v4448_v26, %v6856_v5  ;;  %v10324_v6 = vld [vmem:[#allocation53_spill] sm:$0xff]  ;;  %v10325_v54 = vld [vmem:[#allocation46_spill] sm:$0xff] }
 0x17e   : > { %3767 = vrot.lane.b32.xlu1 %v3494_v39, %s6773_s4  ;;  %v3947_v11 = vcombine.low %v3946_v63, %v10314_v59  ;;  %v10323_v47 = vcombine.high %v9300_v17, %v9300_v17  ;;  %v1789_v62 = vshrl.u32 %v9319_v58, 16  ;;  %v4096_v42 = vcombine.low %v9444_v36, %v4081_v33  ;;  %v9560_v39 = vpop.permute.xlu1 %5618 }
 0x17f   : > { %5811 = vrot.lane.b32.xlu0 %v5691_v13, %s6774_s5  ;;  %v4465_v55 = vrot.slane %v4449_v14, %v6856_v5  ;;  %v4472_v32 = vrot.slane %v4450_v52, %v6856_v5  ;;  %v4479_v59 = vrot.slane %v4451_v9, %v6856_v5  ;;  %v4693_v17 = vcombine.low %v9361_v56, %v9366_v19 }
 0x180   : > { %v9543_v20 = vrot.slane %v10323_v47, %v6856_v5  ;;  %v3955_v45 = vrot.slane %v3947_v11, %v6856_v5  ;;  %v4694_v10 = vcombine.low %v9380_v53, %v9391_v44  ;;  %v4104_v60 = vrot.slane %v4096_v42, %v6856_v5  ;;  %v9569_v44 = vpop.permute.xlu0 %5817 }
 0x181   : > { %v4480_v12 = vcombine.low %v4458_v8, %v4465_v55  ;;  %v4481_v36 = vcombine.low %v4472_v32, %v4479_v59  ;;  %v4695_v13 = vcombine.low %v9395_v50, %v9403_v35  ;;  %v4703_v56 = vrot.slane %v4693_v17, %v6856_v5 }
 0x182   : > { %v1794_v22 = vshll.u32 %v9543_v20, 16  ;;  %v3963_v63 = vcombine.low %v3955_v45, %v9484_v43  ;;  %v4710_v19 = vrot.slane %v4694_v10, %v6856_v5  ;;  %v4112_v53 = vcombine.low %v4104_v60, %v9479_v24  ;;  %v9602_v11 = vpop.permute.xlu1 %3144  ;;  %v10329_v10 = vld [vmem:[#allocation44_spill] sm:$0xff]  ;;  %v10330_v60 = vld [vmem:[#allocation11_spill] sm:$0xff] }
 0x183   : > { %3777 = vrot.lane.b32.xlu0 %v3739_v57, %s6773_s4  ;;  %v4488_v35 = vrot.slane %v4480_v12, %v6856_v5  ;;  %v4495_v50 = vrot.slane %v4481_v36, %v6856_v5  ;;  %v4717_v26 = vrot.slane %v4695_v13, %v6856_v5  ;;  %v2345_v14 = vcombine.low %v10325_v54, %v10324_v6  ;;  %v176_v12 = vld [vmem:[%s6854_s27 + $0xf8] sm:$0xff]  ;;  %v10331_v13 = vld [vmem:[#allocation43_spill] sm:$0xff] }
 0x184   : > { %v9565_v25 = vsel %vm7184_vm14, %v1789_v62, %v1794_v22  ;;  %4140 = vrot.lane.b32.xlu1 %v3963_v63, %s6771_s29  ;;  %v4725_v33 = vcombine.low %v4703_v56, %v4710_v19  ;;  %v6045_v57 = vsel %vm6029_vm8, %v6018_v4, %v9199_v49  ;;  %v4885_v27 = vcombine.low %v9309_v21, %v10258_v37  ;;  %v10326_v21 = vld [vmem:[#allocation42_spill] sm:$0xff]  ;;  %v9613_v42 = vpop.permute.xlu0 %5807 }
 0x185   : > { %v4696_v43 = vcombine.low %v9409_v29, %v9565_v25  ;;  %v4496_v30 = vcombine.low %v4488_v35, %v4495_v50  ;;  %v6544_v29 = vcombine.high %v10261_v7, %v10260_v2  ;;  %6625 = vmatmul.mubr.msk.bf16.vlgmr.msra.gmra.mxu1 %vm6076_vm9, %v6045_v57  ;;  %v2359_v41 = vrot.slane %v2345_v14, %v6856_v5  ;;  %v10327_v4 = vld [vmem:[#allocation18_spill] sm:$0xff] }
 0x186   : > { %v4733_v52 = vrot.slane %v4725_v33, %v6856_v5  ;;  %v4986_v0 = vcombine.low %v9326_v23, %v9322_v34  ;;  %v4988_v49 = vcombine.low %v9319_v58, %v9543_v20  ;;  %6628 = vmatprep.mubr.msk.bf16.mxu1 %vm6779_vm7, %v10252_v15  ;;  %v4893_v2 = vrot.slane %v4885_v27, %v6856_v5  ;;  %v10328_v34 = vld [vmem:[#allocation47_spill] sm:$0xff]  ;;  %v10333_v50 = vld [vmem:[#allocation14_spill] sm:$0xff]  ;;  %v9642_v6 = vpop.permute.xlu1 %3134 }
 0x187   : > { %v4724_v24 = vrot.slane %v4696_v43, %v6856_v5  ;;  %4150 = vrot.lane.b32.xlu0 %v4112_v53, %s6771_s29  ;;  %v4900_v7 = vrot.slane %v6544_v29, %v6856_v5  ;;  %v2100_v9 = vcombine.low %v10327_v4, %v10326_v21  ;;  %v2360_v23 = vcombine.low %v10328_v34, %v2359_v41  ;;  %v10334_v27 = vld [vmem:[#allocation15_spill] sm:$0xff]  ;;  %v10335_v41 = vld [vmem:[#allocation61_spill] sm:$0xff] }
 0x188   : > { %4769 = vrot.lane.b32.xlu1 %v4496_v30, %s6776_s7  ;;  %v4995_v8 = vrot.slane %v4986_v0, %v6856_v5  ;;  %v9608_v47 = vrot.slane %v4988_v49, %v6856_v5  ;;  %v6035_v62 = vsel %vm6029_vm8, %v9517_v61, %v9248_v31  ;;  %v4901_v32 = vcombine.low %v4893_v2, %v9203_v40  ;;  %v175_v61 = vld [vmem:[%s6854_s27 + $0xf0] sm:$0xff]  ;;  %v10336_v0 = vld [vmem:[#allocation35_spill] sm:$0xff]  ;;  %v10338_v2 = vld [vmem:[#allocation62_spill] sm:$0xff]  ;;  %s6573_s27 = sshll.u32 %s6822_s0, 8 }
 0x189   : > { %v4726_v37 = vcombine.low %v4717_v26, %v4724_v24  ;;  %v4902_v59 = vcombine.low %v9206_v38, %v4900_v7  ;;  %v2114_v45 = vrot.slane %v2100_v9, %v6856_v5  ;;  %6605 = vmatmul.mubr.msk.bf16.gmra.mxu0 %vm6076_vm9, %v6035_v62  ;;  %v5170_v31 = vcombine.low %v10330_v60, %v10329_v10  ;;  %v9649_v24 = vpop.permute.xlu0 %3773 }
 0x18a   : > { %v5010_v22 = vcombine.low %v9330_v46, %v4995_v8  ;;  %v5011_v17 = vcombine.low %v9354_v28, %v9608_v47  ;;  %6608 = vmatprep.mubr.msk.bf16.mxu0 %vm6779_vm7, %v10252_v15  ;;  %v4909_v38 = vrot.slane %v4901_v32, %v6856_v5  ;;  %v10332_v28 = vld [vmem:[#allocation45_spill] sm:$0xff]  ;;  %v9640_v43 = vsel %vm5827_vm0, %v2360_v23, %v10333_v50 }
 0x18b   : > { %v4740_v55 = vrot.slane %v4726_v37, %v6856_v5  ;;  %v4916_v36 = vrot.slane %v4902_v59, %v6856_v5  ;;  %v2115_v63 = vcombine.low %v10331_v13, %v2114_v45  ;;  %v5171_v53 = vcombine.low %v10332_v28, %v10325_v54  ;;  %v10337_v37 = vld [vmem:[#allocation63_spill] sm:$0xff] }
 0x18c   : > { %v5018_v56 = vrot.slane %v5010_v22, %v6856_v5  ;;  %v5025_v19 = vrot.slane %v5011_v17, %v6856_v5  ;;  %v5178_v35 = vrot.slane %v5170_v31, %v6856_v5  ;;  %v192_v33 = vpack.c.bf16 %v176_v12, %v175_v61  ;;  %v9684_v61 = vpop.permute.xlu1 %3763 }
 0x18d   : > { %v4741_v40 = vcombine.low %v4733_v52, %v4740_v55  ;;  %v4917_v26 = vcombine.low %v4909_v38, %v4916_v36  ;;  %v5185_v57 = vrot.slane %v5171_v53, %v6856_v5  ;;  %v9647_v30 = vcombine.high %v9319_v58, %v9319_v58  ;;  %v9695_v13 = vpop.permute.xlu0 %4146 }
 0x18e   : > { %v5026_v14 = vcombine.low %v5018_v56, %v5025_v19  ;;  %v6512_v54 = vpack.c.bf16 %v176_v12, %v176_v12  ;;  %v5839_v29 = vsel %vm5827_vm0, %v2115_v63, %v10334_v27  ;;  %v1821_v52 = vrot.slane %v192_v33, %v6856_v5 }
 0x18f   : > { %4779 = vrot.lane.b32.xlu0 %v4741_v40, %s6776_s7  ;;  %5054 = vrot.lane.b32.xlu1 %v4917_v26, %s6770_s28  ;;  %v5447_v49 = vcombine.low %v10336_v0, %v10335_v41  ;;  %v5448_v7 = vcombine.low %v10338_v2, %v10337_v37  ;;  %v5186_v21 = vcombine.low %v5178_v35, %v5185_v57  ;;  %v1797_v34 = vshrl.u32 %v9543_v20, 16  ;;  %v10339_v37 = vld [vmem:[#allocation9_spill] sm:$0xff] }
 0x190   : > { %v1828_v4 = vrot.slane %v6512_v54, %v6856_v5  ;;  %v9662_v9 = vcombine.high %v9543_v20, %v9543_v20  ;;  %v1829_v23 = vcombine.high %v1821_v52, %v1821_v52  ;;  %v9667_v8 = vrot.slane %v1821_v52, %v6856_v5 }
 0x191   : > { %v5455_v62 = vrot.slane %v5447_v49, %v6856_v5  ;;  %v5462_v55 = vrot.slane %v5448_v7, %v6856_v5  ;;  %v1802_v45 = vshll.u32 %v9647_v30, 16  ;;  %v1805_v22 = vshrl.u32 %v9647_v30, 16 }
 0x192   : > { %v1830_v32 = vcombine.high %v1828_v4, %v1828_v4  ;;  %v9672_v59 = vrot.slane %v1828_v4, %v6856_v5  ;;  %v9678_v17 = vrot.slane %v1829_v23, %v6856_v5  ;;  %v1859_v10 = vcombine.high %v9667_v8, %v9667_v8 }
 0x193   : > { %5064 = vrot.lane.b32.xlu0 %v5026_v14, %s6770_s28  ;;  %5331 = vrot.lane.b32.xlu1 %v5186_v21, %s6772_s30  ;;  %v5263_v60 = vcombine.low %v9647_v30, %v9667_v8  ;;  %v5463_v31 = vcombine.low %v5455_v62, %v5462_v55  ;;  %v9691_v40 = vsel %vm7184_vm14, %v1797_v34, %v1802_v45  ;;  %v1810_v38 = vshll.u32 %v9662_v9, 16  ;;  %v9721_v21 = vpop.permute.xlu1 %4136  ;;  %v9730_v55 = vpop.permute.xlu0 %4775 }
 0x194   : > { %v9687_v12 = vrot.slane %v1830_v32, %v6856_v5  ;;  %v1864_v36 = vshrl.u32 %v9667_v8, 16  ;;  %v1861_v63 = vcombine.high %v9678_v17, %v9678_v17  ;;  %v5264_v56 = vcombine.low %v9678_v17, %v1859_v10 }
 0x195   : > { %v5272_v19 = vrot.slane %v5263_v60, %v6856_v5  ;;  %v1869_v28 = vshll.u32 %v9678_v17, 16  ;;  %v9704_v53 = vsel %vm7184_vm14, %v1805_v22, %v1810_v38  ;;  %v1872_v35 = vshrl.u32 %v9678_v17, 16 }
 0x196   : > { %v1877_v50 = vshll.u32 %v1859_v10, 16  ;;  %v1880_v26 = vshrl.u32 %v1859_v10, 16  ;;  %v5265_v33 = vcombine.low %v1861_v63, %v9672_v59  ;;  %v5279_v14 = vrot.slane %v5264_v56, %v6856_v5  ;;  %v10340_v10 = vld [vmem:[#allocation71_spill] sm:$0xff]  ;;  %v10341_v56 = vld [vmem:[#allocation21_spill] sm:$0xff] }
 0x197   : > { %v5287_v57 = vcombine.low %v9608_v47, %v5272_v19  ;;  %5624 = vrot.lane.b32.xlu1 %v5463_v31, %s6777_s8  ;;  %v1871_v54 = vsel %vm7184_vm14, %v1864_v36, %v1869_v28  ;;  %v1885_v52 = vshll.u32 %v1861_v63, 16  ;;  %v1888_v41 = vshrl.u32 %v1861_v63, 16 }
 0x198   : > { %v1879_v27 = vsel %vm7184_vm14, %v1872_v35, %v1877_v50  ;;  %v1893_v0 = vshll.u32 %v9672_v59, 16  ;;  %v5286_v49 = vrot.slane %v5265_v33, %v6856_v5  ;;  %v5875_v2 = vsel %vm5867_vm1, %v5839_v29, %v10339_v37 }
 0x199   : > { %v1896_v7 = vshrl.u32 %v9672_v59, 16  ;;  %v1901_v47 = vshll.u32 %v9687_v12, 16  ;;  %v1887_v4 = vsel %vm7184_vm14, %v1880_v26, %v1885_v52  ;;  %v5548_v23 = vcombine.low %v9565_v25, %v9691_v40 }
 0x19a   : > { %v1895_v34 = vsel %vm7184_vm14, %v1888_v41, %v1893_v0  ;;  %v5549_v62 = vcombine.low %v9704_v53, %v1871_v54  ;;  %v5288_v29 = vcombine.low %v5279_v14, %v5286_v49  ;;  %v5295_v32 = vrot.slane %v5287_v57, %v6856_v5  ;;  %v10342_v14 = vld [vmem:[#allocation17_spill] sm:$0xff]  ;;  %v10343_v0 = vld [vmem:[#allocation16_spill] sm:$0xff] }
 0x19b   : > { %v1903_v45 = vsel %vm7184_vm14, %v1896_v7, %v1901_v47  ;;  %v5550_v22 = vcombine.low %v1879_v27, %v1887_v4  ;;  %v5885_v60 = vsel %vm5867_vm1, %v9640_v43, %v10340_v10  ;;  %v5558_v38 = vrot.slane %v5548_v23, %v6856_v5  ;;  %v9759_v27 = vpop.permute.xlu1 %4765  ;;  %v10344_v7 = vld [vmem:[#allocation40_spill] sm:$0xff]  ;;  %v10345_v47 = vld [vmem:[#allocation39_spill] sm:$0xff] }
 0x19c   : > { %v5551_v31 = vcombine.low %v1895_v34, %v1903_v45  ;;  %v5565_v25 = vrot.slane %v5549_v62, %v6856_v5  ;;  %v5302_v36 = vrot.slane %v5288_v29, %v6856_v5  ;;  %v3125_v19 = vrot.slane %v10341_v56, %v6856_v5  ;;  %v10346_v62 = vld [vmem:[#allocation19_spill] sm:$0xff]  ;;  %v10348_v45 = vld [vmem:[#allocation41_spill] sm:$0xff] }
 0x19d   : > { %v5572_v63 = vrot.slane %v5550_v22, %v6856_v5  ;;  %v4113_v28 = vcombine.low %v9543_v20, %v9647_v30  ;;  %v5745_v43 = vcombine.low %v9662_v9, %v9678_v17  ;;  %v6549_v26 = vcombine.high %v9667_v8, %v9678_v17  ;;  %v9764_v17 = vpop.permute.xlu0 %5060 }
 0x19e   : > { %v5579_v35 = vrot.slane %v5551_v31, %v6856_v5  ;;  %v5580_v50 = vcombine.low %v5558_v38, %v5565_v25  ;;  %v5303_v33 = vcombine.low %v5295_v32, %v5302_v36  ;;  %v5902_v57 = vsel %vm5894_vm2, %v5875_v2, %v10342_v14  ;;  %3150 = vrot.lane.b32.xlu1 %v3125_v19, %s6775_s6  ;;  %v10347_v32 = vld [vmem:[#allocation64_spill] sm:$0xff]  ;;  %s6780_s6 = smov [#allocation4]  }
 0x19f   : > { %v9755_v54 = vrot.slane %v4113_v28, %v6856_v5  ;;  %v5747_v30 = vcombine.low %v9672_v59, %v9687_v12  ;;  %v5754_v41 = vrot.slane %v5745_v43, %v6856_v5  ;;  %v5761_v8 = vrot.slane %v6549_v26, %v6856_v5  ;;  %v10350_v28 = vld [vmem:[#allocation23_spill] sm:$0xff]  ;;  %v5051_v43 = vpop.permute.xlu1 %5050 }
 0x1a0   : > { %v5581_v52 = vcombine.low %v5572_v63, %v5579_v35  ;;  %v5588_v9 = vrot.slane %v5580_v50, %v6856_v5  ;;  %5341 = vrot.lane.b32.xlu0 %v5303_v33, %s6772_s30  ;;  %v5912_v49 = vsel %vm5894_vm2, %v5885_v60, %v10343_v0  ;;  %v3754_v2 = vrot.slane %v9451_v1, %v6856_v5  ;;  %v10349_v60 = vld [vmem:[#allocation58_spill] sm:$0xff] }
 0x1a1   : > { %v5768_v37 = vrot.slane %v5747_v30, %v6856_v5  ;;  %v5692_v4 = vcombine.low %v10345_v47, %v10344_v7  ;;  %v5769_v23 = vcombine.low %v9755_v54, %v5754_v41  ;;  %v5929_v29 = vsel %vm5921_vm3, %v5902_v57, %v10346_v62 }
 0x1a2   : > { %v5595_v34 = vrot.slane %v5581_v52, %v6856_v5  ;;  %v5693_v22 = vcombine.low %v10348_v45, %v10347_v32  ;;  %v5939_v31 = vsel %vm5921_vm3, %v5912_v49, %v10349_v60  ;;  %3779 = vrot.lane.b32.xlu1 %v3754_v2, %s6773_s4  ;;  %v5956_v38 = vsel %vm5948_vm4, %v5929_v29, %v9476_v3  ;;  %v10352_v2 = vld [vmem:[#allocation56_spill] sm:$0xff]  ;;  %v10355_v60 = vld [vmem:[#allocation55_spill] sm:$0xff]  ;;  %s6312_s4 = scalar_lea.sflag [#allocation5], %s136_s23 }
 0x1a3   : > { %v5770_v10 = vcombine.low %v5761_v8, %v5768_v37  ;;  %v5700_v1 = vrot.slane %v5692_v4, %v6856_v5  ;;  %v5777_v36 = vrot.slane %v5769_v23, %v6856_v5  ;;  %v4742_v56 = vcombine.low %v9691_v40, %v9704_v53  ;;  %v5338_v53 = vpop.permute.xlu0 %5337  ;;  %v10351_v37 = vld [vmem:[#allocation60_spill] sm:$0xff]  ;;  %v10354_v4 = vld [vmem:[#allocation50_spill] sm:$0xff]  ;;  %v5328_v23 = vpop.permute.xlu1 %5327 }
 0x1a4   : > { %v5596_v25 = vcombine.low %v5588_v9, %v5595_v34  ;;  %v5707_v63 = vrot.slane %v5693_v22, %v6856_v5  ;;  %v5966_v35 = vsel %vm5948_vm4, %v5939_v31, %v10350_v28  ;;  %v5983_v50 = vsel %vm5975_vm5, %v5956_v38, %v9521_v51 }
 0x1a5   : > { %v5784_v19 = vrot.slane %v5770_v10, %v6856_v5  ;;  %v4749_v3 = vrot.slane %v4742_v56, %v6856_v5  ;;  %v5993_v26 = vsel %vm5975_vm5, %v5966_v35, %v9486_v48  ;;  %v6548_v33 = vcombine.high %v9319_v58, %v9543_v20 }
 0x1a6   : > { %5634 = vrot.lane.b32.xlu0 %v5596_v25, %s6777_s8  ;;  %v1860_v40 = vcombine.high %v9672_v59, %v9672_v59  ;;  %v5708_v57 = vcombine.low %v5700_v1, %v5707_v63  ;;  %v6010_v51 = vsel %vm6002_vm6, %v5983_v50, %v9560_v39  ;;  %v1862_v30 = vcombine.high %v9687_v12, %v9687_v12  ;;  %v10356_v1 = vld [vmem:[#allocation54_spill] sm:$0xff] }
 0x1a7   : > { %v5785_v14 = vcombine.low %v5777_v36, %v5784_v19  ;;  %v4756_v52 = vrot.slane %v4749_v3, %v6856_v5  ;;  %v1904_v48 = vshrl.u32 %v9687_v12, 16  ;;  %v6020_v58 = vsel %vm6002_vm6, %v5993_v26, %v9527_v18  ;;  %v5621_v19 = vpop.permute.xlu1 %5620 }
 0x1a8   : > { %v5304_v9 = vcombine.low %v9687_v12, %v1860_v40  ;;  %v1909_v41 = vshll.u32 %v1860_v40, 16  ;;  %v1912_v20 = vshrl.u32 %v1860_v40, 16  ;;  %v1917_v8 = vshll.u32 %v1862_v30, 16 }
 0x1a9   : > { %v6550_v0 = vcombine.high %v9672_v59, %v9687_v12  ;;  %4781 = vrot.lane.b32.xlu1 %v4756_v52, %s6776_s7  ;;  %v2394_v7 = vcombine.low %v10352_v2, %v10351_v37  ;;  %v6047_v59 = vsel %vm6029_vm8, %v6020_v58, %v9569_v44  ;;  %v10353_v12 = vld [vmem:[#allocation51_spill] sm:$0xff]  ;;  %v6037_v32 = vsel %vm6029_vm8, %v6010_v51, %v9613_v42  ;;  %v10358_v58 = vld [vmem:[#allocation65_spill] sm:$0xff]  ;;  %s6711_s7 = sshll.u32 %s6780_s6, 4  ;;  %s6712_s7 = int_to_ptr.vmem [resolvable:$false] %s6711_s7 }
 0x1aa   : > { %5823 = vrot.lane.b32.xlu0 %v5785_v14, %s6774_s5  ;;  %v5311_v39 = vrot.slane %v5304_v9, %v6856_v5  ;;  %v1911_v49 = vsel %vm7184_vm14, %v1904_v48, %v1909_v41  ;;  %v1919_v18 = vsel %vm7184_vm14, %v1912_v20, %v1917_v8  ;;  %v2148_v34 = vcombine.low %v10354_v4, %v10353_v12  ;;  %v10357_v41 = vld [vmem:[#allocation57_spill] sm:$0xff]  ;;  %s6713_s0 = scalar_lea.vmem %s6712_s7, 512  ;;  %p6714_p0 = scmp.lt.s32.totalorder %s9956_s26, %s6712_s7 }
 0x1ab   : > { %v5793_v47 = vrot.slane %v6550_v0, %v6856_v5  ;;  %v2408_v29 = vrot.slane %v2394_v7, %v6856_v5  ;;  %6629 = vmatmul.mubr.msk.bf16.gmra.mxu1 %vm6076_vm9, %v6047_v59  ;;  %v4127_v45 = vrot.slane %v9755_v54, %v6856_v5  ;;  %v5034_v22 = vrot.slane %v6548_v33, %v6856_v5  ;;  %v3147_v14 = vpop.permute.xlu1 %3146  ;;  %v10360_v37 = vld [vmem:[#allocation49_spill] sm:$0xff] }
 0x1ac   : > { %v5318_v62 = vrot.slane %v5311_v39, %v6856_v5  ;;  %v2156_v44 = vrot.slane %v2148_v34, %v6856_v5  ;;  %6609 = vmatmul.mubr.msk.bf16.gmra.mxu0 %vm6076_vm9, %v6037_v32  ;;  %6632 = vmatprep.mubr.msk.bf16.mxu1 %vm6779_vm7, %v10252_v15  ;;  %v5597_v10 = vcombine.low %v1911_v49, %v1919_v18  ;;  %v10359_v49 = vld [vmem:[#allocation48_spill] sm:$0xff]  ;;  %v10361_v18 = vld [vmem:[#allocation59_spill] sm:$0xff] }
 0x1ad   : > { %v5631_v16 = vpop.permute.xlu0 %5630  ;;  %v5800_v42 = vrot.slane %v5793_v47, %v6856_v5  ;;  %v2409_v31 = vcombine.low %v10355_v60, %v2408_v29  ;;  %6612 = vmatprep.mubr.msk.bf16.mxu0 %vm6779_vm7, %v10252_v15  ;;  %v5041_v36 = vrot.slane %v5034_v22, %v6856_v5  ;;  %v2443_v20 = vcombine.low %v10358_v58, %v10357_v41  ;;  %v10362_v34 = vld [vmem:[#allocation72_spill] sm:$0xff] }
 0x1ae   : > { %5813 = vrot.lane.b32.xlu0 %v5708_v57, %s6774_s5  ;;  %5343 = vrot.lane.b32.xlu1 %v5318_v62, %s6772_s30  ;;  %v2164_v54 = vcombine.low %v2156_v44, %v10356_v1  ;;  %v5604_v28 = vrot.slane %v5597_v10, %v6856_v5  ;;  %v2197_v2 = vcombine.low %v10360_v37, %v10359_v49  ;;  %s6324_s30 = scalar_lea.hbm %s9997_s3, %s6573_s27 }
 0x1af   : > { %v5857_v38 = vsel %vm5827_vm0, %v2409_v31, %v9602_v11  ;;  %v2457_v39 = vrot.slane %v2443_v20, %v6856_v5  ;;  %v10368_v20 = vld [vmem:[#allocation12_spill] sm:$0xff] }
 0x1b0   : > { %v5842_v63 = vsel %vm5827_vm0, %v2164_v54, %v9642_v6  ;;  %v5887_v56 = vsel %vm5867_vm1, %v5857_v38, %v9649_v24  ;;  %v2205_v59 = vrot.slane %v2197_v2, %v6856_v5 }
 0x1b1   : > { %v5820_v25 = vpop.permute.xlu0 %5819  ;;  %v5877_v35 = vsel %vm5867_vm1, %v5842_v63, %v9684_v61  ;;  %v5914_v11 = vsel %vm5894_vm2, %v5887_v56, %v9695_v13  ;;  %v5611_v13 = vrot.slane %v5604_v28, %v6856_v5  ;;  %v2458_v47 = vcombine.low %v10361_v18, %v2457_v39 }
 0x1b2   : > { %4152 = vrot.lane.b32.xlu0 %v4127_v45, %s6771_s29  ;;  %5825 = vrot.lane.b32.xlu1 %v5800_v42, %s6774_s5  ;;  %v5904_v50 = vsel %vm5894_vm2, %v5877_v35, %v9721_v21  ;;  %v5941_v6 = vsel %vm5921_vm3, %v5914_v11, %v9730_v55  ;;  %s6707_s5 = scalar_lea.vmem %s9956_s26, 256 }
 0x1b3   : > { %v5931_v24 = vsel %vm5921_vm3, %v5904_v50, %v9759_v27  ;;  %v5968_v3 = vsel %vm5948_vm4, %v5941_v6, %v9764_v17  ;;  %v5860_v4 = vsel %vm5827_vm0, %v2458_v47, %v3147_v14  ;;  %p6708_p11 = scmp.ne.s32.totalorder %s9956_s26, %s6707_s5  ;;  %p6715_p1 = scmp.lt.s32.totalorder %s6713_s0, %s6707_s5 }
 0x1b4   : > { %v5958_v26 = vsel %vm5948_vm4, %v5931_v24, %v5051_v43  ;;  %v5995_v33 = vsel %vm5975_vm5, %v5968_v3, %v5338_v53  ;;  %v3137_v43 = vpop.permute.xlu1 %3136 }
 0x1b5   : > { %v5810_v61 = vpop.permute.xlu0 %5809  ;;  %v5985_v21 = vsel %vm5975_vm5, %v5958_v26, %v5328_v23  ;;  %v6022_v40 = vsel %vm6002_vm6, %v5995_v33, %v5631_v16  ;;  %v2213_v23 = vcombine.low %v2205_v59, %v10362_v34  ;;  %p6709_p12 = pnand %p6708_p11, %p6839_p5  ;;  %p6716_p2 = por %p6715_p1, %p6714_p0 }
 0x1b6   : > { %5066 = vrot.lane.b32.xlu0 %v5041_v36, %s6770_s28  ;;  %v6012_v55 = vsel %vm6002_vm6, %v5985_v21, %v5621_v19  ;;  %v6049_v27 = vsel %vm6029_vm8, %v6022_v40, %v5820_v25 }
 0x1b7   : > { %6633 = vmatmul.mubr.msk.bf16.gmra.mxu1 %vm6076_vm9, %v6049_v27  ;;  %v6039_v17 = vsel %vm6029_vm8, %v6012_v55, %v5810_v61  ;;  %v5845_v22 = vsel %vm5827_vm0, %v2213_v23, %v3137_v43  ;;  %v10363_v61 = vld [vmem:[#allocation81_spill] sm:$0xff]  ;;  %v10365_v27 = vld [vmem:[#allocation79_spill] sm:$0xff]  ;;  %p6710_p13 = pneg %p6709_p12 }
 0x1b8   : > { %6613 = vmatmul.mubr.msk.bf16.gmra.mxu0 %vm6076_vm9, %v6039_v17  ;;  %6636 = vmatprep.mubr.msk.bf16.mxu1 %vm6779_vm7, %v10252_v15  ;;  %v3766_v53 = vpop.permute.xlu1 %3765  ;;  %v10366_v17 = vld [vmem:[#allocation77_spill] sm:$0xff] }
 0x1b9   : > { %6616 = vmatprep.mubr.msk.bf16.mxu0 %vm6779_vm7, %v10252_v15  ;;  %v3776_v51 = vpop.permute.xlu0 %3775  ;;  %v5879_v10 = vsel %vm5867_vm1, %v5845_v22, %v3766_v53  ;;  %v2246_v43 = vcombine.low %v10366_v17, %v10365_v27  ;;  %p6717_p3 = pnand %p6716_p2, %p6710_p13 }
 0x1ba   : > { %5636 = vrot.lane.b32.xlu0 %v5611_v13, %s6777_s8  ;;  %v5889_v29 = vsel %vm5867_vm1, %v5860_v4, %v3776_v51  ;;  %v10364_v13 = vld [vmem:[#allocation78_spill] sm:$0xff] }
 0x1bb   : > { %v2491_v21 = vcombine.low %v10364_v13, %v10363_v61 }
 0x1bd   : > { %v2499_v14 = vrot.slane %v2491_v21, %v6856_v5 }
 0x1bf   : > { %v4139_v57 = vpop.permute.xlu1 %4138  ;;  %v4149_v52 = vpop.permute.xlu0 %4148 }
 0x1c0   : > { %v5916_v32 = vsel %vm5894_vm2, %v5889_v29, %v4149_v52  ;;  %v5906_v31 = vsel %vm5894_vm2, %v5879_v10, %v4139_v57  ;;  %v10367_v57 = vld [vmem:[#allocation7_spill] sm:$0xff] }
 0x1c1   : > { %v2507_v51 = vcombine.low %v2499_v14, %v10367_v57 }
 0x1c6   : > { %v4768_v30 = vpop.permute.xlu1 %4767 }
 0x1c7   : > { %v5933_v38 = vsel %vm5921_vm3, %v5906_v31, %v4768_v30  ;;  %v2254_v30 = vrot.slane %v2246_v43, %v6856_v5 }
 0x1cb   : > { %v4778_v48 = vpop.permute.xlu0 %4777 }
 0x1cc   : > { %v5943_v45 = vsel %vm5921_vm3, %v5916_v32, %v4778_v48 }
 0x1d0   : > { %v5053_v9 = vpop.permute.xlu1 %5052 }
 0x1d1   : > { %v5960_v36 = vsel %vm5948_vm4, %v5933_v38, %v5053_v9 }
 0x1d3   : > { %v5063_v0 = vpop.permute.xlu0 %5062 }
 0x1d4   : > { %v5330_v8 = vpop.permute.xlu1 %5329  ;;  %v5970_v44 = vsel %vm5948_vm4, %v5943_v45, %v5063_v0 }
 0x1d5   : > { %v5987_v63 = vsel %vm5975_vm5, %v5960_v36, %v5330_v8  ;;  %v2262_v8 = vcombine.low %v2254_v30, %v10368_v20 }
 0x1df   : > { %v5340_v12 = vpop.permute.xlu0 %5339 }
 0x1e0   : > { %v5997_v42 = vsel %vm5975_vm5, %v5970_v44, %v5340_v12  ;;  %v2522_v44 = vrot.slane %v9330_v46, %v6856_v5 }
 0x1e1   : > { %v5623_v7 = vpop.permute.xlu1 %5622 }
 0x1e2   : > { %v6014_v19 = vsel %vm6002_vm6, %v5987_v63, %v5623_v7 }
 0x1e6   : > { %v3149_v62 = vpop.permute.xlu1 %3148 }
 0x1e7   : > { %v5863_v58 = vsel %vm5827_vm0, %v2507_v51, %v3149_v62 }
 0x1e9   : > { %v5633_v16 = vpop.permute.xlu0 %5632 }
 0x1ea   : > { %v6024_v1 = vsel %vm6002_vm6, %v5997_v42, %v5633_v16 }
 0x1eb   : > { %v3139_v60 = vpop.permute.xlu1 %3138 }
 0x1ec   : > { %v5848_v18 = vsel %vm5827_vm0, %v2262_v8, %v3139_v60 }
 0x1ed   : > { %v5822_v54 = vpop.permute.xlu0 %5821 }
 0x1ee   : > { %v6051_v25 = vsel %vm6029_vm8, %v6024_v1, %v5822_v54 }
 0x1ef   : > { %6637 = vmatmul.mubr.msk.bf16.gmra.mxu1 %vm6076_vm9, %v6051_v25 }
 0x1f0   : > { %v3768_v56 = vpop.permute.xlu1 %3767  ;;  %6640 = vmatprep.mubr.msk.bf16.mxu1 %vm6779_vm7, %v10252_v15 }
 0x1f1   : > { %v5812_v28 = vpop.permute.xlu0 %5811  ;;  %v5881_v59 = vsel %vm5867_vm1, %v5848_v18, %v3768_v56 }
 0x1f2   : > { %v6041_v35 = vsel %vm6029_vm8, %v6014_v19, %v5812_v28 }
 0x1f3   : > { %6617 = vmatmul.mubr.msk.bf16.gmra.mxu0 %vm6076_vm9, %v6041_v35 }
 0x1f4   : > { %6620 = vmatprep.mubr.msk.bf16.mxu0 %vm6779_vm7, %v10252_v15 }
 0x1f5   : > { %v3778_v50 = vpop.permute.xlu0 %3777 }
 0x1f6   : > { %v4141_v11 = vpop.permute.xlu1 %4140  ;;  %v5891_v0 = vsel %vm5867_vm1, %v5863_v58, %v3778_v50 }
 0x1f7   : > { %v5908_v34 = vsel %vm5894_vm2, %v5881_v59, %v4141_v11 }
 0x1f9   : > { %v4151_v24 = vpop.permute.xlu0 %4150 }
 0x1fa   : > { %v4770_v6 = vpop.permute.xlu1 %4769  ;;  %v5918_v49 = vsel %vm5894_vm2, %v5891_v0, %v4151_v24 }
 0x1fb   : > { %v5935_v29 = vsel %vm5921_vm3, %v5908_v34, %v4770_v6 }
 0x201   : > { %v5055_v3 = vpop.permute.xlu1 %5054  ;;  %v4780_v33 = vpop.permute.xlu0 %4779 }
 0x202   : > { %v5945_v2 = vsel %vm5921_vm3, %v5918_v49, %v4780_v33  ;;  %v5962_v45 = vsel %vm5948_vm4, %v5935_v29, %v5055_v3 }
 0x205   : > { %v5332_v26 = vpop.permute.xlu1 %5331  ;;  %v5065_v55 = vpop.permute.xlu0 %5064 }
 0x206   : > { %v5972_v47 = vsel %vm5948_vm4, %v5945_v2, %v5065_v55  ;;  %v5989_v22 = vsel %vm5975_vm5, %v5962_v45, %v5332_v26 }
 0x209   : > { %v5625_v40 = vpop.permute.xlu1 %5624 }
 0x20a   : > { %v6016_v60 = vsel %vm6002_vm6, %v5989_v22, %v5625_v40 }
 0x20f   : > { %v6141_v53 = vpop.f32.mrf.mxu0 }
 0x210   : > { %v3151_v52 = vpop.permute.xlu1 %3150  ;;  %6245 = vxpose.xlu0.b32.start [1/16] (narrow) %v6141_v53, 8 }
 0x211   : > { %v6598_v48 = vpop.f32.mrf.mxu0  ;;  %v5866_v38 = vsel %vm5827_vm0, %v2522_v44, %v3151_v52 }
 0x212   : > { %v5342_v9 = vpop.permute.xlu0 %5341 }
 0x213   : > { %v6144_v41 = vpop.f32.mrf.mxu0  ;;  %v5999_v12 = vsel %vm5975_vm5, %v5972_v47, %v5342_v9 }
 0x214   : > { %6246 = vxpose.xlu0.b32.cont [2/16] (narrow) %v6144_v41, 8  ;;  %v3780_v7 = vpop.permute.xlu1 %3779 }
 0x215   : > { %v6599_v39 = vpop.f32.mrf.mxu0  ;;  %v5893_v25 = vsel %vm5867_vm1, %v5866_v38, %v3780_v7 }
 0x218   : > { %v5635_v37 = vpop.permute.xlu0 %5634 }
 0x219   : > { %v6026_v23 = vsel %vm6002_vm6, %v5999_v12, %v5635_v37 }
 0x21a   : > { %v6149_v4 = vpop.f32.mrf.mxu0 }
 0x21b   : > { %6247 = vxpose.xlu0.b32.cont [3/16] (narrow) %v6149_v4, 8  ;;  %v4782_v10 = vpop.permute.xlu1 %4781 }
 0x21c   : > { %v5824_v62 = vpop.permute.xlu0 %5823  ;;  %v6602_v16 = vpop.f32.mrf.mxu0 }
 0x21d   : > { %v6053_v32 = vsel %vm6029_vm8, %v6026_v23, %v5824_v62 }
 0x21e   : > { %6641 = vmatmul.mubr.msk.bf16.gmra.mxu1 %vm6076_vm9, %v6053_v32  ;;  %v6152_v42 = vpop.f32.mrf.mxu0 }
 0x21f   : > { %6644 = vmatprep.mubr.msk.bf16.mxu1 %vm6779_vm7, %v10252_v15  ;;  %6248 = vxpose.xlu0.b32.cont [4/16] (narrow) %v6152_v42, 8 }
 0x220   : > { %v5814_v31 = vpop.permute.xlu0 %5813  ;;  %v6603_v54 = vpop.f32.mrf.mxu0 }
 0x221   : > { %v6043_v1 = vsel %vm6029_vm8, %v6016_v60, %v5814_v31  ;;  %v5344_v46 = vpop.permute.xlu1 %5343 }
 0x222   : > { %6621 = vmatmul.mubr.msk.bf16.gmra.mxu0 %vm6076_vm9, %v6043_v1 }
 0x224   : > { %v4153_v36 = vpop.permute.xlu0 %4152 }
 0x225   : > { %v5920_v5 = vsel %vm5894_vm2, %v5893_v25, %v4153_v36  ;;  %v5826_v19 = vpop.permute.xlu1 %5825 }
 0x226   : > { %v5947_v15 = vsel %vm5921_vm3, %v5920_v5, %v4782_v10 }
 0x228   : > { %v5067_v63 = vpop.permute.xlu0 %5066 }
 0x229   : > { %v5974_v56 = vsel %vm5948_vm4, %v5947_v15, %v5067_v63 }
 0x22a   : > { %v6001_v28 = vsel %vm5975_vm5, %v5974_v56, %v5344_v46 }
 0x22c   : > { %v5637_v35 = vpop.permute.xlu0 %5636 }
 0x22d   : > { %v6028_v11 = vsel %vm6002_vm6, %v6001_v28, %v5637_v35 }
 0x22e   : > { %v6055_v50 = vsel %vm6029_vm8, %v6028_v11, %v5826_v19 }
 0x22f   : > { %6645 = vmatmul.mubr.msk.bf16.gmra.mxu1 %vm6076_vm9, %v6055_v50 }
 0x245   : > { %v6197_v6 = vpop.f32.mrf.mxu1 }
 0x247   : > { %v6626_v24 = vpop.f32.mrf.mxu1 }
 0x249   : > { %v6157_v3 = vpop.f32.mrf.mxu0  ;;  %v6200_v26 = vpop.f32.mrf.mxu1 }
 0x24a   : > { %6249 = vxpose.xlu0.b32.cont [5/16] (narrow) %v6157_v3, 8 }
 0x24b   : > { %v6606_v33 = vpop.f32.mrf.mxu0  ;;  %v6627_v61 = vpop.f32.mrf.mxu1 }
 0x24d   : > { %v6160_v13 = vpop.f32.mrf.mxu0 }
 0x24e   : > { %6250 = vxpose.xlu0.b32.cont [6/16] (narrow) %v6160_v13, 8 }
 0x24f   : > { %v6607_v21 = vpop.f32.mrf.mxu0 }
 0x26b   : > { %v6205_v40 = vpop.f32.mrf.mxu1 }
 0x26c   : > { %6277 = vxpose.xlu1.b32.start [1/9] (short) (narrow) %v6205_v40, 8  ;;  %v6165_v55 = vpop.f32.mrf.mxu0 }
 0x26d   : > { %v6630_v14 = vpop.f32.mrf.mxu1  ;;  %6251 = vxpose.xlu0.b32.cont [7/16] (narrow) %v6165_v55, 8 }
 0x26e   : > { %v6610_v27 = vpop.f32.mrf.mxu0 }
 0x26f   : > { %v6208_v17 = vpop.f32.mrf.mxu1 }
 0x270   : > { %6278 = vxpose.xlu1.b32.cont [2/9] (short) (narrow) %v6208_v17, 8  ;;  %v6168_v43 = vpop.f32.mrf.mxu0 }
 0x271   : > { %v6631_v53 = vpop.f32.mrf.mxu1  ;;  %6252 = vxpose.xlu0.b32.cont [8/16] (narrow) %v6168_v43, 8 }
 0x272   : > { %v6611_v57 = vpop.f32.mrf.mxu0 }
 0x277   : > { %v6213_v51 = vpop.f32.mrf.mxu1 }
 0x278   : > { %6279 = vxpose.xlu1.b32.cont [3/9] (short) (narrow) %v6213_v51, 8  ;;  %v6173_v30 = vpop.f32.mrf.mxu0 }
 0x279   : > { %v6634_v52 = vpop.f32.mrf.mxu1  ;;  %6253 = vxpose.xlu0.b32.cont [9/16] (narrow) %v6173_v30, 8 }
 0x27a   : > { %v6614_v9 = vpop.f32.mrf.mxu0 }
 0x27b   : > { %v6216_v48 = vpop.f32.mrf.mxu1 }
 0x27c   : > { %6280 = vxpose.xlu1.b32.cont [4/9] (short) (narrow) %v6216_v48, 8  ;;  %v6176_v41 = vpop.f32.mrf.mxu0 }
 0x27d   : > { %v6635_v58 = vpop.f32.mrf.mxu1  ;;  %6254 = vxpose.xlu0.b32.cont [10/16] (narrow) %v6176_v41, 8 }
 0x27e   : > { %v6615_v20 = vpop.f32.mrf.mxu0 }
 0x2af   : > { %v6221_v8 = vpop.f32.mrf.mxu1 }
 0x2b0   : > { %6281 = vxpose.xlu1.b32.cont [5/9] (short) (narrow) %v6221_v8, 8 }
 0x2b1   : > { %v6638_v0 = vpop.f32.mrf.mxu1 }
 0x2b3   : > { %v6181_v39 = vpop.f32.mrf.mxu0  ;;  %v6224_v49 = vpop.f32.mrf.mxu1 }
 0x2b4   : > { %6282 = vxpose.xlu1.b32.cont [6/9] (short) (narrow) %v6224_v49, 8  ;;  %6255 = vxpose.xlu0.b32.cont [11/16] (narrow) %v6181_v39, 8 }
 0x2b5   : > { %v6618_v37 = vpop.f32.mrf.mxu0  ;;  %v6639_v2 = vpop.f32.mrf.mxu1 }
 0x2b7   : > { %v6184_v7 = vpop.f32.mrf.mxu0 }
 0x2b8   : > { %6256 = vxpose.xlu0.b32.cont [12/16] (narrow) %v6184_v7, 8 }
 0x2b9   : > { %v6619_v18 = vpop.f32.mrf.mxu0 }
 0x2de   : > { %v6229_v47 = vpop.f32.mrf.mxu1 }
 0x2df   : > { %6283 = vxpose.xlu1.b32.cont [7/9] (short) (narrow) %v6229_v47, 8 }
 0x2e0   : > { %v6642_v59 = vpop.f32.mrf.mxu1 }
 0x2e2   : > { %v6189_v12 = vpop.f32.mrf.mxu0  ;;  %v6232_v4 = vpop.f32.mrf.mxu1 }
 0x2e3   : > { %6284 = vxpose.xlu1.b32.cont [8/9] (short) (narrow) %v6232_v4, 8  ;;  %6257 = vxpose.xlu0.b32.cont [13/16] (narrow) %v6189_v12, 8 }
 0x2e4   : > { %v6622_v34 = vpop.f32.mrf.mxu0  ;;  %v6643_v23 = vpop.f32.mrf.mxu1 }
 0x2e6   : > { %v6192_v62 = vpop.f32.mrf.mxu0 }
 0x2e7   : > { %6258 = vxpose.xlu0.b32.cont [14/16] (narrow) %v6192_v62, 8 }
 0x2e8   : > { %v6623_v29 = vpop.f32.mrf.mxu0 }
 0x2eb   : > { %6259 = vxpose.xlu0.b32.cont [15/16] (narrow) %v6197_v6, 8 }
 0x2ef   : > { %6260 = vxpose.xlu0.b32.end [16/16] (narrow) %v6200_v26, 8  ;;  %v6237_v32 = vpop.f32.mrf.mxu1 }
 0x2f0   : > { %v6244_v16 = vsel %vm6243_vm10, %v6237_v32, 0.0 }
 0x2f1   : > { %6285 = vxpose.xlu1.b32.end [9/9] (short) (narrow) %v6244_v16, 8  ;;  %v6646_v45 = vpop.f32.mrf.mxu1 }
 0x2f3   : > { %v6240_v22 = vpop.f32.mrf.mxu1 }
 0x2f5   : > { %v6647_v44 = vpop.f32.mrf.mxu1 }
 0x32f   : > { %v6261_v10 = vpop.trf.xlu0 }
 0x330   : > { %6309 = vst [vmem:[%s138_s25] sm:$0xff] %v6261_v10 }
 0x34d   : > { %v6293_v42 = vpop.trf.xlu1 }
 0x34e   : > { %6310 = vst [vmem:[%s138_s25 + $0x8] sm:$0xff] %v6293_v42 }
 0x34f   : > { %6720 = shalt.err (!%p6717_p3)
}
 0x350   : > { %s6721_s8 = scalar_lea.hbm %s6324_s30, 256  ;;  %s6725_s11 = scalar_lea.hbm %s9997_s3, 512 }
 0x351   : > { %p6722_p4 = scmp.ne.s32.totalorder %s6324_s30, %s6721_s8  ;;  %p6726_p9 = scmp.lt.s32.totalorder %s6324_s30, %s9997_s3 }
 0x352   : > { %p6727_p10 = scmp.lt.s32.totalorder %s6725_s11, %s6721_s8 }
 0x353   : > { %p6723_p7 = pnand %p6722_p4, %p6839_p5 }
 0x354   : > { %p6728_p11 = por %p6727_p10, %p6726_p9 }
 0x355   : > { %p6724_p8 = pneg %p6723_p7 }
 0x357   : > { %p6729_p12 = pnand %p6728_p11, %p6724_p8 }
 0x359   : > { %6732 = shalt.err (!%p6729_p12)
}
 0x35a   : > { %6654 = dma.vmem_to_hbm [thread:$0]  (%p6839_p5), %s9956_s26, 256, %s6324_s30, %s6312_s4  }
 0x35b PF: > { %p6660_p13 = scmp.ge.s32.totalorder %s6767_s15, 2  ;;  %s6338_s19 = sand.u32 1, %s6755_s12  }
 0x35c   : > { %s6339_s23 = scalar_lea.sflag [#allocation5], %s6338_s19 }
 0x35d   : > { %p6657_p0 = pnand %p6660_p13, %p6843_p6 }
 0x35f   : > { %p6658_p1 = pneg %p6657_p0 }
 0x361   : > { %6750 = dma.done.wait (%p6658_p1), %s6339_s23, 256  }
 0x362   : > { %6752 = vsyncadd (%p6658_p1), %s6339_s23, 4294967040  ;;  %p14_p2 = scmp.ge.s32.totalorder %s6826_s17, 4   ;;  %s10369_s12 = smov %s6759_s13 }
 0x363   : > { %s10370_s13 = smov %s6763_s14  ;;  %s10371_s14 = smov %s6837_s20 }
 0x364   : > { %s10372_s15 = smov %s6826_s17  ;;  %16 = sbr.rel (!%p14_p2) target bundleno = 3 (0x3), region = 63 }
 0x369   :  { %6344 = vsyncpa [#allocation5], 1 }
 0x36a   :  { %6346 = vsyncpa [#allocation5 + $0x1], 1 }

</bundles_post_ra>
